<compile_context>
chip_gen: v5e
topology: v5e:2x2
jax: 0.10.0
libtpu: 0.0.40
codegen_flags: <defaults>
</compile_context>

<pallas_src>
import jax
import jax.numpy as jnp
from jax import lax
from jax.experimental import pallas as pl
from jax.experimental.pallas import tpu as pltpu
import numpy as np

NEG_SLOPE = 0.01  # nn.LeakyReLU default negative slope


# ----------------------------- Pallas kernel --------------------------------
def lstm_critic_kernel(obs_ref, act_ref,                  # (T*Bp, D), (Bp, A)
                       wt_ref, bt_ref,                    # trunk: (D, hid), (1, hid)
                       wih_ref, bl_ref, whh_ref,          # LSTM: (hid,4Hp),(1,4Hp),(Hp,4Hp)
                       w1h1_ref, w1a1_ref, b11_ref,       # Q1 L1: (Hp,hid),(A,hid),(1,hid)
                       w21_ref, b21_ref,                  # Q1 L2: (hid,hid),(1,hid)
                       w31_ref, b31_ref,                  # Q1 L3: (hid,128),(1,128)  lane-padded
                       w1h2_ref, w1a2_ref, b12_ref,       # Q2 (same shapes as Q1)
                       w22_ref, b22_ref,
                       w32_ref, b32_ref,
                       q1_ref, q2_ref,                    # outputs: (Bp, 128) each
                       xp_ref):                           # scratch: (T*Bp, 4Hp)
    Bp = act_ref.shape[0]
    Hp = whh_ref.shape[0]
    T = obs_ref.shape[0] // Bp

    # ---- hoisted batched precompute: trunk + input-gate projection, all t ----
    x = obs_ref[...]                                                     # (T*Bp, D)
    z = jnp.dot(x, wt_ref[...], preferred_element_type=jnp.float32) + bt_ref[...]
    z = jnp.where(z > 0.0, z, NEG_SLOPE * z)                             # LeakyReLU
    xp_ref[...] = (jnp.dot(z, wih_ref[...], preferred_element_type=jnp.float32)
                   + bl_ref[...])                                        # (T*Bp, 4Hp)

    whh = whh_ref[...]                                                   # resident weight
    h = jnp.zeros((Bp, Hp), jnp.float32)
    c = jnp.zeros((Bp, Hp), jnp.float32)

    # ---- fully unrolled recurrence (T static & small): only the h-dependent
    #      matmul + gate elementwise math stays on the serial critical path ----
    for t in range(T):
        gates = xp_ref[pl.ds(t * Bp, Bp), :] + jnp.dot(
            h, whh, preferred_element_type=jnp.float32)                  # (Bp, 4Hp)
        i_g = jax.nn.sigmoid(gates[:, 0:Hp])          # full 128-lane tiles
        f_g = jax.nn.sigmoid(gates[:, Hp:2 * Hp])
        g_g = jnp.tanh(gates[:, 2 * Hp:3 * Hp])
        o_g = jax.nn.sigmoid(gates[:, 3 * Hp:4 * Hp])
        c = f_g * c + i_g * g_g
        h = o_g * jnp.tanh(c)

    h = jnp.maximum(h, 0.0)                                              # ReLU
    act = act_ref[...]

    # cat([h, action]) @ W1 is implemented as two matmuls (h part + action part)
    def q_head(w1h, w1a, b1, w2, b2, w3, b3):
        z1 = (jnp.dot(h, w1h, preferred_element_type=jnp.float32)
              + jnp.dot(act, w1a, preferred_element_type=jnp.float32) + b1)
        z1 = jnp.maximum(z1, 0.0)
        z2 = jnp.maximum(jnp.dot(z1, w2, preferred_element_type=jnp.float32) + b2, 0.0)
        return jnp.dot(z2, w3, preferred_element_type=jnp.float32) + b3

    q1_ref[...] = q_head(w1h1_ref[...], w1a1_ref[...], b11_ref[...],
                         w21_ref[...], b21_ref[...], w31_ref[...], b31_ref[...])
    q2_ref[...] = q_head(w1h2_ref[...], w1a2_ref[...], b12_ref[...],
                         w22_ref[...], b22_ref[...], w32_ref[...], b32_ref[...])


# ----------------------------- param padding ---------------------------------
def _pad_params(params, H, Hp):
    """Pad LSTM hidden dim to Hp per gate block; pad Q3 output to 128 lanes."""
    padc = Hp - H

    def pad_gate_cols(w):  # (in, 4H) -> (in, 4Hp), zero-pad each gate block
        blocks = [w[:, k * H:(k + 1) * H] for k in range(4)]
        return jnp.concatenate(
            [jnp.pad(b, ((0, 0), (0, padc))) for b in blocks], axis=1)

    p = {"wt": params["wt"], "bt": params["bt"]}
    p["wih"] = pad_gate_cols(params["wih"])                      # (hid, 4Hp)
    p["bl"] = pad_gate_cols(params["bl"])                        # (1, 4Hp)
    p["whh"] = jnp.pad(pad_gate_cols(params["whh"]),
                       ((0, padc), (0, 0)))                      # (Hp, 4Hp)
    for q in ("q1", "q2"):
        w1 = params[f"{q}_w1"]                                   # (H + A, hid)
        p[f"{q}_w1h"] = jnp.pad(w1[:H], ((0, padc), (0, 0)))     # (Hp, hid)
        p[f"{q}_w1a"] = w1[H:]                                   # (A, hid)
        p[f"{q}_b1"] = params[f"{q}_b1"]
        p[f"{q}_w2"] = params[f"{q}_w2"]
        p[f"{q}_b2"] = params[f"{q}_b2"]
        p[f"{q}_w3"] = jnp.pad(params[f"{q}_w3"], ((0, 0), (0, 127)))  # (hid, 128)
        p[f"{q}_b3"] = jnp.pad(params[f"{q}_b3"], ((0, 0), (0, 127)))  # (1, 128)
    return p


# ------------------------------- wrapper --------------------------------------
def lstm_critic_forward(obs, action, params):
    """obs: (B, T, input_size); action: (B, action_size).
    Returns (q1, q2), each (B, 1)."""
    B, T, D = obs.shape
    A = action.shape[1]
    H = params["whh"].shape[0]

    Bp = ((B + 7) // 8) * 8              # pad batch to sublane multiple
    Hp = ((H + 127) // 128) * 128        # pad LSTM hidden to full lane tile(s)

    p = _pad_params(params, H, Hp)

    obs_p = jnp.zeros((Bp, T, D), jnp.float32).at[:B].set(obs.astype(jnp.float32))
    act_p = jnp.zeros((Bp, A), jnp.float32).at[:B].set(action.astype(jnp.float32))
    obs2d = jnp.transpose(obs_p, (1, 0, 2)).reshape(T * Bp, D)   # time-major slab

    kernel_inputs = (
        obs2d, act_p,
        p["wt"], p["bt"],
        p["wih"], p["bl"], p["whh"],
        p["q1_w1h"], p["q1_w1a"], p["q1_b1"], p["q1_w2"], p["q1_b2"], p["q1_w3"], p["q1_b3"],
        p["q2_w1h"], p["q2_w1a"], p["q2_b1"], p["q2_w2"], p["q2_b2"], p["q2_w3"], p["q2_b3"],
    )

    vmem = pl.BlockSpec(memory_space=pltpu.MemorySpace.VMEM)

    q1, q2 = pl.pallas_call(
        lstm_critic_kernel,
        out_shape=(jax.ShapeDtypeStruct((Bp, 128), jnp.float32),
                   jax.ShapeDtypeStruct((Bp, 128), jnp.float32)),
        in_specs=[vmem] * len(kernel_inputs),
        out_specs=(vmem, vmem),
        scratch_shapes=[pltpu.VMEM((T * Bp, 4 * Hp), jnp.float32)],
    )(*kernel_inputs)

    return q1[:B, :1], q2[:B, :1]


# --------------------------- pure-JAX reference -------------------------------
def reference_forward(obs, action, params):
    B, T, D = obs.shape
    H = params["whh"].shape[0]
    z = obs @ params["wt"] + params["bt"]                 # (B, T, hid)
    z = jnp.where(z > 0.0, z, NEG_SLOPE * z)              # LeakyReLU
    h = jnp.zeros((B, H), jnp.float32)
    c = jnp.zeros((B, H), jnp.float32)
    for t in range(T):
        gates = z[:, t, :] @ params["wih"] + h @ params["whh"] + params["bl"]
        i_g = jax.nn.sigmoid(gates[:, 0:H])
        f_g = jax.nn.sigmoid(gates[:, H:2 * H])
        g_g = jnp.tanh(gates[:, 2 * H:3 * H])
        o_g = jax.nn.sigmoid(gates[:, 3 * H:4 * H])
        c = f_g * c + i_g * g_g
        h = o_g * jnp.tanh(c)
    h = jnp.maximum(h, 0.0)
    ha = jnp.concatenate([h, action], axis=-1)

    def q(prefix):
        z1 = jnp.maximum(ha @ params[f"{prefix}_w1"] + params[f"{prefix}_b1"], 0.0)
        z2 = jnp.maximum(z1 @ params[f"{prefix}_w2"] + params[f"{prefix}_b2"], 0.0)
        return z2 @ params[f"{prefix}_w3"] + params[f"{prefix}_b3"]

    return q("q1"), q("q2")


# ----------------------------- param init ------------------------------------
def init_params(key, input_size, feature_dim, hidden_size, action_size):
    ks = jax.random.split(key, 12)

    def lin(k, fan_in, fan_out):  # PyTorch Linear-style U(-1/sqrt(in), 1/sqrt(in))
        bound = 1.0 / np.sqrt(fan_in)
        kw, kb = jax.random.split(k)
        w = jax.random.uniform(kw, (fan_in, fan_out), jnp.float32, -bound, bound)
        b = jax.random.uniform(kb, (1, fan_out), jnp.float32, -bound, bound)
        return w, b

    p = {}
    p["wt"], p["bt"] = lin(ks[0], input_size, hidden_size)

    bound = 1.0 / np.sqrt(feature_dim)
    p["wih"] = jax.random.uniform(ks[1], (hidden_size, 4 * feature_dim),
                                  jnp.float32, -bound, bound)
    p["whh"] = jax.random.uniform(ks[2], (feature_dim, 4 * feature_dim),
                                  jnp.float32, -bound, bound)
    bih = jax.random.uniform(ks[3], (1, 4 * feature_dim), jnp.float32, -bound, bound)
    bhh = jax.random.uniform(ks[4], (1, 4 * feature_dim), jnp.float32, -bound, bound)
    p["bl"] = bih + bhh

    for i, q in enumerate(("q1", "q2")):
        p[f"{q}_w1"], p[f"{q}_b1"] = lin(ks[5 + 3 * i], feature_dim + action_size, hidden_size)
        p[f"{q}_w2"], p[f"{q}_b2"] = lin(ks[6 + 3 * i], hidden_size, hidden_size)
        p[f"{q}_w3"], p[f"{q}_b3"] = lin(ks[7 + 3 * i], hidden_size, 1)
    return p


# --------------------------------- main ---------------------------------------
if __name__ == "__main__":
    B, T = 4, 8
    input_size, feature_dim, hidden_size, action_size = 24, 32, 32, 6

    key = jax.random.PRNGKey(0)
    k_obs, k_act, k_par = jax.random.split(key, 3)
    obs = jax.random.normal(k_obs, (B, T, input_size), jnp.float32)
    action = jax.random.normal(k_act, (B, action_size), jnp.float32)
    params = init_params(k_par, input_size, feature_dim, hidden_size, action_size)

    q1, q2 = jax.block_until_ready(lstm_critic_forward(obs, action, params))

    q1_ref, q2_ref = reference_forward(obs, action, params)
    np.testing.assert_allclose(np.asarray(q1), np.asarray(q1_ref), atol=2e-4, rtol=2e-4)
    np.testing.assert_allclose(np.asarray(q2), np.asarray(q2_ref), atol=2e-4, rtol=2e-4)

    print("KERNEL_OK")
</pallas_src>

<mosaic_0001>
module attributes {stable_mosaic.version = 11 : i64} {
  func.func @lstm_critic_kernel(%arg0: memref<64x24xf32, #tpu.memory_space<vmem>>, %arg1: memref<8x6xf32, #tpu.memory_space<vmem>>, %arg2: memref<24x32xf32, #tpu.memory_space<vmem>>, %arg3: memref<1x32xf32, #tpu.memory_space<vmem>>, %arg4: memref<32x512xf32, #tpu.memory_space<vmem>>, %arg5: memref<1x512xf32, #tpu.memory_space<vmem>>, %arg6: memref<128x512xf32, #tpu.memory_space<vmem>>, %arg7: memref<128x32xf32, #tpu.memory_space<vmem>>, %arg8: memref<6x32xf32, #tpu.memory_space<vmem>>, %arg9: memref<1x32xf32, #tpu.memory_space<vmem>>, %arg10: memref<32x32xf32, #tpu.memory_space<vmem>>, %arg11: memref<1x32xf32, #tpu.memory_space<vmem>>, %arg12: memref<32x128xf32, #tpu.memory_space<vmem>>, %arg13: memref<1x128xf32, #tpu.memory_space<vmem>>, %arg14: memref<128x32xf32, #tpu.memory_space<vmem>>, %arg15: memref<6x32xf32, #tpu.memory_space<vmem>>, %arg16: memref<1x32xf32, #tpu.memory_space<vmem>>, %arg17: memref<32x32xf32, #tpu.memory_space<vmem>>, %arg18: memref<1x32xf32, #tpu.memory_space<vmem>>, %arg19: memref<32x128xf32, #tpu.memory_space<vmem>>, %arg20: memref<1x128xf32, #tpu.memory_space<vmem>>, %arg21: memref<8x128xf32, #tpu.memory_space<vmem>>, %arg22: memref<8x128xf32, #tpu.memory_space<vmem>>, %arg23: memref<64x512xf32, #tpu.memory_space<vmem>>) attributes {dimension_semantics = [], scalar_prefetch = 0 : i64, scratch_operands = 1 : i64, tpu.core_type = #tpu.core_type<tc>} {
    %c0 = arith.constant 0 : index
    %c0_0 = arith.constant 0 : index
    %0 = vector.load %arg0[%c0, %c0_0] : memref<64x24xf32, #tpu.memory_space<vmem>>, vector<64x24xf32>
    %c0_1 = arith.constant 0 : index
    %c0_2 = arith.constant 0 : index
    %1 = vector.load %arg2[%c0_1, %c0_2] : memref<24x32xf32, #tpu.memory_space<vmem>>, vector<24x32xf32>
    %cst = arith.constant dense<0.000000e+00> : vector<64x32xf32>
    %2 = tpu.matmul %0, %1, %cst {dimension_numbers = #tpu.dot_dimension_numbers<[1], [0], [0], [1], [0, 0, 1, 1], [], []>} : vector<64x24xf32>, vector<24x32xf32>, vector<64x32xf32> -> vector<64x32xf32>
    %c0_3 = arith.constant 0 : index
    %c0_4 = arith.constant 0 : index
    %3 = vector.load %arg3[%c0_3, %c0_4] : memref<1x32xf32, #tpu.memory_space<vmem>>, vector<1x32xf32>
    %4 = vector.broadcast %3 : vector<1x32xf32> to vector<64x32xf32>
    %5 = arith.addf %2, %4 : vector<64x32xf32>
    %cst_5 = arith.constant 0.000000e+00 : f32
    %6 = vector.broadcast %cst_5 : f32 to vector<64x32xf32>
    %7 = arith.cmpf ogt, %5, %6 : vector<64x32xf32>
    %cst_6 = arith.constant 0.00999999977 : f32
    %8 = vector.broadcast %cst_6 : f32 to vector<64x32xf32>
    %9 = arith.mulf %8, %5 : vector<64x32xf32>
    %10 = arith.select %7, %5, %9 : vector<64x32xi1>, vector<64x32xf32>
    %c0_7 = arith.constant 0 : index
    %c0_8 = arith.constant 0 : index
    %11 = vector.load %arg4[%c0_7, %c0_8] : memref<32x512xf32, #tpu.memory_space<vmem>>, vector<32x512xf32>
    %cst_9 = arith.constant dense<0.000000e+00> : vector<64x512xf32>
    %12 = tpu.matmul %10, %11, %cst_9 {dimension_numbers = #tpu.dot_dimension_numbers<[1], [0], [0], [1], [0, 0, 1, 1], [], []>} : vector<64x32xf32>, vector<32x512xf32>, vector<64x512xf32> -> vector<64x512xf32>
    %c0_10 = arith.constant 0 : index
    %c0_11 = arith.constant 0 : index
    %13 = vector.load %arg5[%c0_10, %c0_11] : memref<1x512xf32, #tpu.memory_space<vmem>>, vector<1x512xf32>
    %14 = vector.broadcast %13 : vector<1x512xf32> to vector<64x512xf32>
    %15 = arith.addf %12, %14 : vector<64x512xf32>
    %c0_12 = arith.constant 0 : index
    %c0_13 = arith.constant 0 : index
    %16 = vector.load %arg23[%c0_12, %c0_13] : memref<64x512xf32, #tpu.memory_space<vmem>>, vector<64x512xf32>
    tpu.vector_store %arg23[%c0_12, %c0_13], %15 {strides = array<i32>} : memref<64x512xf32, #tpu.memory_space<vmem>>, vector<64x512xf32>,
    %c0_14 = arith.constant 0 : index
    %c0_15 = arith.constant 0 : index
    %17 = vector.load %arg6[%c0_14, %c0_15] : memref<128x512xf32, #tpu.memory_space<vmem>>, vector<128x512xf32>
    %cst_16 = arith.constant 0.000000e+00 : f32
    %18 = vector.broadcast %cst_16 : f32 to vector<8x128xf32>
    %cst_17 = arith.constant 0.000000e+00 : f32
    %19 = vector.broadcast %cst_17 : f32 to vector<8x128xf32>
    %c0_18 = arith.constant 0 : index
    %c0_19 = arith.constant 0 : index
    %20 = vector.load %arg23[%c0_18, %c0_19] : memref<64x512xf32, #tpu.memory_space<vmem>>, vector<8x512xf32>
    %cst_20 = arith.constant dense<0.000000e+00> : vector<8x512xf32>
    %21 = tpu.matmul %18, %17, %cst_20 {dimension_numbers = #tpu.dot_dimension_numbers<[1], [0], [0], [1], [0, 0, 1, 1], [], []>} : vector<8x128xf32>, vector<128x512xf32>, vector<8x512xf32> -> vector<8x512xf32>
    %22 = arith.addf %20, %21 : vector<8x512xf32>
    %23 = vector.extract_strided_slice %22 {offsets = [0, 0], sizes = [8, 128], strides = [1, 1]} : vector<8x512xf32> to vector<8x128xf32>
    %24 = arith.negf %23 : vector<8x128xf32>
    %25 = math.exp %24 : vector<8x128xf32>
    %cst_21 = arith.constant 1.000000e+00 : f32
    %26 = vector.broadcast %cst_21 : f32 to vector<8x128xf32>
    %27 = arith.addf %26, %25 : vector<8x128xf32>
    %28 = arith.divf %26, %27 : vector<8x128xf32>
    %29 = vector.extract_strided_slice %22 {offsets = [0, 128], sizes = [8, 128], strides = [1, 1]} : vector<8x512xf32> to vector<8x128xf32>
    %30 = arith.negf %29 : vector<8x128xf32>
    %31 = math.exp %30 : vector<8x128xf32>
    %cst_22 = arith.constant 1.000000e+00 : f32
    %32 = vector.broadcast %cst_22 : f32 to vector<8x128xf32>
    %33 = arith.addf %32, %31 : vector<8x128xf32>
    %34 = arith.divf %32, %33 : vector<8x128xf32>
    %35 = vector.extract_strided_slice %22 {offsets = [0, 256], sizes = [8, 128], strides = [1, 1]} : vector<8x512xf32> to vector<8x128xf32>
    %36 = math.tanh %35 : vector<8x128xf32>
    %37 = vector.extract_strided_slice %22 {offsets = [0, 384], sizes = [8, 128], strides = [1, 1]} : vector<8x512xf32> to vector<8x128xf32>
    %38 = arith.negf %37 : vector<8x128xf32>
    %39 = math.exp %38 : vector<8x128xf32>
    %cst_23 = arith.constant 1.000000e+00 : f32
    %40 = vector.broadcast %cst_23 : f32 to vector<8x128xf32>
    %41 = arith.addf %40, %39 : vector<8x128xf32>
    %42 = arith.divf %40, %41 : vector<8x128xf32>
    %43 = arith.mulf %34, %19 : vector<8x128xf32>
    %44 = arith.mulf %28, %36 : vector<8x128xf32>
    %45 = arith.addf %43, %44 : vector<8x128xf32>
    %46 = math.tanh %45 : vector<8x128xf32>
    %47 = arith.mulf %42, %46 : vector<8x128xf32>
    %c8 = arith.constant 8 : index
    %c0_24 = arith.constant 0 : index
    %48 = vector.load %arg23[%c8, %c0_24] : memref<64x512xf32, #tpu.memory_space<vmem>>, vector<8x512xf32>
    %cst_25 = arith.constant dense<0.000000e+00> : vector<8x512xf32>
    %49 = tpu.matmul %47, %17, %cst_25 {dimension_numbers = #tpu.dot_dimension_numbers<[1], [0], [0], [1], [0, 0, 1, 1], [], []>} : vector<8x128xf32>, vector<128x512xf32>, vector<8x512xf32> -> vector<8x512xf32>
    %50 = arith.addf %48, %49 : vector<8x512xf32>
    %51 = vector.extract_strided_slice %50 {offsets = [0, 0], sizes = [8, 128], strides = [1, 1]} : vector<8x512xf32> to vector<8x128xf32>
    %52 = arith.negf %51 : vector<8x128xf32>
    %53 = math.exp %52 : vector<8x128xf32>
    %cst_26 = arith.constant 1.000000e+00 : f32
    %54 = vector.broadcast %cst_26 : f32 to vector<8x128xf32>
    %55 = arith.addf %54, %53 : vector<8x128xf32>
    %56 = arith.divf %54, %55 : vector<8x128xf32>
    %57 = vector.extract_strided_slice %50 {offsets = [0, 128], sizes = [8, 128], strides = [1, 1]} : vector<8x512xf32> to vector<8x128xf32>
    %58 = arith.negf %57 : vector<8x128xf32>
    %59 = math.exp %58 : vector<8x128xf32>
    %cst_27 = arith.constant 1.000000e+00 : f32
    %60 = vector.broadcast %cst_27 : f32 to vector<8x128xf32>
    %61 = arith.addf %60, %59 : vector<8x128xf32>
    %62 = arith.divf %60, %61 : vector<8x128xf32>
    %63 = vector.extract_strided_slice %50 {offsets = [0, 256], sizes = [8, 128], strides = [1, 1]} : vector<8x512xf32> to vector<8x128xf32>
    %64 = math.tanh %63 : vector<8x128xf32>
    %65 = vector.extract_strided_slice %50 {offsets = [0, 384], sizes = [8, 128], strides = [1, 1]} : vector<8x512xf32> to vector<8x128xf32>
    %66 = arith.negf %65 : vector<8x128xf32>
    %67 = math.exp %66 : vector<8x128xf32>
    %cst_28 = arith.constant 1.000000e+00 : f32
    %68 = vector.broadcast %cst_28 : f32 to vector<8x128xf32>
    %69 = arith.addf %68, %67 : vector<8x128xf32>
    %70 = arith.divf %68, %69 : vector<8x128xf32>
    %71 = arith.mulf %62, %45 : vector<8x128xf32>
    %72 = arith.mulf %56, %64 : vector<8x128xf32>
    %73 = arith.addf %71, %72 : vector<8x128xf32>
    %74 = math.tanh %73 : vector<8x128xf32>
    %75 = arith.mulf %70, %74 : vector<8x128xf32>
    %c16 = arith.constant 16 : index
    %c0_29 = arith.constant 0 : index
    %76 = vector.load %arg23[%c16, %c0_29] : memref<64x512xf32, #tpu.memory_space<vmem>>, vector<8x512xf32>
    %cst_30 = arith.constant dense<0.000000e+00> : vector<8x512xf32>
    %77 = tpu.matmul %75, %17, %cst_30 {dimension_numbers = #tpu.dot_dimension_numbers<[1], [0], [0], [1], [0, 0, 1, 1], [], []>} : vector<8x128xf32>, vector<128x512xf32>, vector<8x512xf32> -> vector<8x512xf32>
    %78 = arith.addf %76, %77 : vector<8x512xf32>
    %79 = vector.extract_strided_slice %78 {offsets = [0, 0], sizes = [8, 128], strides = [1, 1]} : vector<8x512xf32> to vector<8x128xf32>
    %80 = arith.negf %79 : vector<8x128xf32>
    %81 = math.exp %80 : vector<8x128xf32>
    %cst_31 = arith.constant 1.000000e+00 : f32
    %82 = vector.broadcast %cst_31 : f32 to vector<8x128xf32>
    %83 = arith.addf %82, %81 : vector<8x128xf32>
    %84 = arith.divf %82, %83 : vector<8x128xf32>
    %85 = vector.extract_strided_slice %78 {offsets = [0, 128], sizes = [8, 128], strides = [1, 1]} : vector<8x512xf32> to vector<8x128xf32>
    %86 = arith.negf %85 : vector<8x128xf32>
    %87 = math.exp %86 : vector<8x128xf32>
    %cst_32 = arith.constant 1.000000e+00 : f32
    %88 = vector.broadcast %cst_32 : f32 to vector<8x128xf32>
    %89 = arith.addf %88, %87 : vector<8x128xf32>
    %90 = arith.divf %88, %89 : vector<8x128xf32>
    %91 = vector.extract_strided_slice %78 {offsets = [0, 256], sizes = [8, 128], strides = [1, 1]} : vector<8x512xf32> to vector<8x128xf32>
    %92 = math.tanh %91 : vector<8x128xf32>
    %93 = vector.extract_strided_slice %78 {offsets = [0, 384], sizes = [8, 128], strides = [1, 1]} : vector<8x512xf32> to vector<8x128xf32>
    %94 = arith.negf %93 : vector<8x128xf32>
    %95 = math.exp %94 : vector<8x128xf32>
    %cst_33 = arith.constant 1.000000e+00 : f32
    %96 = vector.broadcast %cst_33 : f32 to vector<8x128xf32>
    %97 = arith.addf %96, %95 : vector<8x128xf32>
    %98 = arith.divf %96, %97 : vector<8x128xf32>
    %99 = arith.mulf %90, %73 : vector<8x128xf32>
    %100 = arith.mulf %84, %92 : vector<8x128xf32>
    %101 = arith.addf %99, %100 : vector<8x128xf32>
    %102 = math.tanh %101 : vector<8x128xf32>
    %103 = arith.mulf %98, %102 : vector<8x128xf32>
    %c24 = arith.constant 24 : index
    %c0_34 = arith.constant 0 : index
    %104 = vector.load %arg23[%c24, %c0_34] : memref<64x512xf32, #tpu.memory_space<vmem>>, vector<8x512xf32>
    %cst_35 = arith.constant dense<0.000000e+00> : vector<8x512xf32>
    %105 = tpu.matmul %103, %17, %cst_35 {dimension_numbers = #tpu.dot_dimension_numbers<[1], [0], [0], [1], [0, 0, 1, 1], [], []>} : vector<8x128xf32>, vector<128x512xf32>, vector<8x512xf32> -> vector<8x512xf32>
    %106 = arith.addf %104, %105 : vector<8x512xf32>
    %107 = vector.extract_strided_slice %106 {offsets = [0, 0], sizes = [8, 128], strides = [1, 1]} : vector<8x512xf32> to vector<8x128xf32>
    %108 = arith.negf %107 : vector<8x128xf32>
    %109 = math.exp %108 : vector<8x128xf32>
    %cst_36 = arith.constant 1.000000e+00 : f32
    %110 = vector.broadcast %cst_36 : f32 to vector<8x128xf32>
    %111 = arith.addf %110, %109 : vector<8x128xf32>
    %112 = arith.divf %110, %111 : vector<8x128xf32>
    %113 = vector.extract_strided_slice %106 {offsets = [0, 128], sizes = [8, 128], strides = [1, 1]} : vector<8x512xf32> to vector<8x128xf32>
    %114 = arith.negf %113 : vector<8x128xf32>
    %115 = math.exp %114 : vector<8x128xf32>
    %cst_37 = arith.constant 1.000000e+00 : f32
    %116 = vector.broadcast %cst_37 : f32 to vector<8x128xf32>
    %117 = arith.addf %116, %115 : vector<8x128xf32>
    %118 = arith.divf %116, %117 : vector<8x128xf32>
    %119 = vector.extract_strided_slice %106 {offsets = [0, 256], sizes = [8, 128], strides = [1, 1]} : vector<8x512xf32> to vector<8x128xf32>
    %120 = math.tanh %119 : vector<8x128xf32>
    %121 = vector.extract_strided_slice %106 {offsets = [0, 384], sizes = [8, 128], strides = [1, 1]} : vector<8x512xf32> to vector<8x128xf32>
    %122 = arith.negf %121 : vector<8x128xf32>
    %123 = math.exp %122 : vector<8x128xf32>
    %cst_38 = arith.constant 1.000000e+00 : f32
    %124 = vector.broadcast %cst_38 : f32 to vector<8x128xf32>
    %125 = arith.addf %124, %123 : vector<8x128xf32>
    %126 = arith.divf %124, %125 : vector<8x128xf32>
    %127 = arith.mulf %118, %101 : vector<8x128xf32>
    %128 = arith.mulf %112, %120 : vector<8x128xf32>
    %129 = arith.addf %127, %128 : vector<8x128xf32>
    %130 = math.tanh %129 : vector<8x128xf32>
    %131 = arith.mulf %126, %130 : vector<8x128xf32>
    %c32 = arith.constant 32 : index
    %c0_39 = arith.constant 0 : index
    %132 = vector.load %arg23[%c32, %c0_39] : memref<64x512xf32, #tpu.memory_space<vmem>>, vector<8x512xf32>
    %cst_40 = arith.constant dense<0.000000e+00> : vector<8x512xf32>
    %133 = tpu.matmul %131, %17, %cst_40 {dimension_numbers = #tpu.dot_dimension_numbers<[1], [0], [0], [1], [0, 0, 1, 1], [], []>} : vector<8x128xf32>, vector<128x512xf32>, vector<8x512xf32> -> vector<8x512xf32>
    %134 = arith.addf %132, %133 : vector<8x512xf32>
    %135 = vector.extract_strided_slice %134 {offsets = [0, 0], sizes = [8, 128], strides = [1, 1]} : vector<8x512xf32> to vector<8x128xf32>
    %136 = arith.negf %135 : vector<8x128xf32>
    %137 = math.exp %136 : vector<8x128xf32>
    %cst_41 = arith.constant 1.000000e+00 : f32
    %138 = vector.broadcast %cst_41 : f32 to vector<8x128xf32>
    %139 = arith.addf %138, %137 : vector<8x128xf32>
    %140 = arith.divf %138, %139 : vector<8x128xf32>
    %141 = vector.extract_strided_slice %134 {offsets = [0, 128], sizes = [8, 128], strides = [1, 1]} : vector<8x512xf32> to vector<8x128xf32>
    %142 = arith.negf %141 : vector<8x128xf32>
    %143 = math.exp %142 : vector<8x128xf32>
    %cst_42 = arith.constant 1.000000e+00 : f32
    %144 = vector.broadcast %cst_42 : f32 to vector<8x128xf32>
    %145 = arith.addf %144, %143 : vector<8x128xf32>
    %146 = arith.divf %144, %145 : vector<8x128xf32>
    %147 = vector.extract_strided_slice %134 {offsets = [0, 256], sizes = [8, 128], strides = [1, 1]} : vector<8x512xf32> to vector<8x128xf32>
    %148 = math.tanh %147 : vector<8x128xf32>
    %149 = vector.extract_strided_slice %134 {offsets = [0, 384], sizes = [8, 128], strides = [1, 1]} : vector<8x512xf32> to vector<8x128xf32>
    %150 = arith.negf %149 : vector<8x128xf32>
    %151 = math.exp %150 : vector<8x128xf32>
    %cst_43 = arith.constant 1.000000e+00 : f32
    %152 = vector.broadcast %cst_43 : f32 to vector<8x128xf32>
    %153 = arith.addf %152, %151 : vector<8x128xf32>
    %154 = arith.divf %152, %153 : vector<8x128xf32>
    %155 = arith.mulf %146, %129 : vector<8x128xf32>
    %156 = arith.mulf %140, %148 : vector<8x128xf32>
    %157 = arith.addf %155, %156 : vector<8x128xf32>
    %158 = math.tanh %157 : vector<8x128xf32>
    %159 = arith.mulf %154, %158 : vector<8x128xf32>
    %c40 = arith.constant 40 : index
    %c0_44 = arith.constant 0 : index
    %160 = vector.load %arg23[%c40, %c0_44] : memref<64x512xf32, #tpu.memory_space<vmem>>, vector<8x512xf32>
    %cst_45 = arith.constant dense<0.000000e+00> : vector<8x512xf32>
    %161 = tpu.matmul %159, %17, %cst_45 {dimension_numbers = #tpu.dot_dimension_numbers<[1], [0], [0], [1], [0, 0, 1, 1], [], []>} : vector<8x128xf32>, vector<128x512xf32>, vector<8x512xf32> -> vector<8x512xf32>
    %162 = arith.addf %160, %161 : vector<8x512xf32>
    %163 = vector.extract_strided_slice %162 {offsets = [0, 0], sizes = [8, 128], strides = [1, 1]} : vector<8x512xf32> to vector<8x128xf32>
    %164 = arith.negf %163 : vector<8x128xf32>
    %165 = math.exp %164 : vector<8x128xf32>
    %cst_46 = arith.constant 1.000000e+00 : f32
    %166 = vector.broadcast %cst_46 : f32 to vector<8x128xf32>
    %167 = arith.addf %166, %165 : vector<8x128xf32>
    %168 = arith.divf %166, %167 : vector<8x128xf32>
    %169 = vector.extract_strided_slice %162 {offsets = [0, 128], sizes = [8, 128], strides = [1, 1]} : vector<8x512xf32> to vector<8x128xf32>
    %170 = arith.negf %169 : vector<8x128xf32>
    %171 = math.exp %170 : vector<8x128xf32>
    %cst_47 = arith.constant 1.000000e+00 : f32
    %172 = vector.broadcast %cst_47 : f32 to vector<8x128xf32>
    %173 = arith.addf %172, %171 : vector<8x128xf32>
    %174 = arith.divf %172, %173 : vector<8x128xf32>
    %175 = vector.extract_strided_slice %162 {offsets = [0, 256], sizes = [8, 128], strides = [1, 1]} : vector<8x512xf32> to vector<8x128xf32>
    %176 = math.tanh %175 : vector<8x128xf32>
    %177 = vector.extract_strided_slice %162 {offsets = [0, 384], sizes = [8, 128], strides = [1, 1]} : vector<8x512xf32> to vector<8x128xf32>
    %178 = arith.negf %177 : vector<8x128xf32>
    %179 = math.exp %178 : vector<8x128xf32>
    %cst_48 = arith.constant 1.000000e+00 : f32
    %180 = vector.broadcast %cst_48 : f32 to vector<8x128xf32>
    %181 = arith.addf %180, %179 : vector<8x128xf32>
    %182 = arith.divf %180, %181 : vector<8x128xf32>
    %183 = arith.mulf %174, %157 : vector<8x128xf32>
    %184 = arith.mulf %168, %176 : vector<8x128xf32>
    %185 = arith.addf %183, %184 : vector<8x128xf32>
    %186 = math.tanh %185 : vector<8x128xf32>
    %187 = arith.mulf %182, %186 : vector<8x128xf32>
    %c48 = arith.constant 48 : index
    %c0_49 = arith.constant 0 : index
    %188 = vector.load %arg23[%c48, %c0_49] : memref<64x512xf32, #tpu.memory_space<vmem>>, vector<8x512xf32>
    %cst_50 = arith.constant dense<0.000000e+00> : vector<8x512xf32>
    %189 = tpu.matmul %187, %17, %cst_50 {dimension_numbers = #tpu.dot_dimension_numbers<[1], [0], [0], [1], [0, 0, 1, 1], [], []>} : vector<8x128xf32>, vector<128x512xf32>, vector<8x512xf32> -> vector<8x512xf32>
    %190 = arith.addf %188, %189 : vector<8x512xf32>
    %191 = vector.extract_strided_slice %190 {offsets = [0, 0], sizes = [8, 128], strides = [1, 1]} : vector<8x512xf32> to vector<8x128xf32>
    %192 = arith.negf %191 : vector<8x128xf32>
    %193 = math.exp %192 : vector<8x128xf32>
    %cst_51 = arith.constant 1.000000e+00 : f32
    %194 = vector.broadcast %cst_51 : f32 to vector<8x128xf32>
    %195 = arith.addf %194, %193 : vector<8x128xf32>
    %196 = arith.divf %194, %195 : vector<8x128xf32>
    %197 = vector.extract_strided_slice %190 {offsets = [0, 128], sizes = [8, 128], strides = [1, 1]} : vector<8x512xf32> to vector<8x128xf32>
    %198 = arith.negf %197 : vector<8x128xf32>
    %199 = math.exp %198 : vector<8x128xf32>
    %cst_52 = arith.constant 1.000000e+00 : f32
    %200 = vector.broadcast %cst_52 : f32 to vector<8x128xf32>
    %201 = arith.addf %200, %199 : vector<8x128xf32>
    %202 = arith.divf %200, %201 : vector<8x128xf32>
    %203 = vector.extract_strided_slice %190 {offsets = [0, 256], sizes = [8, 128], strides = [1, 1]} : vector<8x512xf32> to vector<8x128xf32>
    %204 = math.tanh %203 : vector<8x128xf32>
    %205 = vector.extract_strided_slice %190 {offsets = [0, 384], sizes = [8, 128], strides = [1, 1]} : vector<8x512xf32> to vector<8x128xf32>
    %206 = arith.negf %205 : vector<8x128xf32>
    %207 = math.exp %206 : vector<8x128xf32>
    %cst_53 = arith.constant 1.000000e+00 : f32
    %208 = vector.broadcast %cst_53 : f32 to vector<8x128xf32>
    %209 = arith.addf %208, %207 : vector<8x128xf32>
    %210 = arith.divf %208, %209 : vector<8x128xf32>
    %211 = arith.mulf %202, %185 : vector<8x128xf32>
    %212 = arith.mulf %196, %204 : vector<8x128xf32>
    %213 = arith.addf %211, %212 : vector<8x128xf32>
    %214 = math.tanh %213 : vector<8x128xf32>
    %215 = arith.mulf %210, %214 : vector<8x128xf32>
    %c56 = arith.constant 56 : index
    %c0_54 = arith.constant 0 : index
    %216 = vector.load %arg23[%c56, %c0_54] : memref<64x512xf32, #tpu.memory_space<vmem>>, vector<8x512xf32>
    %cst_55 = arith.constant dense<0.000000e+00> : vector<8x512xf32>
    %217 = tpu.matmul %215, %17, %cst_55 {dimension_numbers = #tpu.dot_dimension_numbers<[1], [0], [0], [1], [0, 0, 1, 1], [], []>} : vector<8x128xf32>, vector<128x512xf32>, vector<8x512xf32> -> vector<8x512xf32>
    %218 = arith.addf %216, %217 : vector<8x512xf32>
    %219 = vector.extract_strided_slice %218 {offsets = [0, 0], sizes = [8, 128], strides = [1, 1]} : vector<8x512xf32> to vector<8x128xf32>
    %220 = arith.negf %219 : vector<8x128xf32>
    %221 = math.exp %220 : vector<8x128xf32>
    %cst_56 = arith.constant 1.000000e+00 : f32
    %222 = vector.broadcast %cst_56 : f32 to vector<8x128xf32>
    %223 = arith.addf %222, %221 : vector<8x128xf32>
    %224 = arith.divf %222, %223 : vector<8x128xf32>
    %225 = vector.extract_strided_slice %218 {offsets = [0, 128], sizes = [8, 128], strides = [1, 1]} : vector<8x512xf32> to vector<8x128xf32>
    %226 = arith.negf %225 : vector<8x128xf32>
    %227 = math.exp %226 : vector<8x128xf32>
    %cst_57 = arith.constant 1.000000e+00 : f32
    %228 = vector.broadcast %cst_57 : f32 to vector<8x128xf32>
    %229 = arith.addf %228, %227 : vector<8x128xf32>
    %230 = arith.divf %228, %229 : vector<8x128xf32>
    %231 = vector.extract_strided_slice %218 {offsets = [0, 256], sizes = [8, 128], strides = [1, 1]} : vector<8x512xf32> to vector<8x128xf32>
    %232 = math.tanh %231 : vector<8x128xf32>
    %233 = vector.extract_strided_slice %218 {offsets = [0, 384], sizes = [8, 128], strides = [1, 1]} : vector<8x512xf32> to vector<8x128xf32>
    %234 = arith.negf %233 : vector<8x128xf32>
    %235 = math.exp %234 : vector<8x128xf32>
    %cst_58 = arith.constant 1.000000e+00 : f32
    %236 = vector.broadcast %cst_58 : f32 to vector<8x128xf32>
    %237 = arith.addf %236, %235 : vector<8x128xf32>
    %238 = arith.divf %236, %237 : vector<8x128xf32>
    %239 = arith.mulf %230, %213 : vector<8x128xf32>
    %240 = arith.mulf %224, %232 : vector<8x128xf32>
    %241 = arith.addf %239, %240 : vector<8x128xf32>
    %242 = math.tanh %241 : vector<8x128xf32>
    %243 = arith.mulf %238, %242 : vector<8x128xf32>
    %cst_59 = arith.constant 0.000000e+00 : f32
    %244 = vector.broadcast %cst_59 : f32 to vector<8x128xf32>
    %245 = arith.maximumf %243, %244 : vector<8x128xf32>
    %c0_60 = arith.constant 0 : index
    %c0_61 = arith.constant 0 : index
    %246 = vector.load %arg1[%c0_60, %c0_61] : memref<8x6xf32, #tpu.memory_space<vmem>>, vector<8x6xf32>
    %c0_62 = arith.constant 0 : index
    %c0_63 = arith.constant 0 : index
    %247 = vector.load %arg7[%c0_62, %c0_63] : memref<128x32xf32, #tpu.memory_space<vmem>>, vector<128x32xf32>
    %c0_64 = arith.constant 0 : index
    %c0_65 = arith.constant 0 : index
    %248 = vector.load %arg8[%c0_64, %c0_65] : memref<6x32xf32, #tpu.memory_space<vmem>>, vector<6x32xf32>
    %c0_66 = arith.constant 0 : index
    %c0_67 = arith.constant 0 : index
    %249 = vector.load %arg9[%c0_66, %c0_67] : memref<1x32xf32, #tpu.memory_space<vmem>>, vector<1x32xf32>
    %c0_68 = arith.constant 0 : index
    %c0_69 = arith.constant 0 : index
    %250 = vector.load %arg10[%c0_68, %c0_69] : memref<32x32xf32, #tpu.memory_space<vmem>>, vector<32x32xf32>
    %c0_70 = arith.constant 0 : index
    %c0_71 = arith.constant 0 : index
    %251 = vector.load %arg11[%c0_70, %c0_71] : memref<1x32xf32, #tpu.memory_space<vmem>>, vector<1x32xf32>
    %c0_72 = arith.constant 0 : index
    %c0_73 = arith.constant 0 : index
    %252 = vector.load %arg12[%c0_72, %c0_73] : memref<32x128xf32, #tpu.memory_space<vmem>>, vector<32x128xf32>
    %c0_74 = arith.constant 0 : index
    %c0_75 = arith.constant 0 : index
    %253 = vector.load %arg13[%c0_74, %c0_75] : memref<1x128xf32, #tpu.memory_space<vmem>>, vector<1x128xf32>
    %cst_76 = arith.constant dense<0.000000e+00> : vector<8x32xf32>
    %254 = tpu.matmul %245, %247, %cst_76 {dimension_numbers = #tpu.dot_dimension_numbers<[1], [0], [0], [1], [0, 0, 1, 1], [], []>} : vector<8x128xf32>, vector<128x32xf32>, vector<8x32xf32> -> vector<8x32xf32>
    %cst_77 = arith.constant dense<0.000000e+00> : vector<8x32xf32>
    %255 = tpu.matmul %246, %248, %cst_77 {dimension_numbers = #tpu.dot_dimension_numbers<[1], [0], [0], [1], [0, 0, 1, 1], [], []>} : vector<8x6xf32>, vector<6x32xf32>, vector<8x32xf32> -> vector<8x32xf32>
    %256 = arith.addf %254, %255 : vector<8x32xf32>
    %257 = vector.broadcast %249 : vector<1x32xf32> to vector<8x32xf32>
    %258 = arith.addf %256, %257 : vector<8x32xf32>
    %cst_78 = arith.constant 0.000000e+00 : f32
    %259 = vector.broadcast %cst_78 : f32 to vector<8x32xf32>
    %260 = arith.maximumf %258, %259 : vector<8x32xf32>
    %cst_79 = arith.constant dense<0.000000e+00> : vector<8x32xf32>
    %261 = tpu.matmul %260, %250, %cst_79 {dimension_numbers = #tpu.dot_dimension_numbers<[1], [0], [0], [1], [0, 0, 1, 1], [], []>} : vector<8x32xf32>, vector<32x32xf32>, vector<8x32xf32> -> vector<8x32xf32>
    %262 = vector.broadcast %251 : vector<1x32xf32> to vector<8x32xf32>
    %263 = arith.addf %261, %262 : vector<8x32xf32>
    %cst_80 = arith.constant 0.000000e+00 : f32
    %264 = vector.broadcast %cst_80 : f32 to vector<8x32xf32>
    %265 = arith.maximumf %263, %264 : vector<8x32xf32>
    %cst_81 = arith.constant dense<0.000000e+00> : vector<8x128xf32>
    %266 = tpu.matmul %265, %252, %cst_81 {dimension_numbers = #tpu.dot_dimension_numbers<[1], [0], [0], [1], [0, 0, 1, 1], [], []>} : vector<8x32xf32>, vector<32x128xf32>, vector<8x128xf32> -> vector<8x128xf32>
    %267 = vector.broadcast %253 : vector<1x128xf32> to vector<8x128xf32>
    %268 = arith.addf %266, %267 : vector<8x128xf32>
    %c0_82 = arith.constant 0 : index
    %c0_83 = arith.constant 0 : index
    %269 = vector.load %arg21[%c0_82, %c0_83] : memref<8x128xf32, #tpu.memory_space<vmem>>, vector<8x128xf32>
    tpu.vector_store %arg21[%c0_82, %c0_83], %268 {strides = array<i32>} : memref<8x128xf32, #tpu.memory_space<vmem>>, vector<8x128xf32>,
    %c0_84 = arith.constant 0 : index
    %c0_85 = arith.constant 0 : index
    %270 = vector.load %arg14[%c0_84, %c0_85] : memref<128x32xf32, #tpu.memory_space<vmem>>, vector<128x32xf32>
    %c0_86 = arith.constant 0 : index
    %c0_87 = arith.constant 0 : index
    %271 = vector.load %arg15[%c0_86, %c0_87] : memref<6x32xf32, #tpu.memory_space<vmem>>, vector<6x32xf32>
    %c0_88 = arith.constant 0 : index
    %c0_89 = arith.constant 0 : index
    %272 = vector.load %arg16[%c0_88, %c0_89] : memref<1x32xf32, #tpu.memory_space<vmem>>, vector<1x32xf32>
    %c0_90 = arith.constant 0 : index
    %c0_91 = arith.constant 0 : index
    %273 = vector.load %arg17[%c0_90, %c0_91] : memref<32x32xf32, #tpu.memory_space<vmem>>, vector<32x32xf32>
    %c0_92 = arith.constant 0 : index
    %c0_93 = arith.constant 0 : index
    %274 = vector.load %arg18[%c0_92, %c0_93] : memref<1x32xf32, #tpu.memory_space<vmem>>, vector<1x32xf32>
    %c0_94 = arith.constant 0 : index
    %c0_95 = arith.constant 0 : index
    %275 = vector.load %arg19[%c0_94, %c0_95] : memref<32x128xf32, #tpu.memory_space<vmem>>, vector<32x128xf32>
    %c0_96 = arith.constant 0 : index
    %c0_97 = arith.constant 0 : index
    %276 = vector.load %arg20[%c0_96, %c0_97] : memref<1x128xf32, #tpu.memory_space<vmem>>, vector<1x128xf32>
    %cst_98 = arith.constant dense<0.000000e+00> : vector<8x32xf32>
    %277 = tpu.matmul %245, %270, %cst_98 {dimension_numbers = #tpu.dot_dimension_numbers<[1], [0], [0], [1], [0, 0, 1, 1], [], []>} : vector<8x128xf32>, vector<128x32xf32>, vector<8x32xf32> -> vector<8x32xf32>
    %cst_99 = arith.constant dense<0.000000e+00> : vector<8x32xf32>
    %278 = tpu.matmul %246, %271, %cst_99 {dimension_numbers = #tpu.dot_dimension_numbers<[1], [0], [0], [1], [0, 0, 1, 1], [], []>} : vector<8x6xf32>, vector<6x32xf32>, vector<8x32xf32> -> vector<8x32xf32>
    %279 = arith.addf %277, %278 : vector<8x32xf32>
    %280 = vector.broadcast %272 : vector<1x32xf32> to vector<8x32xf32>
    %281 = arith.addf %279, %280 : vector<8x32xf32>
    %cst_100 = arith.constant 0.000000e+00 : f32
    %282 = vector.broadcast %cst_100 : f32 to vector<8x32xf32>
    %283 = arith.maximumf %281, %282 : vector<8x32xf32>
    %cst_101 = arith.constant dense<0.000000e+00> : vector<8x32xf32>
    %284 = tpu.matmul %283, %273, %cst_101 {dimension_numbers = #tpu.dot_dimension_numbers<[1], [0], [0], [1], [0, 0, 1, 1], [], []>} : vector<8x32xf32>, vector<32x32xf32>, vector<8x32xf32> -> vector<8x32xf32>
    %285 = vector.broadcast %274 : vector<1x32xf32> to vector<8x32xf32>
    %286 = arith.addf %284, %285 : vector<8x32xf32>
    %cst_102 = arith.constant 0.000000e+00 : f32
    %287 = vector.broadcast %cst_102 : f32 to vector<8x32xf32>
    %288 = arith.maximumf %286, %287 : vector<8x32xf32>
    %cst_103 = arith.constant dense<0.000000e+00> : vector<8x128xf32>
    %289 = tpu.matmul %288, %275, %cst_103 {dimension_numbers = #tpu.dot_dimension_numbers<[1], [0], [0], [1], [0, 0, 1, 1], [], []>} : vector<8x32xf32>, vector<32x128xf32>, vector<8x128xf32> -> vector<8x128xf32>
    %290 = vector.broadcast %276 : vector<1x128xf32> to vector<8x128xf32>
    %291 = arith.addf %289, %290 : vector<8x128xf32>
    %c0_104 = arith.constant 0 : index
    %c0_105 = arith.constant 0 : index
    %292 = vector.load %arg22[%c0_104, %c0_105] : memref<8x128xf32, #tpu.memory_space<vmem>>, vector<8x128xf32>
    tpu.vector_store %arg22[%c0_104, %c0_105], %291 {strides = array<i32>} : memref<8x128xf32, #tpu.memory_space<vmem>>, vector<8x128xf32>,
    return
  }
}

</mosaic_0001>

<bundles_post_ra>
// kernel: tpu_custom_call.1
= control target key start
LH: loop header
LB: loop body
LE: loop exit
PB: predicated region body
PF: predicated region fallthrough
CT: control target
= control target key end

     0   :  { %s3736_s0 = inlined_call_operand.vmem [shape: f32[64,24], index: 0, kind: input, shape index: {}]   ;;  %s3737_s1 = inlined_call_operand.vmem [shape: f32[8,6], index: 1, kind: input, shape index: {}]   ;;  %s3738_s2 = inlined_call_operand.vmem [shape: f32[24,32], index: 2, kind: input, shape index: {}]   ;;  %s3739_s3 = inlined_call_operand.vmem [shape: f32[1,32], index: 3, kind: input, shape index: {}]   ;;  %s3740_s4 = inlined_call_operand.vmem [shape: f32[32,512], index: 4, kind: input, shape index: {}]   ;;  %s3741_s5 = inlined_call_operand.vmem [shape: f32[1,512], index: 5, kind: input, shape index: {}]   ;;  %s3742_s6 = inlined_call_operand.hbm [shape: f32[128,512], index: 6, kind: input, shape index: {}]   ;;  %s3743_s7 = inlined_call_operand.vmem [shape: f32[128,32], index: 7, kind: input, shape index: {}]   ;;  %s3744_s8 = inlined_call_operand.vmem [shape: f32[6,32], index: 8, kind: input, shape index: {}]   ;;  %s3745_s9 = inlined_call_operand.vmem [shape: f32[1,32], index: 9, kind: input, shape index: {}]   ;;  %s3746_s10 = inlined_call_operand.vmem [shape: f32[32,32], index: 10, kind: input, shape index: {}]   ;;  %s3747_s11 = inlined_call_operand.vmem [shape: f32[1,32], index: 11, kind: input, shape index: {}]   ;;  %s3748_s12 = inlined_call_operand.vmem [shape: f32[32,128], index: 12, kind: input, shape index: {}]   ;;  %s3749_s13 = inlined_call_operand.vmem [shape: f32[1,128], index: 13, kind: input, shape index: {}]   ;;  %s3750_s14 = inlined_call_operand.vmem [shape: f32[128,32], index: 14, kind: input, shape index: {}]   ;;  %s3751_s15 = inlined_call_operand.vmem [shape: f32[6,32], index: 15, kind: input, shape index: {}]   ;;  %s3752_s16 = inlined_call_operand.vmem [shape: f32[1,32], index: 16, kind: input, shape index: {}]   ;;  %s3753_s17 = inlined_call_operand.vmem [shape: f32[32,32], index: 17, kind: input, shape index: {}]   ;;  %s3754_s18 = inlined_call_operand.vmem [shape: f32[1,32], index: 18, kind: input, shape index: {}]   ;;  %s3755_s19 = inlined_call_operand.vmem [shape: f32[32,128], index: 19, kind: input, shape index: {}]   ;;  %s3756_s20 = inlined_call_operand.vmem [shape: f32[1,128], index: 20, kind: input, shape index: {}]   ;;  %s3757_s21 = inlined_call_operand.hbm [shape: f32[8,128], index: 21, kind: output, shape index: {0}]   ;;  %s3758_s22 = inlined_call_operand.hbm [shape: f32[8,128], index: 22, kind: output, shape index: {1}]  }
   0x1   :  { %3859 = sst [smem:[#allocation66_spill]] %s3736_s0 }
   0x2   :  { %3860 = sst [smem:[#allocation67_spill]] %s3737_s1 }
   0x3   :  { %3861 = sst [smem:[#allocation68_spill]] %s3738_s2 }
   0x4   :  { %3862 = sst [smem:[#allocation69_spill]] %s3739_s3 }
   0x5   :  { %3863 = sst [smem:[#allocation70_spill]] %s3740_s4 }
   0x6   :  { %3864 = sst [smem:[#allocation71_spill]] %s3741_s5 }
   0x7   :  { %3865 = sst [smem:[#allocation72_spill]] %s3742_s6 }
   0x8   :  { %28 = vsyncpa [#allocation4], 0 }
   0x9   :  { %29 = vsyncpa [#allocation5], 0 }
   0xa   :  { %30 = vsyncpa [#allocation8], 0  ;;  %s3866_s29 = sld [smem:[#allocation72_spill]]  ;;  %s2370_s4 = smov [#allocation3]  }
   0xb   :  { %s49_s0 = sshll.u32 %s2370_s4, 4  ;;  %s2371_s23 = smov 512   ;;  %s50_s0 = int_to_ptr.vmem [resolvable:$true] %s49_s0 }
   0xc   :  { %s2372_s1 = smov 32  }
  0x10   :  { %s47_s30 = sshll.u32 %s3866_s29, 4  ;;  %s48_s30 = int_to_ptr.hbm [resolvable:$true] %s47_s30 }
  0x11   :  { %55 = dma.hbm_to_vmem [thread:$0]  %s48_s30, 8192, %s50_s0, [#allocation4], %s2371_s23, %s2371_s23, %s2372_s1  }
  0x12   :  { %2364 = dma.done.wait [#allocation4], 8192  }
  0x13   :  { %2365 = vsyncadd [#allocation4], 4294959104  ;;  %s3867_s6 = sld [smem:[#allocation68_spill]]  ;;  %vm103_vm0 = vcmask 195584   ;;  %v2583_v27 = vld [vmem:[#allocation3 + $0x1e8] sm:$0xff]  ;;  %v2588_v29 = vld [vmem:[#allocation3 + $0x1e0] sm:$0xff] }
  0x14   :  { %s3868_s29 = sld [smem:[#allocation66_spill]]  ;;  %v2586_v28 = vld [vmem:[#allocation3 + $0x1c8] sm:$0xff]  ;;  %v2595_v31 = vld [vmem:[#allocation3 + $0x1c0] sm:$0xff]  ;;  %v2618_v39 = vld [vmem:[#allocation3 + $0x1f0] sm:$0xff]  ;;  %vm219_vm1 = vcmask 261120  }
  0x15   :  { %s3869_s24 = sld [smem:[#allocation70_spill]]  ;;  %v2592_v30 = vld [vmem:[#allocation3 + $0x1a8] sm:$0xff]  ;;  %v2600_v33 = vld [vmem:[#allocation3 + $0x1a0] sm:$0xff]  ;;  %3870 = vst [vmem:[#allocation12_spill] sm:$0xff] %v2618_v39  ;;  %v2636_v44 = vld [vmem:[#allocation3 + $0x1d0] sm:$0xff] }
  0x16   :  { %v2598_v32 = vld [vmem:[#allocation3 + $0x188] sm:$0xff]  ;;  %v2604_v34 = vld [vmem:[#allocation3 + $0x180] sm:$0xff]  ;;  %v2650_v51 = vld [vmem:[#allocation3 + $0x1b0] sm:$0xff]  ;;  %s3904_s2 = sld [smem:[#allocation71_spill]] }
  0x17   :  { %v2607_v35 = vld [vmem:[#allocation3 + $0x168] sm:$0xff]  ;;  %v2610_v36 = vld [vmem:[#allocation3 + $0x160] sm:$0xff]  ;;  %v2666_v56 = vld [vmem:[#allocation3 + $0x190] sm:$0xff]  ;;  %s4085_s23 = sld [smem:[#allocation67_spill]] }
  0x18   :  { %v2613_v37 = vld [vmem:[#allocation3 + $0x140] sm:$0xff]  ;;  %v2616_v38 = vld [vmem:[#allocation3 + $0x148] sm:$0xff]  ;;  %v2680_v63 = vld [vmem:[#allocation3 + $0x170] sm:$0xff] }
  0x19   :  { %v98_v0 = vld [vmem:[%s3867_s6 + $0x10] sm:$0xff]  ;;  %v97_v1 = vld [vmem:[%s3867_s6 + $0x8] sm:$0xff]  ;;  %v96_v2 = vld [vmem:[%s3867_s6] sm:$0xff]  ;;  %s3871_s6 = sld [smem:[#allocation69_spill]] }
  0x1a   :  { %141 = vmatpush.msra.mxu0 %v98_v0  ;;  %2084 = vmatpush.msra.mxu3 %v98_v0  ;;  %v88_v3 = vld [vmem:[%s3868_s29] sm:$0xff]  ;;  %v89_v4 = vld [vmem:[%s3868_s29 + $0x8] sm:$0xff]  ;;  %v94_v5 = vld [vmem:[%s3868_s29 + $0x30] sm:$0xff] }
  0x1b   :  { %v205_v6 = vld [vmem:[%s3869_s24 + $0x60] sm:$0xff]  ;;  %v206_v7 = vld [vmem:[%s3869_s24 + $0x68] sm:$0xff]  ;;  %v207_v8 = vld [vmem:[%s3869_s24 + $0x70] sm:$0xff] }
  0x1c   :  { %142 = vmatpush.msra.mxu0 %v97_v1  ;;  %2085 = vmatpush.msra.mxu3 %v97_v1  ;;  %v208_v9 = vld [vmem:[%s3869_s24 + $0x78] sm:$0xff]  ;;  %v90_v10 = vld [vmem:[%s3868_s29 + $0x10] sm:$0xff]  ;;  %v92_v13 = vld [vmem:[%s3868_s29 + $0x20] sm:$0xff] }
  0x1d   :  { %256 = vmatpush.msra.mxu1 %v205_v6  ;;  %297 = vmatpush.msra.mxu2 %v206_v7  ;;  %v95_v11 = vld [vmem:[%s3868_s29 + $0x38] sm:$0xff]  ;;  %v93_v14 = vld [vmem:[%s3868_s29 + $0x28] sm:$0xff]  ;;  %v201_v15 = vld [vmem:[%s3869_s24 + $0x40] sm:$0xff] }
  0x1e   :  { %143 = vmatpush.msra.mxu0 %v96_v2  ;;  %2086 = vmatpush.msra.mxu3 %v96_v2  ;;  %v91_v12 = vld [vmem:[%s3868_s29 + $0x18] sm:$0xff]  ;;  %v202_v16 = vld [vmem:[%s3869_s24 + $0x48] sm:$0xff]  ;;  %v203_v17 = vld [vmem:[%s3869_s24 + $0x50] sm:$0xff] }
  0x1f   :  { %2012 = vmatmul.msk.f32.vlgmr.msra.gmra.mxu0 %vm103_vm0, %v88_v3  ;;  %2018 = vmatmul.msk.f32.vlgmr.msra.gmra.mxu3 %vm103_vm0, %v94_v5  ;;  %v204_v18 = vld [vmem:[%s3869_s24 + $0x58] sm:$0xff]  ;;  %v197_v19 = vld [vmem:[%s3869_s24 + $0x20] sm:$0xff]  ;;  %v198_v20 = vld [vmem:[%s3869_s24 + $0x28] sm:$0xff] }
  0x20   :  { %338 = vmatpush.msrb.mxu3 %v207_v8  ;;  %379 = vmatpush.msrb.mxu0 %v208_v9  ;;  %v199_v21 = vld [vmem:[%s3869_s24 + $0x30] sm:$0xff]  ;;  %v200_v22 = vld [vmem:[%s3869_s24 + $0x38] sm:$0xff]  ;;  %v193_v23 = vld [vmem:[%s3869_s24] sm:$0xff] }
  0x21   :  { %257 = vmatpush.msra.mxu1 %v201_v15  ;;  %298 = vmatpush.msra.mxu2 %v202_v16  ;;  %v194_v24 = vld [vmem:[%s3869_s24 + $0x8] sm:$0xff]  ;;  %v195_v25 = vld [vmem:[%s3869_s24 + $0x10] sm:$0xff]  ;;  %v196_v26 = vld [vmem:[%s3869_s24 + $0x18] sm:$0xff] }
  0x22   :  { %339 = vmatpush.msrb.mxu3 %v203_v17  ;;  %380 = vmatpush.msrb.mxu0 %v204_v18  ;;  %v2620_v40 = vld [vmem:[#allocation3 + $0x120] sm:$0xff]  ;;  %v2634_v43 = vld [vmem:[#allocation3 + $0x128] sm:$0xff]  ;;  %v2700_v6 = vld [vmem:[#allocation3 + $0x1f8] sm:$0xff] }
  0x23   :  { %258 = vmatpush.msra.mxu1 %v197_v19  ;;  %299 = vmatpush.msra.mxu2 %v198_v20  ;;  %v2627_v41 = vld [vmem:[%s3871_s6] ss:$0 sm:$0xff]  ;;  %v2648_v50 = vld [vmem:[#allocation3 + $0x108] sm:$0xff]  ;;  %v2704_v8 = vld [vmem:[#allocation3 + $0x130] sm:$0xff] }
  0x24   :  { %340 = vmatpush.msrb.mxu3 %v199_v21  ;;  %381 = vmatpush.msrb.mxu0 %v200_v22  ;;  %v2631_v42 = vld [vmem:[#allocation3 + $0x100] sm:$0xff]  ;;  %v2664_v55 = vld [vmem:[#allocation3 + $0xe8] sm:$0xff]  ;;  %v2726_v15 = vld [vmem:[#allocation3 + $0x198] sm:$0xff] }
  0x25   :  { %259 = vmatpush.msra.mxu1 %v193_v23  ;;  %300 = vmatpush.msra.mxu2 %v194_v24  ;;  %v2640_v46 = vld [vmem:[#allocation3 + $0xe0] sm:$0xff]  ;;  %v2678_v62 = vld [vmem:[#allocation3 + $0xc8] sm:$0xff]  ;;  %v2730_v17 = vld [vmem:[#allocation3 + $0xf0] sm:$0xff] }
  0x26   :  { %341 = vmatpush.msrb.mxu3 %v195_v25  ;;  %382 = vmatpush.msrb.mxu0 %v196_v26  ;;  %v2645_v48 = vld [vmem:[#allocation3 + $0xc0] sm:$0xff]  ;;  %v2694_v3 = vld [vmem:[#allocation3 + $0xa8] sm:$0xff]  ;;  %v2734_v19 = vld [vmem:[#allocation3 + $0xd0] sm:$0xff] }
  0x27   :  { %2013 = vmatmul.msk.f32.gmra.mxu0 %vm103_vm0, %v89_v4  ;;  %2019 = vmatmul.msk.f32.gmra.mxu3 %vm103_vm0, %v95_v11  ;;  %v2652_v52 = vld [vmem:[#allocation3 + $0xa0] sm:$0xff]  ;;  %3878 = vst [vmem:[#allocation19_spill] sm:$0xff] %v2694_v3  ;;  %v2696_v4 = vld [vmem:[#allocation3 + $0x150] sm:$0xff]  ;;  %v2702_v7 = vld [vmem:[#allocation3 + $0x88] sm:$0xff] }
  0x28   :  { %528 = vmatpush.msrb.mxu2 %v2583_v27  ;;  %508 = vmatpush.msrb.mxu1 %v2588_v29  ;;  %3872 = vst [vmem:[#allocation13_spill] sm:$0xff] %v2652_v52  ;;  %v2660_v54 = vld [vmem:[#allocation3 + $0x80] sm:$0xff]  ;;  %v2713_v11 = vld [vmem:[#allocation3 + $0x110] sm:$0xff]  ;;  %v2728_v16 = vld [vmem:[#allocation3 + $0x68] sm:$0xff] }
  0x29   :  { %548 = vmatpush.msra.mxu3 %v2618_v39  ;;  %699 = vmatpush.msra.mxu0 %v2618_v39  ;;  %3873 = vst [vmem:[#allocation14_spill] sm:$0xff] %v2660_v54  ;;  %v2670_v58 = vld [vmem:[#allocation3 + $0x60] sm:$0xff]  ;;  %v2736_v20 = vld [vmem:[#allocation3 + $0x48] sm:$0xff]  ;;  %v2740_v22 = vld [vmem:[#allocation3 + $0x178] sm:$0xff] }
  0x2a   :  { %529 = vmatpush.msrb.mxu2 %v2586_v28  ;;  %509 = vmatpush.msrb.mxu1 %v2595_v31  ;;  %3874 = vst [vmem:[#allocation15_spill] sm:$0xff] %v2670_v58  ;;  %v2676_v60 = vld [vmem:[#allocation3 + $0x40] sm:$0xff]  ;;  %v2745_v23 = vld [vmem:[#allocation3 + $0xb0] sm:$0xff]  ;;  %v2750_v26 = vld [vmem:[#allocation3 + $0x158] sm:$0xff] }
  0x2b   :  { %549 = vmatpush.msra.mxu3 %v2636_v44  ;;  %700 = vmatpush.msra.mxu0 %v2636_v44  ;;  %3875 = vst [vmem:[#allocation16_spill] sm:$0xff] %v2676_v60  ;;  %v2685_v1 = vld [vmem:[#allocation3 + $0x20] sm:$0xff] }
  0x2c   :  { %530 = vmatpush.msrb.mxu2 %v2592_v30  ;;  %510 = vmatpush.msrb.mxu1 %v2600_v33  ;;  %3876 = vst [vmem:[#allocation17_spill] sm:$0xff] %v2685_v1  ;;  %v2692_v2 = vld [vmem:[#allocation3] sm:$0xff] }
  0x2d   :  { %550 = vmatpush.msra.mxu3 %v2650_v51  ;;  %701 = vmatpush.msra.mxu0 %v2650_v51  ;;  %3877 = vst [vmem:[#allocation18_spill] sm:$0xff] %v2692_v2 }
  0x2e   :  { %531 = vmatpush.msrb.mxu2 %v2598_v32  ;;  %511 = vmatpush.msrb.mxu1 %v2604_v34  ;;  %3879 = vst [vmem:[#allocation20_spill] sm:$0xff] %v2702_v7 }
  0x2f   :  { %2014 = vmatmul.msk.f32.gmra.mxu0 %vm103_vm0, %v90_v10  ;;  %551 = vmatpush.msra.mxu3 %v2666_v56  ;;  %v2710_v10 = vld [vmem:[#allocation3 + $0x1d8] sm:$0xff]  ;;  %3880 = vst [vmem:[#allocation21_spill] sm:$0xff] %v2728_v16 }
  0x30   :  { %532 = vmatpush.msrb.mxu2 %v2607_v35  ;;  %512 = vmatpush.msrb.mxu1 %v2610_v36  ;;  %3881 = vst [vmem:[#allocation22_spill] sm:$0xff] %v2736_v20 }
  0x31   :  { %702 = vmatpush.msra.mxu0 %v2666_v56  ;;  %552 = vmatpush.msra.mxu3 %v2680_v63  ;;  %3882 = vst [vmem:[#allocation23_spill] sm:$0xff] %v2745_v23 }
  0x32   :  { %513 = vmatpush.msrb.mxu1 %v2613_v37  ;;  %533 = vmatpush.msrb.mxu2 %v2616_v38 }
  0x33   :  { %703 = vmatpush.msra.mxu0 %v2680_v63  ;;  %553 = vmatpush.msra.mxu3 %v2696_v4 }
  0x34   :  { %514 = vmatpush.msrb.mxu1 %v2620_v40  ;;  %534 = vmatpush.msrb.mxu2 %v2634_v43 }
  0x35   :  { %704 = vmatpush.msra.mxu0 %v2696_v4  ;;  %554 = vmatpush.msra.mxu3 %v2704_v8 }
  0x36   :  { %515 = vmatpush.msrb.mxu1 %v2631_v42  ;;  %535 = vmatpush.msrb.mxu2 %v2648_v50 }
  0x37   :  { %2015 = vmatmul.msk.f32.gmra.mxu0 %vm103_vm0, %v91_v12  ;;  %555 = vmatpush.msra.mxu3 %v2713_v11 }
  0x38   :  { %516 = vmatpush.msrb.mxu1 %v2640_v46  ;;  %536 = vmatpush.msrb.mxu2 %v2664_v55 }
  0x39   :  { %705 = vmatpush.msra.mxu0 %v2704_v8  ;;  %556 = vmatpush.msra.mxu3 %v2730_v17 }
  0x3a   :  { %517 = vmatpush.msrb.mxu1 %v2645_v48  ;;  %537 = vmatpush.msrb.mxu2 %v2678_v62 }
  0x3b   :  { %706 = vmatpush.msra.mxu0 %v2713_v11  ;;  %557 = vmatpush.msra.mxu3 %v2734_v19 }
  0x3c   :  { %518 = vmatpush.msrb.mxu1 %v2652_v52  ;;  %538 = vmatpush.msrb.mxu2 %v2694_v3 }
  0x3d   :  { %707 = vmatpush.msra.mxu0 %v2730_v17  ;;  %558 = vmatpush.msra.mxu3 %v2745_v23 }
  0x3e   :  { %519 = vmatpush.msrb.mxu1 %v2660_v54  ;;  %539 = vmatpush.msrb.mxu2 %v2702_v7 }
  0x3f   :  { %2016 = vmatmul.msk.f32.gmra.mxu0 %vm103_vm0, %v92_v13 }
  0x40   :  { %520 = vmatpush.msrb.mxu1 %v2670_v58  ;;  %540 = vmatpush.msrb.mxu2 %v2728_v16 }
  0x41   :  { %708 = vmatpush.msra.mxu0 %v2734_v19 }
  0x42   :  { %521 = vmatpush.msrb.mxu1 %v2676_v60  ;;  %541 = vmatpush.msrb.mxu2 %v2736_v20 }
  0x43   :  { %709 = vmatpush.msra.mxu0 %v2745_v23 }
  0x44   :  { %522 = vmatpush.msrb.mxu1 %v2685_v1 }
  0x46   :  { %523 = vmatpush.msrb.mxu1 %v2692_v2 }
  0x47   :  { %2017 = vmatmul.msk.f32.gmra.mxu0 %vm103_vm0, %v93_v14  ;;  %v2719_v14 = vld [vmem:[#allocation3 + $0x1b8] sm:$0xff] }
  0x9c   :  { %v145_v45 = vpop.f32.mrf.mxu0 }
  0x9d   :  { %v146_v47 = vadd.f32 %v2627_v41, %v145_v45  ;;  %v2753_v45 = vld [vmem:[#allocation3 + $0x90] sm:$0xff] }
  0x9e   :  { %3883 = vst [vmem:[#allocation24_spill] sm:$0xff] %v2753_v45  ;;  %559 = vmatpush.msra.mxu3 %v2753_v45  ;;  %710 = vmatpush.msra.mxu0 %v2753_v45 }
  0x9f   :  { %vm169_vm2 = vcmp.gt.f32.partialorder %v146_v47, 0.0  ;;  %v177_v49 = vmul.f32 0.01, %v146_v47 }
  0xa1   :  { %v185_v53 = vsel %vm169_vm2, %v146_v47, %v177_v49  ;;  %v2760_v47 = vld [vmem:[#allocation3 + $0x138] sm:$0xff]  ;;  %v2762_v49 = vld [vmem:[#allocation3 + $0x28] sm:$0xff] }
  0xa2   :  { %2020 = vmatmul.msk.f32.vlgmr.msra.gmra.mxu1 %vm219_vm1, %v185_v53  ;;  %2028 = vmatmul.msk.f32.vlgmr.msra.gmra.mxu2 %vm219_vm1, %v185_v53  ;;  %3884 = vst [vmem:[#allocation25_spill] sm:$0xff] %v2762_v49 }
  0xa3   :  { %2036 = vmatmul.msk.f32.vlgmr.msrb.gmra.mxu3 %vm219_vm1, %v185_v53  ;;  %2044 = vmatmul.msk.f32.vlgmr.msrb.gmra.mxu0 %vm219_vm1, %v185_v53  ;;  %v2764_v53 = vld [vmem:[#allocation3 + $0x70] sm:$0xff] }
  0xa4   :  { %v148_v57 = vpop.f32.mrf.mxu0  ;;  %568 = vmatpush.msra.mxu1 %v2700_v6  ;;  %3885 = vst [vmem:[#allocation26_spill] sm:$0xff] %v2764_v53  ;;  %542 = vmatpush.msrb.mxu2 %v2762_v49 }
  0xa5   :  { %v149_v59 = vadd.f32 %v2627_v41, %v148_v57  ;;  %560 = vmatpush.msra.mxu3 %v2764_v53  ;;  %711 = vmatpush.msra.mxu0 %v2764_v53 }
  0xa6   :  { %569 = vmatpush.msra.mxu1 %v2710_v10 }
  0xa7   :  { %vm170_vm3 = vcmp.gt.f32.partialorder %v149_v59, 0.0  ;;  %v178_v61 = vmul.f32 0.01, %v149_v59 }
  0xa8   :  { %570 = vmatpush.msra.mxu1 %v2719_v14 }
  0xa9   :  { %v186_v0 = vsel %vm170_vm3, %v149_v59, %v178_v61  ;;  %v2768_v59 = vld [vmem:[#allocation3 + $0x8] sm:$0xff] }
  0xaa   :  { %2021 = vmatmul.msk.f32.gmra.mxu1 %vm219_vm1, %v186_v0  ;;  %2029 = vmatmul.msk.f32.gmra.mxu2 %vm219_vm1, %v186_v0  ;;  %3886 = vst [vmem:[#allocation27_spill] sm:$0xff] %v2768_v59 }
  0xab   :  { %2037 = vmatmul.msk.f32.gmra.mxu3 %vm219_vm1, %v186_v0  ;;  %2045 = vmatmul.msk.f32.gmra.mxu0 %vm219_vm1, %v186_v0  ;;  %v2771_v0 = vld [vmem:[#allocation3 + $0x118] sm:$0xff] }
  0xac   :  { %v151_v5 = vpop.f32.mrf.mxu0  ;;  %571 = vmatpush.msra.mxu1 %v2726_v15  ;;  %3887 = vst [vmem:[#allocation28_spill] sm:$0xff] %v2771_v0  ;;  %543 = vmatpush.msrb.mxu2 %v2768_v59 }
  0xad   :  { %v152_v9 = vadd.f32 %v2627_v41, %v151_v5  ;;  %v2774_v5 = vld [vmem:[#allocation3 + $0x50] sm:$0xff] }
  0xae   :  { %572 = vmatpush.msra.mxu1 %v2740_v22  ;;  %3888 = vst [vmem:[#allocation29_spill] sm:$0xff] %v2774_v5  ;;  %561 = vmatpush.msra.mxu3 %v2774_v5 }
  0xaf   :  { %vm171_vm4 = vcmp.gt.f32.partialorder %v152_v9, 0.0  ;;  %v179_v12 = vmul.f32 0.01, %v152_v9  ;;  %659 = vmatpush.msra.mxu2 %v2588_v29  ;;  %712 = vmatpush.msra.mxu0 %v2774_v5 }
  0xb0   :  { %573 = vmatpush.msra.mxu1 %v2750_v26 }
  0xb1   :  { %v187_v13 = vsel %vm171_vm4, %v152_v9, %v179_v12  ;;  %660 = vmatpush.msra.mxu2 %v2595_v31 }
  0xb2   :  { %2022 = vmatmul.msk.f32.gmra.mxu1 %vm219_vm1, %v187_v13  ;;  %2030 = vmatmul.msk.f32.gmra.mxu2 %vm219_vm1, %v187_v13 }
  0xb3   :  { %2038 = vmatmul.msk.f32.gmra.mxu3 %vm219_vm1, %v187_v13  ;;  %2046 = vmatmul.msk.f32.gmra.mxu0 %vm219_vm1, %v187_v13  ;;  %v2783_v13 = vld [vmem:[#allocation3 + $0xf8] sm:$0xff] }
  0xb4   :  { %v154_v18 = vpop.f32.mrf.mxu0  ;;  %574 = vmatpush.msra.mxu1 %v2760_v47  ;;  %3889 = vst [vmem:[#allocation30_spill] sm:$0xff] %v2783_v13  ;;  %661 = vmatpush.msra.mxu2 %v2600_v33 }
  0xb5   :  { %v155_v21 = vadd.f32 %v2627_v41, %v154_v18  ;;  %v2785_v18 = vld [vmem:[#allocation3 + $0x30] sm:$0xff] }
  0xb6   :  { %575 = vmatpush.msra.mxu1 %v2771_v0  ;;  %3890 = vst [vmem:[#allocation31_spill] sm:$0xff] %v2785_v18  ;;  %562 = vmatpush.msra.mxu3 %v2785_v18  ;;  %v2811_v0 = vld [vmem:[#allocation3 + $0x98] sm:$0xff] }
  0xb7   :  { %vm172_vm5 = vcmp.gt.f32.partialorder %v155_v21, 0.0  ;;  %v180_v24 = vmul.f32 0.01, %v155_v21  ;;  %713 = vmatpush.msra.mxu0 %v2785_v18  ;;  %3894 = vst [vmem:[#allocation35_spill] sm:$0xff] %v2811_v0  ;;  %662 = vmatpush.msra.mxu2 %v2604_v34 }
  0xb8   :  { %576 = vmatpush.msra.mxu1 %v2783_v13 }
  0xb9   :  { %v188_v25 = vsel %vm172_vm5, %v155_v21, %v180_v24  ;;  %v2793_v21 = vld [vmem:[#allocation3 + $0xd8] sm:$0xff]  ;;  %v2795_v24 = vld [vmem:[#allocation3 + $0x10] sm:$0xff]  ;;  %663 = vmatpush.msra.mxu2 %v2610_v36 }
  0xba   :  { %2023 = vmatmul.msk.f32.gmra.mxu1 %vm219_vm1, %v188_v25  ;;  %2031 = vmatmul.msk.f32.gmra.mxu2 %vm219_vm1, %v188_v25  ;;  %3891 = vst [vmem:[#allocation32_spill] sm:$0xff] %v2793_v21 }
  0xbb   :  { %2039 = vmatmul.msk.f32.gmra.mxu3 %vm219_vm1, %v188_v25  ;;  %2047 = vmatmul.msk.f32.gmra.mxu0 %vm219_vm1, %v188_v25  ;;  %3892 = vst [vmem:[#allocation33_spill] sm:$0xff] %v2795_v24 }
  0xbc   :  { %v157_v57 = vpop.f32.mrf.mxu0  ;;  %577 = vmatpush.msra.mxu1 %v2793_v21  ;;  %563 = vmatpush.msra.mxu3 %v2795_v24  ;;  %v2834_v21 = vld [vmem:[#allocation3 + $0x38] sm:$0xff] }
  0xbd   :  { %v158_v61 = vadd.f32 %v2627_v41, %v157_v57  ;;  %v163_v57 = vpop.f32.mrf.mxu3  ;;  %714 = vmatpush.msra.mxu0 %v2795_v24  ;;  %664 = vmatpush.msra.mxu2 %v2613_v37  ;;  %3897 = vst [vmem:[#allocation38_spill] sm:$0xff] %v2834_v21 }
  0xbe   :  { %679 = vmatpush.msrb.mxu3 %v2583_v27 }
  0xbf   :  { %vm173_vm6 = vcmp.gt.f32.partialorder %v158_v61, 0.0  ;;  %v181_v9 = vmul.f32 0.01, %v158_v61  ;;  %850 = vmatpush.msrb.mxu0 %v2618_v39  ;;  %665 = vmatpush.msra.mxu2 %v2620_v40  ;;  %v2842_v39 = vld [vmem:[#allocation3 + $0x18] sm:$0xff] }
  0xc0   :  { %680 = vmatpush.msrb.mxu3 %v2586_v28  ;;  %3898 = vst [vmem:[#allocation39_spill] sm:$0xff] %v2842_v39 }
  0xc1   :  { %v189_v12 = vsel %vm173_vm6, %v158_v61, %v181_v9  ;;  %v2800_v9 = vld [vmem:[#allocation3 + $0xb8] sm:$0xff]  ;;  %851 = vmatpush.msrb.mxu0 %v2636_v44  ;;  %666 = vmatpush.msra.mxu2 %v2631_v42 }
  0xc2   :  { %2024 = vmatmul.msk.f32.gmra.mxu1 %vm219_vm1, %v189_v12  ;;  %2032 = vmatmul.msk.f32.gmra.mxu2 %vm219_vm1, %v189_v12  ;;  %3893 = vst [vmem:[#allocation34_spill] sm:$0xff] %v2800_v9 }
  0xc3   :  { %2040 = vmatmul.msk.f32.gmra.mxu3 %vm219_vm1, %v189_v12  ;;  %2048 = vmatmul.msk.f32.gmra.mxu0 %vm219_vm1, %v189_v12 }
  0xc4   :  { %v160_v25 = vpop.f32.mrf.mxu0  ;;  %578 = vmatpush.msra.mxu1 %v2800_v9  ;;  %v2819_v9 = vld [vmem:[#allocation3 + $0x78] sm:$0xff]  ;;  %681 = vmatpush.msrb.mxu3 %v2592_v30 }
  0xc5   :  { %v161_v61 = vadd.f32 %v2627_v41, %v160_v25  ;;  %v164_v25 = vadd.f32 %v2627_v41, %v163_v57  ;;  %3895 = vst [vmem:[#allocation36_spill] sm:$0xff] %v2819_v9  ;;  %852 = vmatpush.msrb.mxu0 %v2650_v51  ;;  %667 = vmatpush.msra.mxu2 %v2640_v46 }
  0xc6   :  { %579 = vmatpush.msra.mxu1 %v2811_v0  ;;  %682 = vmatpush.msrb.mxu3 %v2598_v32 }
  0xc7   :  { %vm174_vm7 = vcmp.gt.f32.partialorder %v161_v61, 0.0  ;;  %v182_v12 = vmul.f32 0.01, %v161_v61  ;;  %v183_v57 = vmul.f32 0.01, %v164_v25  ;;  %vm175_vm8 = vcmp.gt.f32.partialorder %v164_v25, 0.0  ;;  %853 = vmatpush.msrb.mxu0 %v2666_v56  ;;  %668 = vmatpush.msra.mxu2 %v2645_v48 }
  0xc8   :  { %580 = vmatpush.msra.mxu1 %v2819_v9  ;;  %683 = vmatpush.msrb.mxu3 %v2607_v35 }
  0xc9   :  { %v190_v13 = vsel %vm174_vm7, %v161_v61, %v182_v12  ;;  %v2823_v61 = vld [vmem:[#allocation3 + $0x58] sm:$0xff]  ;;  %v166_v12 = vpop.f32.mrf.mxu3  ;;  %v191_v0 = vsel %vm175_vm8, %v164_v25, %v183_v57  ;;  %854 = vmatpush.msrb.mxu0 %v2680_v63  ;;  %669 = vmatpush.msra.mxu2 %v2652_v52  ;;  %v2373_v25 = vmov 0.0   ;;  %v3899_v57 = vld [vmem:[#allocation28_spill] sm:$0xff] }
  0xca   :  { %2025 = vmatmul.msk.f32.gmra.mxu1 %vm219_vm1, %v190_v13  ;;  %2033 = vmatmul.msk.f32.gmra.mxu2 %vm219_vm1, %v190_v13  ;;  %3896 = vst [vmem:[#allocation37_spill] sm:$0xff] %v2823_v61 }
  0xcb   :  { %2041 = vmatmul.msk.f32.gmra.mxu3 %vm219_vm1, %v190_v13  ;;  %2049 = vmatmul.msk.f32.gmra.mxu0 %vm219_vm1, %v190_v13  ;;  %v167_v13 = vadd.f32 %v2627_v41, %v166_v12  ;;  %v3900_v12 = vld [vmem:[#allocation30_spill] sm:$0xff] }
  0xcc   :  { %581 = vmatpush.msra.mxu1 %v2823_v61  ;;  %684 = vmatpush.msrb.mxu3 %v2616_v38 }
  0xcd   :  { %v184_v41 = vmul.f32 0.01, %v167_v13  ;;  %vm176_vm9 = vcmp.gt.f32.partialorder %v167_v13, 0.0  ;;  %855 = vmatpush.msrb.mxu0 %v2696_v4  ;;  %670 = vmatpush.msra.mxu2 %v2660_v54 }
  0xce   :  { %582 = vmatpush.msra.mxu1 %v2834_v21  ;;  %685 = vmatpush.msrb.mxu3 %v2634_v43 }
  0xcf   :  { %856 = vmatpush.msrb.mxu0 %v2704_v8  ;;  %671 = vmatpush.msra.mxu2 %v2670_v58 }
  0xd0   :  { %583 = vmatpush.msra.mxu1 %v2842_v39  ;;  %686 = vmatpush.msrb.mxu3 %v2648_v50 }
  0xd1   :  { %857 = vmatpush.msrb.mxu0 %v2713_v11  ;;  %672 = vmatpush.msra.mxu2 %v2676_v60 }
  0xd2   :  { %2026 = vmatmul.msk.f32.gmra.mxu1 %vm219_vm1, %v191_v0  ;;  %2034 = vmatmul.msk.f32.gmra.mxu2 %vm219_vm1, %v191_v0 }
  0xd3   :  { %2042 = vmatmul.msk.f32.gmra.mxu3 %vm219_vm1, %v191_v0  ;;  %2050 = vmatmul.msk.f32.gmra.mxu0 %vm219_vm1, %v191_v0  ;;  %v192_v0 = vsel %vm176_vm9, %v167_v13, %v184_v41  ;;  %v3901_v13 = vld [vmem:[#allocation32_spill] sm:$0xff]  ;;  %v3902_v41 = vld [vmem:[#allocation34_spill] sm:$0xff] }
  0xd4   :  { %687 = vmatpush.msrb.mxu3 %v2664_v55  ;;  %858 = vmatpush.msrb.mxu0 %v2730_v17 }
  0xd5   :  { %673 = vmatpush.msra.mxu2 %v2685_v1 }
  0xd6   :  { %688 = vmatpush.msrb.mxu3 %v2678_v62  ;;  %859 = vmatpush.msrb.mxu0 %v2734_v19 }
  0xd7   :  { %674 = vmatpush.msra.mxu2 %v2692_v2 }
  0xd8   :  { %689 = vmatpush.msrb.mxu3 %v2694_v3  ;;  %860 = vmatpush.msrb.mxu0 %v2745_v23 }
  0xda   :  { %2027 = vmatmul.msk.f32.gmra.mxu1 %vm219_vm1, %v192_v0  ;;  %2035 = vmatmul.msk.f32.gmra.mxu2 %vm219_vm1, %v192_v0 }
  0xdb   :  { %2043 = vmatmul.msk.f32.gmra.mxu3 %vm219_vm1, %v192_v0  ;;  %2051 = vmatmul.msk.f32.gmra.mxu0 %vm219_vm1, %v192_v0  ;;  %v3903_v0 = vld [vmem:[#allocation35_spill] sm:$0xff] }
  0xdc   :  { %690 = vmatpush.msrb.mxu3 %v2702_v7  ;;  %861 = vmatpush.msrb.mxu0 %v2753_v45 }
  0xde   :  { %691 = vmatpush.msrb.mxu3 %v2728_v16  ;;  %862 = vmatpush.msrb.mxu0 %v2764_v53 }
  0xe0   :  { %692 = vmatpush.msrb.mxu3 %v2736_v20  ;;  %863 = vmatpush.msrb.mxu0 %v2774_v5 }
  0xe2   :  { %524 = vmatmul.f32.vlgmr.msrb.gmra.mxu1 %v2373_v25  ;;  %544 = vmatmul.f32.vlgmr.msrb.gmra.mxu2 %v2373_v25 }
  0xe3   :  { %564 = vmatmul.f32.vlgmr.msra.gmra.mxu3 %v2373_v25  ;;  %719 = vmatpush.msrb.mxu1 %v2700_v6 }
  0xe4   :  { %810 = vmatpush.msrb.mxu2 %v2588_v29  ;;  %693 = vmatpush.msrb.mxu3 %v2762_v49 }
  0xe5   :  { %720 = vmatpush.msrb.mxu1 %v2710_v10  ;;  %864 = vmatpush.msrb.mxu0 %v2785_v18 }
  0xe6   :  { %811 = vmatpush.msrb.mxu2 %v2595_v31  ;;  %694 = vmatpush.msrb.mxu3 %v2768_v59 }
  0xe7   :  { %721 = vmatpush.msrb.mxu1 %v2719_v14  ;;  %865 = vmatpush.msrb.mxu0 %v2795_v24 }
  0xe8   :  { %830 = vmatpush.msra.mxu3 %v2583_v27  ;;  %812 = vmatpush.msrb.mxu2 %v2600_v33 }
  0xe9   :  { %722 = vmatpush.msrb.mxu1 %v2726_v15 }
  0xea   :  { %584 = vmatmul.f32.vlgmr.msra.gmra.mxu1 %v2373_v25  ;;  %831 = vmatpush.msra.mxu3 %v2586_v28 }
  0xeb   :  { %723 = vmatpush.msrb.mxu1 %v2740_v22  ;;  %813 = vmatpush.msrb.mxu2 %v2604_v34 }
  0xec   :  { %832 = vmatpush.msra.mxu3 %v2592_v30 }
  0xed   :  { %724 = vmatpush.msrb.mxu1 %v2750_v26  ;;  %814 = vmatpush.msrb.mxu2 %v2610_v36 }
  0xee   :  { %833 = vmatpush.msra.mxu3 %v2598_v32 }
  0xef   :  { %725 = vmatpush.msrb.mxu1 %v2760_v47  ;;  %815 = vmatpush.msrb.mxu2 %v2613_v37 }
  0xf0   :  { %834 = vmatpush.msra.mxu3 %v2607_v35 }
  0xf1   :  { %726 = vmatpush.msrb.mxu1 %v3899_v57  ;;  %816 = vmatpush.msrb.mxu2 %v2620_v40 }
  0xf2   :  { %835 = vmatpush.msra.mxu3 %v2616_v38 }
  0xf3   :  { %727 = vmatpush.msrb.mxu1 %v3900_v12  ;;  %817 = vmatpush.msrb.mxu2 %v2631_v42 }
  0xf4   :  { %836 = vmatpush.msra.mxu3 %v2634_v43 }
  0xf5   :  { %728 = vmatpush.msrb.mxu1 %v3901_v13  ;;  %818 = vmatpush.msrb.mxu2 %v2640_v46 }
  0xf6   :  { %837 = vmatpush.msra.mxu3 %v2648_v50 }
  0xf7   :  { %729 = vmatpush.msrb.mxu1 %v3902_v41  ;;  %819 = vmatpush.msrb.mxu2 %v2645_v48 }
  0xf8   :  { %838 = vmatpush.msra.mxu3 %v2664_v55 }
  0xf9   :  { %730 = vmatpush.msrb.mxu1 %v3903_v0  ;;  %820 = vmatpush.msrb.mxu2 %v2652_v52 }
  0xfa   :  { %839 = vmatpush.msra.mxu3 %v2678_v62 }
  0xfb   :  { %731 = vmatpush.msrb.mxu1 %v2819_v9  ;;  %821 = vmatpush.msrb.mxu2 %v2660_v54 }
  0xfc   :  { %840 = vmatpush.msra.mxu3 %v2694_v3 }
  0xfd   :  { %732 = vmatpush.msrb.mxu1 %v2823_v61  ;;  %822 = vmatpush.msrb.mxu2 %v2670_v58 }
  0xfe   :  { %841 = vmatpush.msra.mxu3 %v2702_v7 }
  0xff   :  { %733 = vmatpush.msrb.mxu1 %v2834_v21  ;;  %823 = vmatpush.msrb.mxu2 %v2676_v60 }
 0x100   :  { %842 = vmatpush.msra.mxu3 %v2728_v16 }
 0x101   :  { %734 = vmatpush.msrb.mxu1 %v2842_v39  ;;  %824 = vmatpush.msrb.mxu2 %v2685_v1 }
 0x102   :  { %843 = vmatpush.msra.mxu3 %v2736_v20 }
 0x103   :  { %870 = vmatpush.msra.mxu1 %v2700_v6  ;;  %825 = vmatpush.msrb.mxu2 %v2692_v2 }
 0x104   :  { %844 = vmatpush.msra.mxu3 %v2762_v49 }
 0x105   :  { %871 = vmatpush.msra.mxu1 %v2710_v10 }
 0x106   :  { %845 = vmatpush.msra.mxu3 %v2768_v59  ;;  %v209_v59 = vld [vmem:[%s3904_s2] sm:$0xf] }
 0x107   :  { %872 = vmatpush.msra.mxu1 %v2719_v14  ;;  %v211_v18 = vperm.slane %v209_v59, 0  ;;  %v2961_v20 = vperm.slane %v209_v59, 2  ;;  %v2965_v53 = vperm.slane %v209_v59, 3 }
 0x109   :  { %873 = vmatpush.msra.mxu1 %v2726_v15  ;;  %3908 = vst [vmem:[#allocation41_spill] sm:$0xff] %v2965_v53 }
 0x10b   :  { %874 = vmatpush.msra.mxu1 %v2740_v22 }
 0x10d   :  { %875 = vmatpush.msra.mxu1 %v2750_v26 }
 0x10f   :  { %876 = vmatpush.msra.mxu1 %v2760_v47 }
 0x111   :  { %877 = vmatpush.msra.mxu1 %v3899_v57 }
 0x113   :  { %878 = vmatpush.msra.mxu1 %v3900_v12 }
 0x115   :  { %879 = vmatpush.msra.mxu1 %v3901_v13 }
 0x117   :  { %880 = vmatpush.msra.mxu1 %v3902_v41 }
 0x119   :  { %881 = vmatpush.msra.mxu1 %v3903_v0 }
 0x11b   :  { %882 = vmatpush.msra.mxu1 %v2819_v9 }
 0x11d   :  { %883 = vmatpush.msra.mxu1 %v2823_v61 }
 0x11f   :  { %884 = vmatpush.msra.mxu1 %v2834_v21  ;;  %v261_v25 = vpop.f32.mrf.mxu1  ;;  %v212_v21 = vperm.slane %v209_v59, 1 }
 0x120   :  { %v2947_v24 = vpop.f32.mrf.mxu0 }
 0x121   :  { %885 = vmatpush.msra.mxu1 %v2842_v39 }
 0x125   :  { %v2953_v2 = vpop.f32.mrf.mxu2 }
 0x126   :  { %v2955_v49 = vpop.f32.mrf.mxu3 }
 0x127   :  { %v264_v1 = vpop.f32.mrf.mxu1 }
 0x128   :  { %v2957_v5 = vadd.f32 %v264_v1, %v211_v18  ;;  %v2959_v61 = vpop.f32.mrf.mxu0 }
 0x129   :  { %3906 = vst [vmem:[#allocation30_spill] sm:$0xff] %v2959_v61 }
 0x12a   :  { %3905 = vst [vmem:[#allocation28_spill] sm:$0xff] %v2957_v5 }
 0x12d   :  { %v305_v60 = vpop.f32.mrf.mxu2 }
 0x12e   :  { %v2963_v9 = vadd.f32 %v305_v60, %v212_v21  ;;  %v346_v39 = vpop.f32.mrf.mxu3 }
 0x12f   :  { %v2968_v16 = vadd.f32 %v346_v39, %v2961_v20  ;;  %v267_v58 = vpop.f32.mrf.mxu1 }
 0x130   :  { %3907 = vst [vmem:[#allocation40_spill] sm:$0xff] %v2963_v9  ;;  %v2970_v0 = vadd.f32 %v267_v58, %v211_v18  ;;  %v390_v45 = vpop.f32.mrf.mxu0 }
 0x131   :  { %3909 = vst [vmem:[#allocation42_spill] sm:$0xff] %v2968_v16  ;;  %v2973_v1 = vadd.f32 %v390_v45, %v2965_v53 }
 0x132   :  { %3910 = vst [vmem:[#allocation43_spill] sm:$0xff] %v2970_v0 }
 0x133   :  { %3911 = vst [vmem:[#allocation44_spill] sm:$0xff] %v2973_v1 }
 0x135   :  { %v308_v5 = vpop.f32.mrf.mxu2 }
 0x136   :  { %v2975_v61 = vadd.f32 %v308_v5, %v212_v21  ;;  %v349_v7 = vpop.f32.mrf.mxu3 }
 0x137   :  { %v2978_v60 = vadd.f32 %v349_v7, %v2961_v20  ;;  %v270_v9 = vpop.f32.mrf.mxu1 }
 0x138   :  { %3912 = vst [vmem:[#allocation45_spill] sm:$0xff] %v2975_v61  ;;  %v2980_v59 = vadd.f32 %v270_v9, %v211_v18  ;;  %v393_v54 = vpop.f32.mrf.mxu0 }
 0x139   :  { %3913 = vst [vmem:[#allocation46_spill] sm:$0xff] %v2978_v60  ;;  %v2983_v39 = vadd.f32 %v393_v54, %v2965_v53 }
 0x13a   :  { %3914 = vst [vmem:[#allocation47_spill] sm:$0xff] %v2980_v59 }
 0x13b   :  { %3915 = vst [vmem:[#allocation48_spill] sm:$0xff] %v2983_v39 }
 0x13d   :  { %v311_v58 = vpop.f32.mrf.mxu2 }
 0x13e   :  { %v2985_v0 = vadd.f32 %v311_v58, %v212_v21  ;;  %v352_v16 = vpop.f32.mrf.mxu3 }
 0x13f   :  { %v2988_v45 = vadd.f32 %v352_v16, %v2961_v20  ;;  %v273_v5 = vpop.f32.mrf.mxu1 }
 0x140   :  { %3916 = vst [vmem:[#allocation49_spill] sm:$0xff] %v2985_v0  ;;  %v2990_v61 = vadd.f32 %v273_v5, %v211_v18  ;;  %v396_v1 = vpop.f32.mrf.mxu0 }
 0x141   :  { %3917 = vst [vmem:[#allocation50_spill] sm:$0xff] %v2988_v45  ;;  %v2993_v7 = vadd.f32 %v396_v1, %v2965_v53 }
 0x142   :  { %3918 = vst [vmem:[#allocation51_spill] sm:$0xff] %v2990_v61 }
 0x143   :  { %3919 = vst [vmem:[#allocation52_spill] sm:$0xff] %v2993_v7 }
 0x145   :  { %v314_v9 = vpop.f32.mrf.mxu2 }
 0x146   :  { %v2995_v59 = vadd.f32 %v314_v9, %v212_v21  ;;  %v355_v60 = vpop.f32.mrf.mxu3 }
 0x147   :  { %v2998_v54 = vadd.f32 %v355_v60, %v2961_v20  ;;  %v276_v58 = vpop.f32.mrf.mxu1 }
 0x148   :  { %3920 = vst [vmem:[#allocation53_spill] sm:$0xff] %v2995_v59  ;;  %v3000_v0 = vadd.f32 %v276_v58, %v211_v18  ;;  %v399_v39 = vpop.f32.mrf.mxu0 }
 0x149   :  { %3921 = vst [vmem:[#allocation54_spill] sm:$0xff] %v2998_v54  ;;  %v3003_v16 = vadd.f32 %v399_v39, %v2965_v53 }
 0x14a   :  { %3922 = vst [vmem:[#allocation55_spill] sm:$0xff] %v3000_v0 }
 0x14b   :  { %3923 = vst [vmem:[#allocation56_spill] sm:$0xff] %v3003_v16 }
 0x14d   :  { %v317_v5 = vpop.f32.mrf.mxu2 }
 0x14e   :  { %v3005_v61 = vadd.f32 %v317_v5, %v212_v21  ;;  %v358_v45 = vpop.f32.mrf.mxu3 }
 0x14f   :  { %v3008_v1 = vadd.f32 %v358_v45, %v2961_v20  ;;  %v279_v9 = vpop.f32.mrf.mxu1  ;;  %v262_v45 = vadd.f32 %v261_v25, %v211_v18 }
 0x150   :  { %3924 = vst [vmem:[#allocation57_spill] sm:$0xff] %v3005_v61  ;;  %v3010_v59 = vadd.f32 %v279_v9, %v211_v18  ;;  %v402_v7 = vpop.f32.mrf.mxu0 }
 0x151   :  { %3925 = vst [vmem:[#allocation58_spill] sm:$0xff] %v3008_v1  ;;  %v3013_v60 = vadd.f32 %v402_v7, %v2965_v53 }
 0x152   :  { %3926 = vst [vmem:[#allocation59_spill] sm:$0xff] %v3010_v59 }
 0x153   :  { %3927 = vst [vmem:[#allocation60_spill] sm:$0xff] %v3013_v60 }
 0x155   :  { %v320_v58 = vpop.f32.mrf.mxu2 }
 0x156   :  { %v3015_v0 = vadd.f32 %v320_v58, %v212_v21  ;;  %v361_v54 = vpop.f32.mrf.mxu3  ;;  %v303_v58 = vadd.f32 %v2953_v2, %v212_v21 }
 0x157   :  { %v3018_v39 = vadd.f32 %v361_v54, %v2961_v20  ;;  %v282_v5 = vpop.f32.mrf.mxu1  ;;  %v385_v54 = vadd.f32 %v2947_v24, %v2965_v53  ;;  %v344_v24 = vadd.f32 %v2955_v49, %v2961_v20 }
 0x158   :  { %3928 = vst [vmem:[#allocation61_spill] sm:$0xff] %v3015_v0  ;;  %v3020_v61 = vadd.f32 %v282_v5, %v211_v18 }
 0x159   :  { %3929 = vst [vmem:[#allocation62_spill] sm:$0xff] %v3018_v39 }
 0x15a   :  { %3930 = vst [vmem:[#allocation63_spill] sm:$0xff] %v3020_v61 }
 0x15d   :  { %v323_v16 = vpop.f32.mrf.mxu2 }
 0x15e   :  { %v3022_v1 = vadd.f32 %v323_v16, %v212_v21  ;;  %v364_v9 = vpop.f32.mrf.mxu3 }
 0x15f   :  { %v3025_v59 = vadd.f32 %v364_v9, %v2961_v20  ;;  %v525_v7 = vpop.f32.mrf.mxu1 }
 0x160   :  { %3931 = vst [vmem:[#allocation64_spill] sm:$0xff] %v3022_v1  ;;  %v588_v60 = vadd.f32 %v525_v7, %v262_v45 }
 0x161   :  { %3932 = vst [vmem:[#allocation65_spill] sm:$0xff] %v3025_v59 }
 0x162   :  { %v2052_v41 = vmul.f32 -1.442695, %v588_v60 }
 0x164   :  { %2100 = vpow2.f32 %v2052_v41 }
 0x165   :  { %v545_v0 = vpop.f32.mrf.mxu2 }
 0x166   :  { %v589_v5 = vadd.f32 %v545_v0, %v303_v58  ;;  %v565_v59 = vpop.f32.mrf.mxu3 }
 0x167   :  { %v585_v61 = vpop.f32.mrf.mxu1 }
 0x168   :  { %v2053_v39 = vmul.f32 -1.442695, %v589_v5  ;;  %v591_v18 = vadd.f32 %v585_v61, %v385_v54 }
 0x16a   :  { %v2101_v25 = vpop.eup %2100  ;;  %2102 = vpow2.f32 %v2053_v39  ;;  %v2054_v16 = vmul.f32 -1.442695, %v591_v18  ;;  %v590_v39 = vadd.f32 %v565_v59, %v344_v24 }
 0x16b   :  { %v595_v1 = vadd.f32 1.0, %v2101_v25 }
 0x16c   :  { %2104 = vpow2.f32 %v2054_v16 }
 0x16d   :  { %2106 = vrcp.f32 %v595_v1  ;;  %v607_v5 = vand.u32 2147483648, %v595_v1  ;;  %vm601_vm11 = vweird.f32 %v595_v1  ;;  %v605_v16 = vand.u32 2147483647, %v595_v1 }
 0x16f   :  { %v608_v20 = vor.u32 1.1754944e-38, %v607_v5  ;;  %vm606_vm15 = vcmp.eq.f32.partialorder %v605_v16, 8.507059e+37 }
 0x170   :  { %v2103_v9 = vpop.eup %2102 }
 0x171   :  { %v614_v45 = vadd.f32 1.0, %v2103_v9 }
 0x172   :  { %v2105_v60 = vpop.eup %2104 }
 0x173   :  { %v2107_v7 = vpop.eup %2106  ;;  %2108 = vrcp.f32 %v614_v45  ;;  %v634_v21 = vadd.f32 1.0, %v2105_v60  ;;  %v626_v9 = vand.u32 2147483648, %v614_v45  ;;  %v624_v23 = vand.u32 2147483647, %v614_v45 }
 0x174   :  { %v597_v2 = vmul.f32 %v2107_v7, %v595_v1  ;;  %vm602_vm10 = vweird.f32 %v2107_v7  ;;  %vm620_vm14 = vweird.f32 %v614_v45 }
 0x175   :  { %2110 = vrcp.f32 %v634_v21  ;;  %vm603_vm12 = vmor %vm601_vm11, %vm602_vm10  ;;  %vm625_vm2 = vcmp.eq.f32.partialorder %v624_v23, 8.507059e+37  ;;  %vm640_vm4 = vweird.f32 %v634_v21 }
 0x176   :  { %v598_v41 = vsub.f32 1.0, %v597_v2  ;;  %2112 = vtanh.f32 %v590_v39 }
 0x178   :  { %v599_v61 = vmul.f32 %v2107_v7, %v598_v41  ;;  %v627_v41 = vor.u32 1.1754944e-38, %v626_v9 }
 0x179   :  { %v2109_v0 = vpop.eup %2108 }
 0x17a   :  { %v616_v58 = vmul.f32 %v2109_v0, %v614_v45  ;;  %v600_v54 = vadd.f32 %v2107_v7, %v599_v61  ;;  %vm621_vm13 = vweird.f32 %v2109_v0  ;;  %v644_v45 = vand.u32 2147483647, %v634_v21 }
 0x17b   :  { %v2111_v18 = vpop.eup %2110  ;;  %vm622_vm0 = vmor %vm620_vm14, %vm621_vm13 }
 0x17c   :  { %v617_v25 = vsub.f32 1.0, %v616_v58  ;;  %v636_v60 = vmul.f32 %v2111_v18, %v634_v21  ;;  %v604_v53 = vsel %vm603_vm12, %v2107_v7, %v600_v54  ;;  %v2113_v58 = vpop.eup %2112  ;;  %vm641_vm3 = vweird.f32 %v2111_v18 }
 0x17d   :  { %v609_v24 = vsel %vm606_vm15, %v608_v20, %v604_v53  ;;  %v646_v54 = vand.u32 2147483648, %v634_v21  ;;  %vm642_vm5 = vmor %vm640_vm4, %vm641_vm3  ;;  %vm645_vm6 = vcmp.eq.f32.partialorder %v644_v45, 8.507059e+37  ;;  %v3962_v21 = vld [vmem:[#allocation40_spill] sm:$0xff] }
 0x17e   :  { %v618_v2 = vmul.f32 %v2109_v0, %v617_v25  ;;  %v637_v49 = vsub.f32 1.0, %v636_v60  ;;  %v651_v39 = vmul.f32 %v2113_v58, %v609_v24 }
 0x17f   :  { %v647_v53 = vor.u32 1.1754944e-38, %v646_v54 }
 0x180   :  { %v619_v59 = vadd.f32 %v2109_v0, %v618_v2  ;;  %v638_v3 = vmul.f32 %v2111_v18, %v637_v49  ;;  %v3103_v2 = vpop.f32.mrf.mxu0 }
 0x182   :  { %v623_v61 = vsel %vm622_vm0, %v2109_v0, %v619_v59  ;;  %v639_v7 = vadd.f32 %v2111_v18, %v638_v3  ;;  %v3958_v3 = vld [vmem:[#allocation39_spill] sm:$0xff] }
 0x183   :  { %v628_v1 = vsel %vm625_vm2, %v627_v41, %v623_v61 }
 0x184   :  { %v650_v52 = vmul.f32 0.0, %v628_v1  ;;  %v643_v5 = vsel %vm642_vm5, %v2111_v18, %v639_v7 }
 0x185   :  { %v648_v23 = vsel %vm645_vm6, %v647_v53, %v643_v5 }
 0x186   :  { %v3032_v13 = vadd.f32 %v651_v39, %v650_v52  ;;  %v3933_v52 = vld [vmem:[#allocation12_spill] sm:$0xff]  ;;  %v3964_v39 = vld [vmem:[#allocation42_spill] sm:$0xff] }
 0x187   :  { %3963 = vst [vmem:[#allocation12_spill] sm:$0xff] %v3103_v2 }
 0x188   :  { %2114 = vtanh.f32 %v3032_v13 }
 0x18e   :  { %v2115_v0 = vpop.eup %2114 }
 0x18f   :  { %v654_v25 = vmul.f32 %v2115_v0, %v648_v23 }
 0x191   :  { %675 = vmatmul.f32.vlgmr.msra.gmra.mxu2 %v654_v25  ;;  %695 = vmatmul.f32.vlgmr.msrb.gmra.mxu3 %v654_v25 }
 0x192   :  { %715 = vmatmul.f32.vlgmr.msra.gmra.mxu0 %v654_v25  ;;  %735 = vmatmul.f32.vlgmr.msrb.gmra.mxu1 %v654_v25 }
 0x193   :  { %961 = vmatpush.msra.mxu2 %v2588_v29  ;;  %981 = vmatpush.msrb.mxu3 %v2583_v27  ;;  %v3934_v27 = vld [vmem:[#allocation32_spill] sm:$0xff]  ;;  %v3936_v29 = vld [vmem:[#allocation19_spill] sm:$0xff] }
 0x194   :  { %1001 = vmatpush.msra.mxu0 %v3933_v52  ;;  %1021 = vmatpush.msrb.mxu1 %v2700_v6  ;;  %v3960_v6 = vld [vmem:[#allocation30_spill] sm:$0xff] }
 0x195   :  { %962 = vmatpush.msra.mxu2 %v2595_v31  ;;  %982 = vmatpush.msrb.mxu3 %v2586_v28  ;;  %v3935_v28 = vld [vmem:[#allocation13_spill] sm:$0xff]  ;;  %v3938_v31 = vld [vmem:[#allocation34_spill] sm:$0xff] }
 0x196   :  { %1002 = vmatpush.msra.mxu0 %v2636_v44  ;;  %1022 = vmatpush.msrb.mxu1 %v2710_v10  ;;  %v3949_v44 = vld [vmem:[#allocation29_spill] sm:$0xff] }
 0x197   :  { %963 = vmatpush.msra.mxu2 %v2600_v33  ;;  %983 = vmatpush.msrb.mxu3 %v2592_v30  ;;  %v3937_v30 = vld [vmem:[#allocation23_spill] sm:$0xff]  ;;  %v3940_v33 = vld [vmem:[#allocation20_spill] sm:$0xff] }
 0x198   :  { %1003 = vmatpush.msra.mxu0 %v2650_v51  ;;  %1023 = vmatpush.msrb.mxu1 %v2719_v14  ;;  %v3953_v51 = vld [vmem:[#allocation31_spill] sm:$0xff] }
 0x199   :  { %964 = vmatpush.msra.mxu2 %v2604_v34  ;;  %984 = vmatpush.msrb.mxu3 %v2598_v32  ;;  %v3939_v32 = vld [vmem:[#allocation14_spill] sm:$0xff]  ;;  %v3941_v34 = vld [vmem:[#allocation24_spill] sm:$0xff] }
 0x19a   :  { %1004 = vmatpush.msra.mxu0 %v2666_v56  ;;  %1024 = vmatpush.msrb.mxu1 %v2726_v15  ;;  %v3955_v56 = vld [vmem:[#allocation18_spill] sm:$0xff] }
 0x19b   :  { %965 = vmatpush.msra.mxu2 %v2610_v36  ;;  %985 = vmatpush.msrb.mxu3 %v2607_v35  ;;  %v3942_v35 = vld [vmem:[#allocation35_spill] sm:$0xff] }
 0x19c   :  { %1005 = vmatpush.msra.mxu0 %v2680_v63  ;;  %1025 = vmatpush.msrb.mxu1 %v2740_v22  ;;  %v3943_v36 = vld [vmem:[#allocation15_spill] sm:$0xff]  ;;  %v3957_v63 = vld [vmem:[#allocation33_spill] sm:$0xff] }
 0x19d   :  { %966 = vmatpush.msra.mxu2 %v2613_v37  ;;  %986 = vmatpush.msrb.mxu3 %v2616_v38  ;;  %v3944_v37 = vld [vmem:[#allocation21_spill] sm:$0xff]  ;;  %v3945_v38 = vld [vmem:[#allocation26_spill] sm:$0xff] }
 0x19e   :  { %1006 = vmatpush.msra.mxu0 %v2696_v4  ;;  %1026 = vmatpush.msrb.mxu1 %v2750_v26  ;;  %v3959_v4 = vld [vmem:[#allocation41_spill] sm:$0xff] }
 0x19f   :  { %967 = vmatpush.msra.mxu2 %v2620_v40  ;;  %987 = vmatpush.msrb.mxu3 %v2634_v43  ;;  %v3946_v40 = vld [vmem:[#allocation36_spill] sm:$0xff]  ;;  %v3948_v43 = vld [vmem:[#allocation22_spill] sm:$0xff] }
 0x1a0   :  { %1007 = vmatpush.msra.mxu0 %v2704_v8  ;;  %1027 = vmatpush.msrb.mxu1 %v2760_v47  ;;  %v388_v8 = vadd.f32 %v3960_v6, %v3959_v4  ;;  %v3986_v4 = vld [vmem:[#allocation45_spill] sm:$0xff] }
 0x1a1   :  { %968 = vmatpush.msra.mxu2 %v2631_v42  ;;  %988 = vmatpush.msrb.mxu3 %v2648_v50  ;;  %v3947_v42 = vld [vmem:[#allocation16_spill] sm:$0xff]  ;;  %v3952_v50 = vld [vmem:[#allocation25_spill] sm:$0xff] }
 0x1a2   :  { %1008 = vmatpush.msra.mxu0 %v2713_v11  ;;  %1028 = vmatpush.msrb.mxu1 %v3899_v57 }
 0x1a3   :  { %969 = vmatpush.msra.mxu2 %v2640_v46  ;;  %989 = vmatpush.msrb.mxu3 %v2664_v55  ;;  %v3950_v46 = vld [vmem:[#allocation37_spill] sm:$0xff]  ;;  %v3954_v55 = vld [vmem:[#allocation38_spill] sm:$0xff] }
 0x1a4   :  { %1009 = vmatpush.msra.mxu0 %v2730_v17  ;;  %1029 = vmatpush.msrb.mxu1 %v3900_v12 }
 0x1a5   :  { %970 = vmatpush.msra.mxu2 %v2645_v48  ;;  %990 = vmatpush.msrb.mxu3 %v2678_v62  ;;  %v3951_v48 = vld [vmem:[#allocation17_spill] sm:$0xff]  ;;  %v3956_v62 = vld [vmem:[#allocation27_spill] sm:$0xff] }
 0x1a6   :  { %1010 = vmatpush.msra.mxu0 %v2734_v19  ;;  %1030 = vmatpush.msrb.mxu1 %v3934_v27  ;;  %v3961_v19 = vld [vmem:[#allocation28_spill] sm:$0xff] }
 0x1a7   :  { %971 = vmatpush.msra.mxu2 %v3935_v28  ;;  %991 = vmatpush.msrb.mxu3 %v3936_v29 }
 0x1a8   :  { %1011 = vmatpush.msra.mxu0 %v3937_v30  ;;  %1031 = vmatpush.msrb.mxu1 %v3938_v31 }
 0x1a9   :  { %972 = vmatpush.msra.mxu2 %v3939_v32  ;;  %992 = vmatpush.msrb.mxu3 %v3940_v33 }
 0x1aa   :  { %1012 = vmatpush.msra.mxu0 %v3941_v34  ;;  %1032 = vmatpush.msrb.mxu1 %v3942_v35 }
 0x1ab   :  { %973 = vmatpush.msra.mxu2 %v3943_v36  ;;  %993 = vmatpush.msrb.mxu3 %v3944_v37 }
 0x1ac   :  { %1013 = vmatpush.msra.mxu0 %v3945_v38  ;;  %1033 = vmatpush.msrb.mxu1 %v3946_v40 }
 0x1ad   :  { %974 = vmatpush.msra.mxu2 %v3947_v42  ;;  %994 = vmatpush.msrb.mxu3 %v3948_v43 }
 0x1ae   :  { %1014 = vmatpush.msra.mxu0 %v3949_v44  ;;  %1034 = vmatpush.msrb.mxu1 %v3950_v46 }
 0x1af   :  { %975 = vmatpush.msra.mxu2 %v3951_v48  ;;  %995 = vmatpush.msrb.mxu3 %v3952_v50 }
 0x1b0   :  { %1015 = vmatpush.msra.mxu0 %v3953_v51  ;;  %1035 = vmatpush.msrb.mxu1 %v3954_v55 }
 0x1b1   :  { %976 = vmatpush.msra.mxu2 %v3955_v56  ;;  %996 = vmatpush.msrb.mxu3 %v3956_v62 }
 0x1b2   :  { %1016 = vmatpush.msra.mxu0 %v3957_v63  ;;  %1036 = vmatpush.msrb.mxu1 %v3958_v3 }
 0x20f   :  { %v736_v10 = vpop.f32.mrf.mxu1  ;;  %v716_v61 = vpop.f32.mrf.mxu0 }
 0x210   :  { %v742_v11 = vadd.f32 %v736_v10, %v388_v8  ;;  %v741_v7 = vadd.f32 %v716_v61, %v3964_v39  ;;  %v3143_v61 = vld [vmem:[#allocation3 + $0x1b8] sm:$0xff]  ;;  %v3152_v39 = vld [vmem:[#allocation3 + $0x190] sm:$0xff] }
 0x212   :  { %v2057_v14 = vmul.f32 -1.442695, %v742_v11 }
 0x214   :  { %2116 = vpow2.f32 %v2057_v14  ;;  %v676_v15 = vpop.f32.mrf.mxu2  ;;  %v696_v17 = vpop.f32.mrf.mxu3 }
 0x215   :  { %v739_v22 = vadd.f32 %v676_v15, %v3961_v19  ;;  %v740_v18 = vadd.f32 %v696_v17, %v3962_v21  ;;  %v3113_v21 = vld [vmem:[#allocation3 + $0x1e8] sm:$0xff] }
 0x217   :  { %v2055_v16 = vmul.f32 -1.442695, %v739_v22  ;;  %v2056_v9 = vmul.f32 -1.442695, %v740_v18  ;;  %v3116_v18 = vld [vmem:[#allocation3 + $0x1f0] sm:$0xff] }
 0x219   :  { %2118 = vpow2.f32 %v2055_v16  ;;  %v3119_v16 = vld [vmem:[#allocation3 + $0x1f8] sm:$0xff] }
 0x21a   :  { %v2117_v60 = vpop.eup %2116  ;;  %2120 = vpow2.f32 %v2056_v9  ;;  %v3122_v9 = vld [vmem:[#allocation3 + $0x1c0] sm:$0xff] }
 0x21b   :  { %v785_v20 = vadd.f32 1.0, %v2117_v60  ;;  %v3125_v60 = vld [vmem:[#allocation3 + $0x1c8] sm:$0xff] }
 0x21d   :  { %2122 = vrcp.f32 %v785_v20  ;;  %v797_v10 = vand.u32 2147483648, %v785_v20  ;;  %vm791_vm0 = vweird.f32 %v785_v20  ;;  %v795_v11 = vand.u32 2147483647, %v785_v20 }
 0x21f   :  { %v2119_v49 = vpop.eup %2118  ;;  %v798_v15 = vor.u32 1.1754944e-38, %v797_v10  ;;  %vm796_vm3 = vcmp.eq.f32.partialorder %v795_v11, 8.507059e+37  ;;  %v3270_v10 = vld [vmem:[#allocation3] sm:$0xff]  ;;  %v3273_v11 = vld [vmem:[#allocation3 + $0x8] sm:$0xff] }
 0x220   :  { %v2121_v59 = vpop.eup %2120  ;;  %v746_v41 = vadd.f32 1.0, %v2119_v49  ;;  %v3131_v49 = vld [vmem:[#allocation3 + $0x1d8] sm:$0xff]  ;;  %3982 = vst [vmem:[#allocation17_spill] sm:$0xff] %v3270_v10 }
 0x221   :  { %v765_v24 = vadd.f32 1.0, %v2121_v59  ;;  %v3134_v59 = vld [vmem:[#allocation3 + $0x1a0] sm:$0xff]  ;;  %3983 = vst [vmem:[#allocation25_spill] sm:$0xff] %v3273_v11 }
 0x222   :  { %2124 = vrcp.f32 %v746_v41  ;;  %v758_v23 = vand.u32 2147483648, %v746_v41  ;;  %v756_v28 = vand.u32 2147483647, %v746_v41  ;;  %vm752_vm9 = vweird.f32 %v746_v41 }
 0x223   :  { %2126 = vrcp.f32 %v765_v24  ;;  %v2123_v58 = vpop.eup %2122  ;;  %v777_v29 = vand.u32 2147483648, %v765_v24  ;;  %v775_v32 = vand.u32 2147483647, %v765_v24  ;;  %vm771_vm11 = vweird.f32 %v765_v24 }
 0x224   :  { %v787_v53 = vmul.f32 %v2123_v58, %v785_v20  ;;  %2128 = vtanh.f32 %v741_v7  ;;  %v759_v36 = vor.u32 1.1754944e-38, %v758_v23  ;;  %vm757_vm12 = vcmp.eq.f32.partialorder %v756_v28, 8.507059e+37  ;;  %v3128_v20 = vld [vmem:[#allocation3 + $0x1d0] sm:$0xff]  ;;  %v3155_v7 = vld [vmem:[#allocation3 + $0x198] sm:$0xff]  ;;  %v3173_v23 = vld [vmem:[#allocation3 + $0x148] sm:$0xff] }
 0x225   :  { %v778_v42 = vor.u32 1.1754944e-38, %v777_v29  ;;  %vm776_vm14 = vcmp.eq.f32.partialorder %v775_v32, 8.507059e+37  ;;  %vm792_vm15 = vweird.f32 %v2123_v58  ;;  %v3183_v28 = vld [vmem:[#allocation3 + $0x128] sm:$0xff]  ;;  %v3186_v29 = vld [vmem:[#allocation3 + $0x130] sm:$0xff] }
 0x226   :  { %v788_v33 = vsub.f32 1.0, %v787_v53  ;;  %vm793_vm2 = vmor %vm791_vm0, %vm792_vm15  ;;  %v3167_v53 = vld [vmem:[#allocation3 + $0x178] sm:$0xff]  ;;  %v3193_v32 = vld [vmem:[#allocation3 + $0x108] sm:$0xff] }
 0x228   :  { %v2125_v1 = vpop.eup %2124  ;;  %v789_v51 = vmul.f32 %v2123_v58, %v788_v33  ;;  %v3200_v33 = vld [vmem:[#allocation3 + $0xe0] sm:$0xff] }
 0x229   :  { %v2127_v54 = vpop.eup %2126  ;;  %v748_v45 = vmul.f32 %v2125_v1, %v746_v41  ;;  %vm753_vm7 = vweird.f32 %v2125_v1  ;;  %v3137_v41 = vld [vmem:[#allocation3 + $0x1a8] sm:$0xff] }
 0x22a   :  { %v767_v5 = vmul.f32 %v2127_v54, %v765_v24  ;;  %vm772_vm8 = vweird.f32 %v2127_v54  ;;  %vm754_vm10 = vmor %vm752_vm9, %vm753_vm7  ;;  %v2129_v43 = vpop.eup %2128  ;;  %v790_v8 = vadd.f32 %v2123_v58, %v789_v51  ;;  %v3140_v24 = vld [vmem:[#allocation3 + $0x1b0] sm:$0xff]  ;;  %v3250_v51 = vld [vmem:[#allocation3 + $0x40] sm:$0xff] }
 0x22b   :  { %v749_v0 = vsub.f32 1.0, %v748_v45  ;;  %vm773_vm13 = vmor %vm771_vm11, %vm772_vm8  ;;  %v3161_v45 = vld [vmem:[#allocation3 + $0x168] sm:$0xff]  ;;  %3976 = vst [vmem:[#allocation26_spill] sm:$0xff] %v3250_v51 }
 0x22c   :  { %v768_v25 = vsub.f32 1.0, %v767_v5  ;;  %v794_v14 = vsel %vm793_vm2, %v2123_v58, %v790_v8  ;;  %v3146_v58 = vld [vmem:[#allocation3 + $0x180] sm:$0xff]  ;;  %v3164_v5 = vld [vmem:[#allocation3 + $0x170] sm:$0xff]  ;;  %v3263_v8 = vld [vmem:[#allocation3 + $0x28] sm:$0xff] }
 0x22d   :  { %v750_v52 = vmul.f32 %v2125_v1, %v749_v0  ;;  %v799_v19 = vsel %vm796_vm3, %v798_v15, %v794_v14  ;;  %v3170_v0 = vld [vmem:[#allocation3 + $0x140] sm:$0xff]  ;;  %3980 = vst [vmem:[#allocation29_spill] sm:$0xff] %v3263_v8  ;;  %v3984_v14 = vld [vmem:[#allocation44_spill] sm:$0xff] }
 0x22e   :  { %v769_v30 = vmul.f32 %v2127_v54, %v768_v25  ;;  %v3176_v25 = vld [vmem:[#allocation3 + $0x150] sm:$0xff] }
 0x22f   :  { %v751_v34 = vadd.f32 %v2125_v1, %v750_v52  ;;  %v3180_v52 = vld [vmem:[#allocation3 + $0x120] sm:$0xff] }
 0x230   :  { %v770_v37 = vadd.f32 %v2127_v54, %v769_v30  ;;  %v3190_v30 = vld [vmem:[#allocation3 + $0x100] sm:$0xff] }
 0x231   :  { %v755_v38 = vsel %vm754_vm10, %v2125_v1, %v751_v34  ;;  %v3149_v1 = vld [vmem:[#allocation3 + $0x188] sm:$0xff] }
 0x232   :  { %v760_v44 = vsel %vm757_vm12, %v759_v36, %v755_v38  ;;  %v774_v48 = vsel %vm773_vm13, %v2127_v54, %v770_v37  ;;  %v3158_v54 = vld [vmem:[#allocation3 + $0x160] sm:$0xff]  ;;  %v3203_v34 = vld [vmem:[#allocation3 + $0xe8] sm:$0xff] }
 0x233   :  { %v779_v50 = vsel %vm776_vm14, %v778_v42, %v774_v48  ;;  %v802_v56 = vmul.f32 %v2129_v43, %v760_v44  ;;  %v3210_v36 = vld [vmem:[#allocation3 + $0xc0] sm:$0xff]  ;;  %v3213_v37 = vld [vmem:[#allocation3 + $0xc8] sm:$0xff] }
 0x234   :  { %v801_v62 = vmul.f32 %v779_v50, %v3032_v13  ;;  %v3110_v13 = vld [vmem:[#allocation3 + $0x1e0] sm:$0xff]  ;;  %3965 = vst [vmem:[#allocation32_spill] sm:$0xff] %v3213_v37  ;;  %v3223_v42 = vld [vmem:[#allocation3 + $0xa8] sm:$0xff] }
 0x235   :  { %v3220_v38 = vld [vmem:[#allocation3 + $0xa0] sm:$0xff]  ;;  %3968 = vst [vmem:[#allocation23_spill] sm:$0xff] %v3223_v42  ;;  %v3233_v44 = vld [vmem:[#allocation3 + $0x88] sm:$0xff] }
 0x236   :  { %v3107_v6 = vadd.f32 %v802_v56, %v801_v62  ;;  %3967 = vst [vmem:[#allocation19_spill] sm:$0xff] %v3220_v38  ;;  %v3230_v43 = vld [vmem:[#allocation3 + $0x80] sm:$0xff]  ;;  %v3243_v50 = vld [vmem:[#allocation3 + $0x68] sm:$0xff] }
 0x237   :  { %3970 = vst [vmem:[#allocation14_spill] sm:$0xff] %v3230_v43  ;;  %v3240_v48 = vld [vmem:[#allocation3 + $0x60] sm:$0xff]  ;;  %v3253_v56 = vld [vmem:[#allocation3 + $0x48] sm:$0xff] }
 0x238   :  { %2130 = vtanh.f32 %v3107_v6  ;;  %3971 = vst [vmem:[#allocation20_spill] sm:$0xff] %v3233_v44  ;;  %v3260_v62 = vld [vmem:[#allocation3 + $0x20] sm:$0xff] }
 0x239   :  { %3973 = vst [vmem:[#allocation35_spill] sm:$0xff] %v3240_v48 }
 0x23a   :  { %3974 = vst [vmem:[#allocation15_spill] sm:$0xff] %v3243_v50 }
 0x23b   :  { %3977 = vst [vmem:[#allocation36_spill] sm:$0xff] %v3253_v56 }
 0x23c   :  { %3979 = vst [vmem:[#allocation22_spill] sm:$0xff] %v3260_v62 }
 0x23e   :  { %v2131_v17 = vpop.eup %2130 }
 0x23f   :  { %v805_v22 = vmul.f32 %v2131_v17, %v799_v19 }
 0x241   :  { %826 = vmatmul.f32.vlgmr.msrb.gmra.mxu2 %v805_v22  ;;  %846 = vmatmul.f32.vlgmr.msra.gmra.mxu3 %v805_v22 }
 0x242   :  { %866 = vmatmul.f32.vlgmr.msrb.gmra.mxu0 %v805_v22  ;;  %886 = vmatmul.f32.vlgmr.msra.gmra.mxu1 %v805_v22 }
 0x243   :  { %1112 = vmatpush.msrb.mxu2 %v3110_v13  ;;  %1132 = vmatpush.msra.mxu3 %v3113_v21 }
 0x244   :  { %1152 = vmatpush.msrb.mxu0 %v3116_v18  ;;  %1172 = vmatpush.msra.mxu1 %v3119_v16 }
 0x245   :  { %1113 = vmatpush.msrb.mxu2 %v3122_v9  ;;  %1133 = vmatpush.msra.mxu3 %v3125_v60 }
 0x246   :  { %1153 = vmatpush.msrb.mxu0 %v3128_v20  ;;  %1173 = vmatpush.msra.mxu1 %v3131_v49 }
 0x247   :  { %1114 = vmatpush.msrb.mxu2 %v3134_v59  ;;  %1134 = vmatpush.msra.mxu3 %v3137_v41 }
 0x248   :  { %1154 = vmatpush.msrb.mxu0 %v3140_v24  ;;  %1174 = vmatpush.msra.mxu1 %v3143_v61 }
 0x249   :  { %1115 = vmatpush.msrb.mxu2 %v3146_v58  ;;  %1135 = vmatpush.msra.mxu3 %v3149_v1 }
 0x24a   :  { %1155 = vmatpush.msrb.mxu0 %v3152_v39  ;;  %1175 = vmatpush.msra.mxu1 %v3155_v7 }
 0x24b   :  { %1116 = vmatpush.msrb.mxu2 %v3158_v54  ;;  %1136 = vmatpush.msra.mxu3 %v3161_v45 }
 0x24c   :  { %1156 = vmatpush.msrb.mxu0 %v3164_v5  ;;  %1176 = vmatpush.msra.mxu1 %v3167_v53 }
 0x24d   :  { %1117 = vmatpush.msrb.mxu2 %v3170_v0  ;;  %1137 = vmatpush.msra.mxu3 %v3173_v23 }
 0x24e   :  { %1157 = vmatpush.msrb.mxu0 %v3176_v25  ;;  %1177 = vmatpush.msra.mxu1 %v2750_v26  ;;  %v3196_v26 = vld [vmem:[#allocation3 + $0x110] sm:$0xff] }
 0x24f   :  { %1118 = vmatpush.msrb.mxu2 %v3180_v52  ;;  %1138 = vmatpush.msra.mxu3 %v3183_v28 }
 0x250   :  { %1158 = vmatpush.msrb.mxu0 %v3186_v29  ;;  %1178 = vmatpush.msra.mxu1 %v2760_v47  ;;  %v3206_v47 = vld [vmem:[#allocation3 + $0xf0] sm:$0xff] }
 0x251   :  { %1119 = vmatpush.msrb.mxu2 %v3190_v30  ;;  %1139 = vmatpush.msra.mxu3 %v3193_v32 }
 0x252   :  { %1159 = vmatpush.msrb.mxu0 %v3196_v26  ;;  %1179 = vmatpush.msra.mxu1 %v3899_v57  ;;  %v3216_v57 = vld [vmem:[#allocation3 + $0xd0] sm:$0xff] }
 0x253   :  { %1120 = vmatpush.msrb.mxu2 %v3200_v33  ;;  %1140 = vmatpush.msra.mxu3 %v3203_v34  ;;  %3966 = vst [vmem:[#allocation13_spill] sm:$0xff] %v3216_v57 }
 0x254   :  { %1160 = vmatpush.msrb.mxu0 %v3206_v47  ;;  %1180 = vmatpush.msra.mxu1 %v3900_v12  ;;  %v3226_v12 = vld [vmem:[#allocation3 + $0xb0] sm:$0xff] }
 0x255   :  { %1121 = vmatpush.msrb.mxu2 %v3210_v36  ;;  %1141 = vmatpush.msra.mxu3 %v3213_v37  ;;  %3969 = vst [vmem:[#allocation34_spill] sm:$0xff] %v3226_v12 }
 0x256   :  { %1161 = vmatpush.msrb.mxu0 %v3216_v57  ;;  %1181 = vmatpush.msra.mxu1 %v3934_v27  ;;  %v3236_v27 = vld [vmem:[#allocation3 + $0x90] sm:$0xff] }
 0x257   :  { %1122 = vmatpush.msrb.mxu2 %v3220_v38  ;;  %1142 = vmatpush.msra.mxu3 %v3223_v42  ;;  %3972 = vst [vmem:[#allocation24_spill] sm:$0xff] %v3236_v27 }
 0x258   :  { %1162 = vmatpush.msrb.mxu0 %v3226_v12  ;;  %1182 = vmatpush.msra.mxu1 %v3938_v31  ;;  %v3246_v31 = vld [vmem:[#allocation3 + $0x70] sm:$0xff] }
 0x259   :  { %1123 = vmatpush.msrb.mxu2 %v3230_v43  ;;  %1143 = vmatpush.msra.mxu3 %v3233_v44  ;;  %3975 = vst [vmem:[#allocation21_spill] sm:$0xff] %v3246_v31 }
 0x25a   :  { %1163 = vmatpush.msrb.mxu0 %v3236_v27  ;;  %1183 = vmatpush.msra.mxu1 %v3942_v35  ;;  %v3256_v35 = vld [vmem:[#allocation3 + $0x50] sm:$0xff] }
 0x25b   :  { %1124 = vmatpush.msrb.mxu2 %v3240_v48  ;;  %1144 = vmatpush.msra.mxu3 %v3243_v50  ;;  %3978 = vst [vmem:[#allocation16_spill] sm:$0xff] %v3256_v35 }
 0x25c   :  { %1164 = vmatpush.msrb.mxu0 %v3246_v31  ;;  %1184 = vmatpush.msra.mxu1 %v3946_v40  ;;  %v3266_v40 = vld [vmem:[#allocation3 + $0x30] sm:$0xff] }
 0x25d   :  { %1125 = vmatpush.msrb.mxu2 %v3250_v51  ;;  %1145 = vmatpush.msra.mxu3 %v3253_v56  ;;  %3981 = vst [vmem:[#allocation37_spill] sm:$0xff] %v3266_v40 }
 0x25e   :  { %1165 = vmatpush.msrb.mxu0 %v3256_v35  ;;  %1185 = vmatpush.msra.mxu1 %v3950_v46 }
 0x25f   :  { %1126 = vmatpush.msrb.mxu2 %v3260_v62  ;;  %1146 = vmatpush.msra.mxu3 %v3263_v8 }
 0x260   :  { %1166 = vmatpush.msrb.mxu0 %v3266_v40  ;;  %1186 = vmatpush.msra.mxu1 %v3954_v55  ;;  %v3985_v55 = vld [vmem:[#allocation43_spill] sm:$0xff] }
 0x261   :  { %1127 = vmatpush.msrb.mxu2 %v3270_v10  ;;  %1147 = vmatpush.msra.mxu3 %v3273_v11 }
 0x262   :  { %1167 = vmatpush.msrb.mxu0 %v3957_v63  ;;  %1187 = vmatpush.msra.mxu1 %v3958_v3 }
 0x2bf   :  { %v887_v46 = vpop.f32.mrf.mxu1 }
 0x2c0   :  { %v893_v15 = vadd.f32 %v887_v46, %v3984_v14  ;;  %v867_v46 = vpop.f32.mrf.mxu0 }
 0x2c2   :  { %v2060_v17 = vmul.f32 -1.442695, %v893_v15 }
 0x2c4   :  { %2132 = vpow2.f32 %v2060_v17  ;;  %v827_v19 = vpop.f32.mrf.mxu2  ;;  %v847_v22 = vpop.f32.mrf.mxu3  ;;  %v3987_v17 = vld [vmem:[#allocation46_spill] sm:$0xff] }
 0x2c5   :  { %v890_v2 = vadd.f32 %v827_v19, %v3985_v55  ;;  %v891_v40 = vadd.f32 %v847_v22, %v3986_v4  ;;  %v892_v19 = vadd.f32 %v867_v46, %v3987_v17 }
 0x2c7   :  { %v2058_v10 = vmul.f32 -1.442695, %v890_v2  ;;  %v2059_v8 = vmul.f32 -1.442695, %v891_v40 }
 0x2c9   :  { %2134 = vpow2.f32 %v2058_v10 }
 0x2ca   :  { %v2133_v62 = vpop.eup %2132  ;;  %2136 = vpow2.f32 %v2059_v8 }
 0x2cb   :  { %v936_v11 = vadd.f32 1.0, %v2133_v62 }
 0x2cd   :  { %2138 = vrcp.f32 %v936_v11  ;;  %vm942_vm13 = vweird.f32 %v936_v11 }
 0x2cf   :  { %v2135_v63 = vpop.eup %2134 }
 0x2d0   :  { %v2137_v35 = vpop.eup %2136  ;;  %v897_v3 = vadd.f32 1.0, %v2135_v63 }
 0x2d1   :  { %v916_v56 = vadd.f32 1.0, %v2137_v35 }
 0x2d2   :  { %2140 = vrcp.f32 %v897_v3  ;;  %v909_v8 = vand.u32 2147483648, %v897_v3  ;;  %v907_v63 = vand.u32 2147483647, %v897_v3  ;;  %vm903_vm6 = vweird.f32 %v897_v3 }
 0x2d3   :  { %2142 = vrcp.f32 %v916_v56  ;;  %v2139_v14 = vpop.eup %2138  ;;  %v928_v51 = vand.u32 2147483648, %v916_v56  ;;  %v926_v31 = vand.u32 2147483647, %v916_v56  ;;  %vm922_vm8 = vweird.f32 %v916_v56 }
 0x2d4   :  { %v938_v40 = vmul.f32 %v2139_v14, %v936_v11  ;;  %2144 = vtanh.f32 %v892_v19  ;;  %v910_v46 = vor.u32 1.1754944e-38, %v909_v8  ;;  %vm908_vm9 = vcmp.eq.f32.partialorder %v907_v63, 8.507059e+37  ;;  %v3993_v63 = vld [vmem:[#allocation24_spill] sm:$0xff] }
 0x2d5   :  { %v929_v19 = vor.u32 1.1754944e-38, %v928_v51  ;;  %vm927_vm11 = vcmp.eq.f32.partialorder %v926_v31, 8.507059e+37  ;;  %vm943_vm12 = vweird.f32 %v2139_v14  ;;  %v948_v8 = vand.u32 2147483648, %v936_v11 }
 0x2d6   :  { %v939_v50 = vsub.f32 1.0, %v938_v40  ;;  %vm944_vm14 = vmor %vm942_vm13, %vm943_vm12 }
 0x2d8   :  { %v2141_v15 = vpop.eup %2140  ;;  %v940_v43 = vmul.f32 %v2139_v14, %v939_v50  ;;  %v3333_v50 = vld [vmem:[#allocation3 + $0xd8] sm:$0xff] }
 0x2d9   :  { %v2143_v55 = vpop.eup %2142  ;;  %v899_v4 = vmul.f32 %v2141_v15, %v897_v3  ;;  %vm904_vm4 = vweird.f32 %v2141_v15  ;;  %3988 = vst [vmem:[#allocation31_spill] sm:$0xff] %v3333_v50 }
 0x2da   :  { %v918_v2 = vmul.f32 %v2143_v55, %v916_v56  ;;  %vm923_vm5 = vweird.f32 %v2143_v55  ;;  %vm905_vm7 = vmor %vm903_vm6, %vm904_vm4  ;;  %v941_v3 = vadd.f32 %v2139_v14, %v940_v43  ;;  %v949_v56 = vor.u32 1.1754944e-38, %v948_v8  ;;  %v3321_v43 = vld [vmem:[#allocation3 + $0x118] sm:$0xff]  ;;  %v4003_v8 = vld [vmem:[#allocation22_spill] sm:$0xff] }
 0x2db   :  { %v900_v10 = vsub.f32 1.0, %v899_v4  ;;  %vm924_vm10 = vmor %vm922_vm8, %vm923_vm5  ;;  %v2145_v4 = vpop.eup %2144 }
 0x2dc   :  { %v919_v62 = vsub.f32 1.0, %v918_v2  ;;  %v945_v51 = vsel %vm944_vm14, %v2139_v14, %v941_v3  ;;  %v3339_v14 = vld [vmem:[#allocation3 + $0xb8] sm:$0xff] }
 0x2dd   :  { %v901_v22 = vmul.f32 %v2141_v15, %v900_v10  ;;  %3990 = vst [vmem:[#allocation38_spill] sm:$0xff] %v3339_v14  ;;  %v3357_v3 = vld [vmem:[#allocation3 + $0x58] sm:$0xff] }
 0x2de   :  { %v920_v35 = vmul.f32 %v2143_v55, %v919_v62  ;;  %4002 = vst [vmem:[#allocation33_spill] sm:$0xff] %v3357_v3 }
 0x2df   :  { %v902_v48 = vadd.f32 %v2141_v15, %v901_v22  ;;  %v3992_v22 = vld [vmem:[#allocation20_spill] sm:$0xff] }
 0x2e0   :  { %v921_v17 = vadd.f32 %v2143_v55, %v920_v35  ;;  %v3345_v35 = vld [vmem:[#allocation3 + $0x98] sm:$0xff] }
 0x2e1   :  { %v906_v27 = vsel %vm905_vm7, %v2141_v15, %v902_v48  ;;  %v946_v48 = vand.u32 2147483647, %v936_v11  ;;  %v3989_v11 = vld [vmem:[#allocation34_spill] sm:$0xff]  ;;  %3994 = vst [vmem:[#allocation18_spill] sm:$0xff] %v3345_v35 }
 0x2e2   :  { %v911_v2 = vsel %vm908_vm9, %v910_v46, %v906_v27  ;;  %v925_v10 = vsel %vm924_vm10, %v2143_v55, %v921_v17  ;;  %v3991_v55 = vld [vmem:[#allocation14_spill] sm:$0xff]  ;;  %v3995_v46 = vld [vmem:[#allocation35_spill] sm:$0xff] }
 0x2e3   :  { %v930_v44 = vsel %vm927_vm11, %v929_v19, %v925_v10  ;;  %v953_v62 = vmul.f32 %v2145_v4, %v911_v2  ;;  %vm947_vm15 = vcmp.eq.f32.partialorder %v946_v48, 8.507059e+37  ;;  %v3996_v17 = vld [vmem:[#allocation15_spill] sm:$0xff]  ;;  %v3997_v19 = vld [vmem:[#allocation21_spill] sm:$0xff]  ;;  %v3999_v2 = vld [vmem:[#allocation26_spill] sm:$0xff] }
 0x2e4   :  { %v952_v12 = vmul.f32 %v930_v44, %v3107_v6  ;;  %v950_v31 = vsel %vm947_vm15, %v949_v56, %v945_v51  ;;  %v3309_v6 = vld [vmem:[#allocation3 + $0x158] sm:$0xff]  ;;  %v4000_v10 = vld [vmem:[#allocation36_spill] sm:$0xff] }
 0x2e5   :  { %v3327_v44 = vld [vmem:[#allocation3 + $0xf8] sm:$0xff] }
 0x2e6   :  { %v3283_v40 = vadd.f32 %v953_v62, %v952_v12  ;;  %v3315_v12 = vld [vmem:[#allocation3 + $0x138] sm:$0xff]  ;;  %v4001_v62 = vld [vmem:[#allocation16_spill] sm:$0xff] }
 0x2e7   :  { %v3351_v4 = vld [vmem:[#allocation3 + $0x78] sm:$0xff] }
 0x2e8   :  { %2146 = vtanh.f32 %v3283_v40  ;;  %3998 = vst [vmem:[#allocation27_spill] sm:$0xff] %v3351_v4  ;;  %v4004_v48 = vld [vmem:[#allocation29_spill] sm:$0xff] }
 0x2e9   :  { %v4005_v51 = vld [vmem:[#allocation37_spill] sm:$0xff] }
 0x2ea   :  { %v3363_v56 = vld [vmem:[#allocation3 + $0x38] sm:$0xff] }
 0x2eb   :  { %4006 = vst [vmem:[#allocation39_spill] sm:$0xff] %v3363_v56 }
 0x2ee   :  { %v2147_v27 = vpop.eup %2146 }
 0x2ef   :  { %v956_v15 = vmul.f32 %v2147_v27, %v950_v31  ;;  %v4007_v27 = vld [vmem:[#allocation17_spill] sm:$0xff] }
 0x2f0   :  { %v4008_v31 = vld [vmem:[#allocation25_spill] sm:$0xff] }
 0x2f1   :  { %977 = vmatmul.f32.vlgmr.msra.gmra.mxu2 %v956_v15  ;;  %997 = vmatmul.f32.vlgmr.msrb.gmra.mxu3 %v956_v15 }
 0x2f2   :  { %1017 = vmatmul.f32.vlgmr.msra.gmra.mxu0 %v956_v15  ;;  %1037 = vmatmul.f32.vlgmr.msrb.gmra.mxu1 %v956_v15  ;;  %v3368_v15 = vld [vmem:[#allocation3 + $0x10] sm:$0xff] }
 0x2f3   :  { %1263 = vmatpush.msra.mxu2 %v3110_v13  ;;  %1283 = vmatpush.msrb.mxu3 %v3113_v21  ;;  %4009 = vst [vmem:[#allocation30_spill] sm:$0xff] %v3368_v15 }
 0x2f4   :  { %1303 = vmatpush.msra.mxu0 %v3116_v18  ;;  %1323 = vmatpush.msrb.mxu1 %v3119_v16 }
 0x2f5   :  { %1264 = vmatpush.msra.mxu2 %v3122_v9  ;;  %1284 = vmatpush.msrb.mxu3 %v3125_v60 }
 0x2f6   :  { %1304 = vmatpush.msra.mxu0 %v3128_v20  ;;  %1324 = vmatpush.msrb.mxu1 %v3131_v49 }
 0x2f7   :  { %1265 = vmatpush.msra.mxu2 %v3134_v59  ;;  %1285 = vmatpush.msrb.mxu3 %v3137_v41 }
 0x2f8   :  { %1305 = vmatpush.msra.mxu0 %v3140_v24  ;;  %1325 = vmatpush.msrb.mxu1 %v3143_v61 }
 0x2f9   :  { %1266 = vmatpush.msra.mxu2 %v3146_v58  ;;  %1286 = vmatpush.msrb.mxu3 %v3149_v1 }
 0x2fa   :  { %1306 = vmatpush.msra.mxu0 %v3152_v39  ;;  %1326 = vmatpush.msrb.mxu1 %v3155_v7 }
 0x2fb   :  { %1267 = vmatpush.msra.mxu2 %v3158_v54  ;;  %1287 = vmatpush.msrb.mxu3 %v3161_v45 }
 0x2fc   :  { %1307 = vmatpush.msra.mxu0 %v3164_v5  ;;  %1327 = vmatpush.msrb.mxu1 %v3167_v53 }
 0x2fd   :  { %1268 = vmatpush.msra.mxu2 %v3170_v0  ;;  %1288 = vmatpush.msrb.mxu3 %v3173_v23 }
 0x2fe   :  { %1308 = vmatpush.msra.mxu0 %v3176_v25  ;;  %1328 = vmatpush.msrb.mxu1 %v3309_v6 }
 0x2ff   :  { %1269 = vmatpush.msra.mxu2 %v3180_v52  ;;  %1289 = vmatpush.msrb.mxu3 %v3183_v28 }
 0x300   :  { %1309 = vmatpush.msra.mxu0 %v3186_v29  ;;  %1329 = vmatpush.msrb.mxu1 %v3315_v12 }
 0x301   :  { %1270 = vmatpush.msra.mxu2 %v3190_v30  ;;  %1290 = vmatpush.msrb.mxu3 %v3193_v32 }
 0x302   :  { %1310 = vmatpush.msra.mxu0 %v3196_v26  ;;  %1330 = vmatpush.msrb.mxu1 %v3321_v43 }
 0x303   :  { %1271 = vmatpush.msra.mxu2 %v3200_v33  ;;  %1291 = vmatpush.msrb.mxu3 %v3203_v34 }
 0x304   :  { %1311 = vmatpush.msra.mxu0 %v3206_v47  ;;  %1331 = vmatpush.msrb.mxu1 %v3327_v44 }
 0x305   :  { %1272 = vmatpush.msra.mxu2 %v3210_v36  ;;  %1292 = vmatpush.msrb.mxu3 %v3213_v37 }
 0x306   :  { %1312 = vmatpush.msra.mxu0 %v3216_v57  ;;  %1332 = vmatpush.msrb.mxu1 %v3333_v50 }
 0x307   :  { %1273 = vmatpush.msra.mxu2 %v3220_v38  ;;  %1293 = vmatpush.msrb.mxu3 %v3223_v42 }
 0x308   :  { %1313 = vmatpush.msra.mxu0 %v3989_v11  ;;  %1333 = vmatpush.msrb.mxu1 %v3339_v14 }
 0x309   :  { %1274 = vmatpush.msra.mxu2 %v3991_v55  ;;  %1294 = vmatpush.msrb.mxu3 %v3992_v22 }
 0x30a   :  { %1314 = vmatpush.msra.mxu0 %v3993_v63  ;;  %1334 = vmatpush.msrb.mxu1 %v3345_v35 }
 0x30b   :  { %1275 = vmatpush.msra.mxu2 %v3995_v46  ;;  %1295 = vmatpush.msrb.mxu3 %v3996_v17 }
 0x30c   :  { %1315 = vmatpush.msra.mxu0 %v3997_v19  ;;  %1335 = vmatpush.msrb.mxu1 %v3351_v4 }
 0x30d   :  { %1276 = vmatpush.msra.mxu2 %v3999_v2  ;;  %1296 = vmatpush.msrb.mxu3 %v4000_v10 }
 0x30e   :  { %1316 = vmatpush.msra.mxu0 %v4001_v62  ;;  %1336 = vmatpush.msrb.mxu1 %v3357_v3  ;;  %v3371_v62 = vld [vmem:[#allocation3 + $0x18] sm:$0xff] }
 0x30f   :  { %1277 = vmatpush.msra.mxu2 %v4003_v8  ;;  %1297 = vmatpush.msrb.mxu3 %v4004_v48  ;;  %4010 = vst [vmem:[#allocation28_spill] sm:$0xff] %v3371_v62  ;;  %v4011_v48 = vld [vmem:[#allocation48_spill] sm:$0xff] }
 0x310   :  { %1317 = vmatpush.msra.mxu0 %v4005_v51  ;;  %1337 = vmatpush.msrb.mxu1 %v3363_v56  ;;  %v4012_v56 = vld [vmem:[#allocation47_spill] sm:$0xff] }
 0x311   :  { %1278 = vmatpush.msra.mxu2 %v4007_v27  ;;  %1298 = vmatpush.msrb.mxu3 %v4008_v31  ;;  %v4013_v27 = vld [vmem:[#allocation49_spill] sm:$0xff] }
 0x312   :  { %1318 = vmatpush.msra.mxu0 %v3368_v15  ;;  %1338 = vmatpush.msrb.mxu1 %v3371_v62 }
 0x36f   :  { %v1038_v8 = vpop.f32.mrf.mxu1 }
 0x370   :  { %v1044_v3 = vadd.f32 %v1038_v8, %v4011_v48 }
 0x372   :  { %v2063_v51 = vmul.f32 -1.442695, %v1044_v3  ;;  %v1018_v3 = vpop.f32.mrf.mxu0 }
 0x374   :  { %2148 = vpow2.f32 %v2063_v51  ;;  %v978_v10 = vpop.f32.mrf.mxu2  ;;  %v998_v2 = vpop.f32.mrf.mxu3  ;;  %v4014_v51 = vld [vmem:[#allocation50_spill] sm:$0xff] }
 0x375   :  { %v1041_v4 = vadd.f32 %v978_v10, %v4012_v56  ;;  %v1042_v19 = vadd.f32 %v998_v2, %v4013_v27  ;;  %v1043_v10 = vadd.f32 %v1018_v3, %v4014_v51 }
 0x377   :  { %v2061_v31 = vmul.f32 -1.442695, %v1041_v4  ;;  %v2062_v17 = vmul.f32 -1.442695, %v1042_v19 }
 0x379   :  { %2150 = vpow2.f32 %v2061_v31 }
 0x37a   :  { %v2149_v46 = vpop.eup %2148  ;;  %2152 = vpow2.f32 %v2062_v17 }
 0x37b   :  { %v1087_v15 = vadd.f32 1.0, %v2149_v46 }
 0x37d   :  { %2154 = vrcp.f32 %v1087_v15  ;;  %vm1093_vm10 = vweird.f32 %v1087_v15 }
 0x37f   :  { %v2151_v35 = vpop.eup %2150 }
 0x380   :  { %v2153_v63 = vpop.eup %2152  ;;  %v1048_v62 = vadd.f32 1.0, %v2151_v35 }
 0x381   :  { %v1067_v22 = vadd.f32 1.0, %v2153_v63 }
 0x382   :  { %2156 = vrcp.f32 %v1048_v62  ;;  %v1060_v17 = vand.u32 2147483648, %v1048_v62  ;;  %v1058_v35 = vand.u32 2147483647, %v1048_v62  ;;  %vm1054_vm3 = vweird.f32 %v1048_v62 }
 0x383   :  { %2158 = vrcp.f32 %v1067_v22  ;;  %v2155_v8 = vpop.eup %2154  ;;  %v1079_v55 = vand.u32 2147483648, %v1067_v22  ;;  %v1077_v14 = vand.u32 2147483647, %v1067_v22  ;;  %vm1073_vm5 = vweird.f32 %v1067_v22 }
 0x384   :  { %v1089_v19 = vmul.f32 %v2155_v8, %v1087_v15  ;;  %2160 = vtanh.f32 %v1043_v10  ;;  %v1061_v3 = vor.u32 1.1754944e-38, %v1060_v17  ;;  %vm1059_vm6 = vcmp.eq.f32.partialorder %v1058_v35, 8.507059e+37  ;;  %v4024_v35 = vld [vmem:[#allocation24_spill] sm:$0xff] }
 0x385   :  { %v1080_v10 = vor.u32 1.1754944e-38, %v1079_v55  ;;  %vm1078_vm8 = vcmp.eq.f32.partialorder %v1077_v14, 8.507059e+37  ;;  %vm1094_vm9 = vweird.f32 %v2155_v8  ;;  %v1099_v17 = vand.u32 2147483648, %v1087_v15 }
 0x386   :  { %v1090_v11 = vsub.f32 1.0, %v1089_v19  ;;  %vm1095_vm11 = vmor %vm1093_vm10, %vm1094_vm9 }
 0x388   :  { %v2157_v48 = vpop.eup %2156  ;;  %v1091_v57 = vmul.f32 %v2155_v8, %v1090_v11  ;;  %v4019_v11 = vld [vmem:[#allocation23_spill] sm:$0xff] }
 0x389   :  { %v2159_v56 = vpop.eup %2158  ;;  %v1050_v2 = vmul.f32 %v2157_v48, %v1048_v62  ;;  %vm1055_vm0 = vweird.f32 %v2157_v48 }
 0x38a   :  { %v1069_v4 = vmul.f32 %v2159_v56, %v1067_v22  ;;  %vm1074_vm2 = vweird.f32 %v2159_v56  ;;  %vm1056_vm4 = vmor %vm1054_vm3, %vm1055_vm0  ;;  %v1092_v62 = vadd.f32 %v2155_v8, %v1091_v57  ;;  %v1100_v22 = vor.u32 1.1754944e-38, %v1099_v17  ;;  %v4016_v57 = vld [vmem:[#allocation13_spill] sm:$0xff]  ;;  %v4034_v17 = vld [vmem:[#allocation22_spill] sm:$0xff] }
 0x38b   :  { %v1051_v27 = vsub.f32 1.0, %v1050_v2  ;;  %vm1075_vm7 = vmor %vm1073_vm5, %vm1074_vm2  ;;  %v2161_v2 = vpop.eup %2160 }
 0x38c   :  { %v1070_v46 = vsub.f32 1.0, %v1069_v4  ;;  %v1096_v55 = vsel %vm1095_vm11, %v2155_v8, %v1092_v62  ;;  %v4021_v8 = vld [vmem:[#allocation38_spill] sm:$0xff]  ;;  %v4033_v62 = vld [vmem:[#allocation33_spill] sm:$0xff] }
 0x38d   :  { %v1052_v31 = vmul.f32 %v2157_v48, %v1051_v27 }
 0x38e   :  { %v1071_v63 = vmul.f32 %v2159_v56, %v1070_v46 }
 0x38f   :  { %v1053_v42 = vadd.f32 %v2157_v48, %v1052_v31  ;;  %v4023_v31 = vld [vmem:[#allocation20_spill] sm:$0xff] }
 0x390   :  { %v1072_v51 = vadd.f32 %v2159_v56, %v1071_v63  ;;  %v4025_v63 = vld [vmem:[#allocation18_spill] sm:$0xff] }
 0x391   :  { %v1057_v38 = vsel %vm1056_vm4, %v2157_v48, %v1053_v42  ;;  %v1097_v42 = vand.u32 2147483647, %v1087_v15  ;;  %v4020_v15 = vld [vmem:[#allocation34_spill] sm:$0xff] }
 0x392   :  { %v1062_v4 = vsel %vm1059_vm6, %v1061_v3, %v1057_v38  ;;  %v1076_v27 = vsel %vm1075_vm7, %v2159_v56, %v1072_v51  ;;  %v4022_v56 = vld [vmem:[#allocation14_spill] sm:$0xff]  ;;  %v4026_v3 = vld [vmem:[#allocation35_spill] sm:$0xff] }
 0x393   :  { %v1081_v50 = vsel %vm1078_vm8, %v1080_v10, %v1076_v27  ;;  %v1104_v46 = vmul.f32 %v2161_v2, %v1062_v4  ;;  %vm1098_vm12 = vcmp.eq.f32.partialorder %v1097_v42, 8.507059e+37  ;;  %v4027_v51 = vld [vmem:[#allocation15_spill] sm:$0xff]  ;;  %v4028_v10 = vld [vmem:[#allocation21_spill] sm:$0xff]  ;;  %v4030_v4 = vld [vmem:[#allocation26_spill] sm:$0xff] }
 0x394   :  { %v1103_v37 = vmul.f32 %v1081_v50, %v3283_v40  ;;  %v1101_v14 = vsel %vm1098_vm12, %v1100_v22, %v1096_v55  ;;  %v4017_v40 = vld [vmem:[#allocation31_spill] sm:$0xff]  ;;  %v4031_v27 = vld [vmem:[#allocation36_spill] sm:$0xff]  ;;  %v4035_v42 = vld [vmem:[#allocation29_spill] sm:$0xff] }
 0x395   :  { %v4018_v50 = vld [vmem:[#allocation19_spill] sm:$0xff]  ;;  %v4036_v55 = vld [vmem:[#allocation37_spill] sm:$0xff] }
 0x396   :  { %v3379_v19 = vadd.f32 %v1104_v46, %v1103_v37  ;;  %v4015_v37 = vld [vmem:[#allocation32_spill] sm:$0xff]  ;;  %v4029_v2 = vld [vmem:[#allocation27_spill] sm:$0xff] }
 0x397   :  { %v4032_v46 = vld [vmem:[#allocation16_spill] sm:$0xff]  ;;  %v4037_v22 = vld [vmem:[#allocation39_spill] sm:$0xff] }
 0x398   :  { %2162 = vtanh.f32 %v3379_v19 }
 0x39e   :  { %v2163_v38 = vpop.eup %2162 }
 0x39f   :  { %v1107_v48 = vmul.f32 %v2163_v38, %v1101_v14  ;;  %v4038_v38 = vld [vmem:[#allocation17_spill] sm:$0xff] }
 0x3a0   :  { %v4039_v14 = vld [vmem:[#allocation25_spill] sm:$0xff] }
 0x3a1   :  { %1128 = vmatmul.f32.vlgmr.msrb.gmra.mxu2 %v1107_v48  ;;  %1148 = vmatmul.f32.vlgmr.msra.gmra.mxu3 %v1107_v48 }
 0x3a2   :  { %1168 = vmatmul.f32.vlgmr.msrb.gmra.mxu0 %v1107_v48  ;;  %1188 = vmatmul.f32.vlgmr.msra.gmra.mxu1 %v1107_v48  ;;  %v4040_v48 = vld [vmem:[#allocation30_spill] sm:$0xff] }
 0x3a3   :  { %1414 = vmatpush.msrb.mxu2 %v3110_v13  ;;  %1434 = vmatpush.msra.mxu3 %v3113_v21 }
 0x3a4   :  { %1454 = vmatpush.msrb.mxu0 %v3116_v18  ;;  %1474 = vmatpush.msra.mxu1 %v3119_v16 }
 0x3a5   :  { %1415 = vmatpush.msrb.mxu2 %v3122_v9  ;;  %1435 = vmatpush.msra.mxu3 %v3125_v60 }
 0x3a6   :  { %1455 = vmatpush.msrb.mxu0 %v3128_v20  ;;  %1475 = vmatpush.msra.mxu1 %v3131_v49 }
 0x3a7   :  { %1416 = vmatpush.msrb.mxu2 %v3134_v59  ;;  %1436 = vmatpush.msra.mxu3 %v3137_v41 }
 0x3a8   :  { %1456 = vmatpush.msrb.mxu0 %v3140_v24  ;;  %1476 = vmatpush.msra.mxu1 %v3143_v61 }
 0x3a9   :  { %1417 = vmatpush.msrb.mxu2 %v3146_v58  ;;  %1437 = vmatpush.msra.mxu3 %v3149_v1 }
 0x3aa   :  { %1457 = vmatpush.msrb.mxu0 %v3152_v39  ;;  %1477 = vmatpush.msra.mxu1 %v3155_v7 }
 0x3ab   :  { %1418 = vmatpush.msrb.mxu2 %v3158_v54  ;;  %1438 = vmatpush.msra.mxu3 %v3161_v45 }
 0x3ac   :  { %1458 = vmatpush.msrb.mxu0 %v3164_v5  ;;  %1478 = vmatpush.msra.mxu1 %v3167_v53 }
 0x3ad   :  { %1419 = vmatpush.msrb.mxu2 %v3170_v0  ;;  %1439 = vmatpush.msra.mxu3 %v3173_v23 }
 0x3ae   :  { %1459 = vmatpush.msrb.mxu0 %v3176_v25  ;;  %1479 = vmatpush.msra.mxu1 %v3309_v6 }
 0x3af   :  { %1420 = vmatpush.msrb.mxu2 %v3180_v52  ;;  %1440 = vmatpush.msra.mxu3 %v3183_v28 }
 0x3b0   :  { %1460 = vmatpush.msrb.mxu0 %v3186_v29  ;;  %1480 = vmatpush.msra.mxu1 %v3315_v12 }
 0x3b1   :  { %1421 = vmatpush.msrb.mxu2 %v3190_v30  ;;  %1441 = vmatpush.msra.mxu3 %v3193_v32 }
 0x3b2   :  { %1461 = vmatpush.msrb.mxu0 %v3196_v26  ;;  %1481 = vmatpush.msra.mxu1 %v3321_v43 }
 0x3b3   :  { %1422 = vmatpush.msrb.mxu2 %v3200_v33  ;;  %1442 = vmatpush.msra.mxu3 %v3203_v34 }
 0x3b4   :  { %1462 = vmatpush.msrb.mxu0 %v3206_v47  ;;  %1482 = vmatpush.msra.mxu1 %v3327_v44 }
 0x3b5   :  { %1423 = vmatpush.msrb.mxu2 %v3210_v36  ;;  %1443 = vmatpush.msra.mxu3 %v4015_v37 }
 0x3b6   :  { %1463 = vmatpush.msrb.mxu0 %v4016_v57  ;;  %1483 = vmatpush.msra.mxu1 %v4017_v40 }
 0x3b7   :  { %1424 = vmatpush.msrb.mxu2 %v4018_v50  ;;  %1444 = vmatpush.msra.mxu3 %v4019_v11 }
 0x3b8   :  { %1464 = vmatpush.msrb.mxu0 %v4020_v15  ;;  %1484 = vmatpush.msra.mxu1 %v4021_v8 }
 0x3b9   :  { %1425 = vmatpush.msrb.mxu2 %v4022_v56  ;;  %1445 = vmatpush.msra.mxu3 %v4023_v31 }
 0x3ba   :  { %1465 = vmatpush.msrb.mxu0 %v4024_v35  ;;  %1485 = vmatpush.msra.mxu1 %v4025_v63 }
 0x3bb   :  { %1426 = vmatpush.msrb.mxu2 %v4026_v3  ;;  %1446 = vmatpush.msra.mxu3 %v4027_v51 }
 0x3bc   :  { %1466 = vmatpush.msrb.mxu0 %v4028_v10  ;;  %1486 = vmatpush.msra.mxu1 %v4029_v2 }
 0x3bd   :  { %1427 = vmatpush.msrb.mxu2 %v4030_v4  ;;  %1447 = vmatpush.msra.mxu3 %v4031_v27  ;;  %v4041_v4 = vld [vmem:[#allocation28_spill] sm:$0xff] }
 0x3be   :  { %1467 = vmatpush.msrb.mxu0 %v4032_v46  ;;  %1487 = vmatpush.msra.mxu1 %v4033_v62  ;;  %v4042_v46 = vld [vmem:[#allocation52_spill] sm:$0xff] }
 0x3bf   :  { %1428 = vmatpush.msrb.mxu2 %v4034_v17  ;;  %1448 = vmatpush.msra.mxu3 %v4035_v42  ;;  %v4043_v42 = vld [vmem:[#allocation51_spill] sm:$0xff] }
 0x3c0   :  { %1468 = vmatpush.msrb.mxu0 %v4036_v55  ;;  %1488 = vmatpush.msra.mxu1 %v4037_v22  ;;  %v4044_v55 = vld [vmem:[#allocation53_spill] sm:$0xff] }
 0x3c1   :  { %1429 = vmatpush.msrb.mxu2 %v4038_v38  ;;  %1449 = vmatpush.msra.mxu3 %v4039_v14 }
 0x3c2   :  { %1469 = vmatpush.msrb.mxu0 %v4040_v48  ;;  %1489 = vmatpush.msra.mxu1 %v4041_v4 }
 0x41f   :  { %v1189_v27 = vpop.f32.mrf.mxu1 }
 0x420   :  { %v1195_v2 = vadd.f32 %v1189_v27, %v4042_v46 }
 0x422   :  { %v2066_v62 = vmul.f32 -1.442695, %v1195_v2  ;;  %v1169_v2 = vpop.f32.mrf.mxu0 }
 0x424   :  { %2164 = vpow2.f32 %v2066_v62  ;;  %v1129_v17 = vpop.f32.mrf.mxu2  ;;  %v1149_v10 = vpop.f32.mrf.mxu3  ;;  %v4045_v62 = vld [vmem:[#allocation54_spill] sm:$0xff] }
 0x425   :  { %v1192_v51 = vadd.f32 %v1129_v17, %v4043_v42  ;;  %v1193_v3 = vadd.f32 %v1149_v10, %v4044_v55  ;;  %v1194_v17 = vadd.f32 %v1169_v2, %v4045_v62 }
 0x427   :  { %v2064_v22 = vmul.f32 -1.442695, %v1192_v51  ;;  %v2065_v63 = vmul.f32 -1.442695, %v1193_v3 }
 0x429   :  { %2166 = vpow2.f32 %v2064_v22 }
 0x42a   :  { %v2165_v38 = vpop.eup %2164  ;;  %2168 = vpow2.f32 %v2065_v63 }
 0x42b   :  { %v1238_v14 = vadd.f32 1.0, %v2165_v38 }
 0x42d   :  { %2170 = vrcp.f32 %v1238_v14  ;;  %vm1244_vm7 = vweird.f32 %v1238_v14 }
 0x42f   :  { %v2167_v48 = vpop.eup %2166 }
 0x430   :  { %v2169_v35 = vpop.eup %2168  ;;  %v1199_v4 = vadd.f32 1.0, %v2167_v48 }
 0x431   :  { %v1218_v31 = vadd.f32 1.0, %v2169_v35 }
 0x432   :  { %2172 = vrcp.f32 %v1199_v4  ;;  %v1211_v63 = vand.u32 2147483648, %v1199_v4  ;;  %v1209_v48 = vand.u32 2147483647, %v1199_v4  ;;  %vm1205_vm15 = vweird.f32 %v1199_v4 }
 0x433   :  { %2174 = vrcp.f32 %v1218_v31  ;;  %v2171_v27 = vpop.eup %2170  ;;  %v1230_v56 = vand.u32 2147483648, %v1218_v31  ;;  %v1228_v8 = vand.u32 2147483647, %v1218_v31  ;;  %vm1224_vm2 = vweird.f32 %v1218_v31 }
 0x434   :  { %v1240_v3 = vmul.f32 %v2171_v27, %v1238_v14  ;;  %2176 = vtanh.f32 %v1194_v17  ;;  %v1212_v2 = vor.u32 1.1754944e-38, %v1211_v63  ;;  %vm1210_vm3 = vcmp.eq.f32.partialorder %v1209_v48, 8.507059e+37 }
 0x435   :  { %v1231_v17 = vor.u32 1.1754944e-38, %v1230_v56  ;;  %vm1229_vm5 = vcmp.eq.f32.partialorder %v1228_v8, 8.507059e+37  ;;  %vm1245_vm6 = vweird.f32 %v2171_v27  ;;  %v1250_v63 = vand.u32 2147483648, %v1238_v14 }
 0x436   :  { %v1241_v15 = vsub.f32 1.0, %v1240_v3  ;;  %vm1246_vm8 = vmor %vm1244_vm7, %vm1245_vm6 }
 0x438   :  { %v2173_v46 = vpop.eup %2172  ;;  %v1242_v57 = vmul.f32 %v2171_v27, %v1241_v15 }
 0x439   :  { %v2175_v42 = vpop.eup %2174  ;;  %v1201_v10 = vmul.f32 %v2173_v46, %v1199_v4  ;;  %vm1206_vm13 = vweird.f32 %v2173_v46 }
 0x43a   :  { %v1220_v51 = vmul.f32 %v2175_v42, %v1218_v31  ;;  %vm1225_vm14 = vweird.f32 %v2175_v42  ;;  %vm1207_vm0 = vmor %vm1205_vm15, %vm1206_vm13  ;;  %v1243_v4 = vadd.f32 %v2171_v27, %v1242_v57  ;;  %v1251_v31 = vor.u32 1.1754944e-38, %v1250_v63 }
 0x43b   :  { %v1202_v55 = vsub.f32 1.0, %v1201_v10  ;;  %vm1226_vm4 = vmor %vm1224_vm2, %vm1225_vm14  ;;  %v2177_v10 = vpop.eup %2176 }
 0x43c   :  { %v1221_v22 = vsub.f32 1.0, %v1220_v51  ;;  %v1247_v56 = vsel %vm1246_vm8, %v2171_v27, %v1243_v4 }
 0x43d   :  { %v1203_v38 = vmul.f32 %v2173_v46, %v1202_v55 }
 0x43e   :  { %v1222_v35 = vmul.f32 %v2175_v42, %v1221_v22 }
 0x43f   :  { %v1204_v11 = vadd.f32 %v2173_v46, %v1203_v38 }
 0x440   :  { %v1223_v62 = vadd.f32 %v2175_v42, %v1222_v35 }
 0x441   :  { %v1208_v50 = vsel %vm1207_vm0, %v2173_v46, %v1204_v11  ;;  %v1248_v11 = vand.u32 2147483647, %v1238_v14 }
 0x442   :  { %v1213_v51 = vsel %vm1210_vm3, %v1212_v2, %v1208_v50  ;;  %v1227_v55 = vsel %vm1226_vm4, %v2175_v42, %v1223_v62  ;;  %v4076_v2 = vld [vmem:[#allocation58_spill] sm:$0xff] }
 0x443   :  { %v1232_v40 = vsel %vm1229_vm5, %v1231_v17, %v1227_v55  ;;  %v1255_v22 = vmul.f32 %v2177_v10, %v1213_v51  ;;  %vm1249_vm9 = vcmp.eq.f32.partialorder %v1248_v11, 8.507059e+37 }
 0x444   :  { %v1254_v37 = vmul.f32 %v1232_v40, %v3379_v19  ;;  %v1252_v8 = vsel %vm1249_vm9, %v1251_v31, %v1247_v56 }
 0x446   :  { %v3451_v3 = vadd.f32 %v1255_v22, %v1254_v37 }
 0x448   :  { %2178 = vtanh.f32 %v3451_v3 }
 0x44e   :  { %v2179_v50 = vpop.eup %2178 }
 0x44f   :  { %v1258_v46 = vmul.f32 %v2179_v50, %v1252_v8 }
 0x451   :  { %1279 = vmatmul.f32.vlgmr.msra.gmra.mxu2 %v1258_v46  ;;  %1299 = vmatmul.f32.vlgmr.msrb.gmra.mxu3 %v1258_v46 }
 0x452   :  { %1319 = vmatmul.f32.vlgmr.msra.gmra.mxu0 %v1258_v46  ;;  %1339 = vmatmul.f32.vlgmr.msrb.gmra.mxu1 %v1258_v46 }
 0x453   :  { %1565 = vmatpush.msra.mxu2 %v3110_v13  ;;  %1585 = vmatpush.msrb.mxu3 %v3113_v21  ;;  %v4046_v13 = vld [vmem:[#allocation32_spill] sm:$0xff]  ;;  %v4047_v21 = vld [vmem:[#allocation13_spill] sm:$0xff] }
 0x454   :  { %1605 = vmatpush.msra.mxu0 %v3116_v18  ;;  %1625 = vmatpush.msrb.mxu1 %v3119_v16  ;;  %v4048_v18 = vld [vmem:[#allocation31_spill] sm:$0xff] }
 0x455   :  { %1566 = vmatpush.msra.mxu2 %v3122_v9  ;;  %1586 = vmatpush.msrb.mxu3 %v3125_v60  ;;  %v4049_v16 = vld [vmem:[#allocation19_spill] sm:$0xff]  ;;  %v4051_v60 = vld [vmem:[#allocation34_spill] sm:$0xff] }
 0x456   :  { %1606 = vmatpush.msra.mxu0 %v3128_v20  ;;  %1626 = vmatpush.msrb.mxu1 %v3131_v49  ;;  %v4050_v9 = vld [vmem:[#allocation23_spill] sm:$0xff]  ;;  %v4052_v20 = vld [vmem:[#allocation38_spill] sm:$0xff] }
 0x457   :  { %1567 = vmatpush.msra.mxu2 %v3134_v59  ;;  %1587 = vmatpush.msrb.mxu3 %v3137_v41  ;;  %v4053_v49 = vld [vmem:[#allocation14_spill] sm:$0xff]  ;;  %v4054_v59 = vld [vmem:[#allocation20_spill] sm:$0xff] }
 0x458   :  { %1607 = vmatpush.msra.mxu0 %v3140_v24  ;;  %1627 = vmatpush.msrb.mxu1 %v3143_v61  ;;  %v4055_v41 = vld [vmem:[#allocation24_spill] sm:$0xff]  ;;  %v4056_v24 = vld [vmem:[#allocation18_spill] sm:$0xff]  ;;  %v4057_v61 = vld [vmem:[#allocation35_spill] sm:$0xff] }
 0x459   :  { %1568 = vmatpush.msra.mxu2 %v3146_v58  ;;  %1588 = vmatpush.msrb.mxu3 %v3149_v1  ;;  %v4058_v58 = vld [vmem:[#allocation15_spill] sm:$0xff]  ;;  %v4059_v1 = vld [vmem:[#allocation21_spill] sm:$0xff] }
 0x45a   :  { %1608 = vmatpush.msra.mxu0 %v3152_v39  ;;  %1628 = vmatpush.msrb.mxu1 %v3155_v7  ;;  %v4060_v39 = vld [vmem:[#allocation27_spill] sm:$0xff]  ;;  %v4061_v7 = vld [vmem:[#allocation26_spill] sm:$0xff] }
 0x45b   :  { %1569 = vmatpush.msra.mxu2 %v3158_v54  ;;  %1589 = vmatpush.msrb.mxu3 %v3161_v45  ;;  %v4062_v54 = vld [vmem:[#allocation36_spill] sm:$0xff] }
 0x45c   :  { %1609 = vmatpush.msra.mxu0 %v3164_v5  ;;  %1629 = vmatpush.msrb.mxu1 %v3167_v53  ;;  %v4063_v45 = vld [vmem:[#allocation16_spill] sm:$0xff]  ;;  %v4064_v5 = vld [vmem:[#allocation33_spill] sm:$0xff]  ;;  %v4065_v53 = vld [vmem:[#allocation22_spill] sm:$0xff] }
 0x45d   :  { %1570 = vmatpush.msra.mxu2 %v3170_v0  ;;  %1590 = vmatpush.msrb.mxu3 %v3173_v23  ;;  %v4066_v0 = vld [vmem:[#allocation29_spill] sm:$0xff] }
 0x45e   :  { %1610 = vmatpush.msra.mxu0 %v3176_v25  ;;  %1630 = vmatpush.msrb.mxu1 %v3309_v6  ;;  %v4067_v23 = vld [vmem:[#allocation37_spill] sm:$0xff]  ;;  %v4068_v25 = vld [vmem:[#allocation39_spill] sm:$0xff] }
 0x45f   :  { %1571 = vmatpush.msra.mxu2 %v3180_v52  ;;  %1591 = vmatpush.msrb.mxu3 %v3183_v28  ;;  %v4069_v52 = vld [vmem:[#allocation17_spill] sm:$0xff]  ;;  %v4074_v6 = vld [vmem:[#allocation55_spill] sm:$0xff] }
 0x460   :  { %1611 = vmatpush.msra.mxu0 %v3186_v29  ;;  %1631 = vmatpush.msrb.mxu1 %v3315_v12  ;;  %v4070_v28 = vld [vmem:[#allocation25_spill] sm:$0xff]  ;;  %v4071_v29 = vld [vmem:[#allocation30_spill] sm:$0xff] }
 0x461   :  { %1572 = vmatpush.msra.mxu2 %v3190_v30  ;;  %1592 = vmatpush.msrb.mxu3 %v3193_v32  ;;  %v4072_v30 = vld [vmem:[#allocation28_spill] sm:$0xff] }
 0x462   :  { %1612 = vmatpush.msra.mxu0 %v3196_v26  ;;  %1632 = vmatpush.msrb.mxu1 %v3321_v43  ;;  %v4073_v26 = vld [vmem:[#allocation56_spill] sm:$0xff]  ;;  %v4075_v43 = vld [vmem:[#allocation57_spill] sm:$0xff] }
 0x463   :  { %1573 = vmatpush.msra.mxu2 %v3200_v33  ;;  %1593 = vmatpush.msrb.mxu3 %v3203_v34 }
 0x464   :  { %1613 = vmatpush.msra.mxu0 %v3206_v47  ;;  %1633 = vmatpush.msrb.mxu1 %v3327_v44 }
 0x465   :  { %1574 = vmatpush.msra.mxu2 %v3210_v36  ;;  %1594 = vmatpush.msrb.mxu3 %v4046_v13 }
 0x466   :  { %1614 = vmatpush.msra.mxu0 %v4047_v21  ;;  %1634 = vmatpush.msrb.mxu1 %v4048_v18 }
 0x467   :  { %1575 = vmatpush.msra.mxu2 %v4049_v16  ;;  %1595 = vmatpush.msrb.mxu3 %v4050_v9 }
 0x468   :  { %1615 = vmatpush.msra.mxu0 %v4051_v60  ;;  %1635 = vmatpush.msrb.mxu1 %v4052_v20 }
 0x469   :  { %1576 = vmatpush.msra.mxu2 %v4053_v49  ;;  %1596 = vmatpush.msrb.mxu3 %v4054_v59 }
 0x46a   :  { %1616 = vmatpush.msra.mxu0 %v4055_v41  ;;  %1636 = vmatpush.msrb.mxu1 %v4056_v24 }
 0x46b   :  { %1577 = vmatpush.msra.mxu2 %v4057_v61  ;;  %1597 = vmatpush.msrb.mxu3 %v4058_v58 }
 0x46c   :  { %1617 = vmatpush.msra.mxu0 %v4059_v1  ;;  %1637 = vmatpush.msrb.mxu1 %v4060_v39 }
 0x46d   :  { %1578 = vmatpush.msra.mxu2 %v4061_v7  ;;  %1598 = vmatpush.msrb.mxu3 %v4062_v54 }
 0x46e   :  { %1618 = vmatpush.msra.mxu0 %v4063_v45  ;;  %1638 = vmatpush.msrb.mxu1 %v4064_v5 }
 0x46f   :  { %1579 = vmatpush.msra.mxu2 %v4065_v53  ;;  %1599 = vmatpush.msrb.mxu3 %v4066_v0 }
 0x470   :  { %1619 = vmatpush.msra.mxu0 %v4067_v23  ;;  %1639 = vmatpush.msrb.mxu1 %v4068_v25  ;;  %v4077_v23 = vld [vmem:[#allocation60_spill] sm:$0xff] }
 0x471   :  { %1580 = vmatpush.msra.mxu2 %v4069_v52  ;;  %1600 = vmatpush.msrb.mxu3 %v4070_v28 }
 0x472   :  { %1620 = vmatpush.msra.mxu0 %v4071_v29  ;;  %1640 = vmatpush.msrb.mxu1 %v4072_v30  ;;  %v4078_v30 = vld [vmem:[#allocation59_spill] sm:$0xff] }
 0x4cf   :  { %v1340_v32 = vpop.f32.mrf.mxu1  ;;  %v1320_v38 = vpop.f32.mrf.mxu0 }
 0x4d0   :  { %v1346_v33 = vadd.f32 %v1340_v32, %v4073_v26  ;;  %v1345_v62 = vadd.f32 %v1320_v38, %v4076_v2  ;;  %v4079_v26 = vld [vmem:[#allocation61_spill] sm:$0xff] }
 0x4d2   :  { %v2069_v34 = vmul.f32 -1.442695, %v1346_v33 }
 0x4d4   :  { %2180 = vpow2.f32 %v2069_v34  ;;  %v1280_v47 = vpop.f32.mrf.mxu2  ;;  %v1300_v36 = vpop.f32.mrf.mxu3 }
 0x4d5   :  { %v1343_v12 = vadd.f32 %v1280_v47, %v4074_v6  ;;  %v1344_v44 = vadd.f32 %v1300_v36, %v4075_v43 }
 0x4d7   :  { %v2067_v19 = vmul.f32 -1.442695, %v1343_v12  ;;  %v2068_v37 = vmul.f32 -1.442695, %v1344_v44 }
 0x4d9   :  { %2182 = vpow2.f32 %v2067_v19 }
 0x4da   :  { %v2181_v57 = vpop.eup %2180  ;;  %2184 = vpow2.f32 %v2068_v37 }
 0x4db   :  { %v1389_v40 = vadd.f32 1.0, %v2181_v57 }
 0x4dd   :  { %2186 = vrcp.f32 %v1389_v40  ;;  %v1401_v39 = vand.u32 2147483648, %v1389_v40  ;;  %vm1395_vm4 = vweird.f32 %v1389_v40  ;;  %v1399_v7 = vand.u32 2147483647, %v1389_v40 }
 0x4df   :  { %v2183_v15 = vpop.eup %2182  ;;  %v1402_v45 = vor.u32 1.1754944e-38, %v1401_v39  ;;  %vm1400_vm6 = vcmp.eq.f32.partialorder %v1399_v7, 8.507059e+37  ;;  %v1864_v7 = vld [vmem:[%s3750_s14 + $0x78] sm:$0xff] }
 0x4e0   :  { %v2185_v14 = vpop.eup %2184  ;;  %v1350_v27 = vadd.f32 1.0, %v2183_v15  ;;  %v4080_v15 = vld [vmem:[#allocation62_spill] sm:$0xff] }
 0x4e1   :  { %v1369_v42 = vadd.f32 1.0, %v2185_v14 }
 0x4e2   :  { %2188 = vrcp.f32 %v1350_v27  ;;  %v1362_v4 = vand.u32 2147483648, %v1350_v27  ;;  %v1360_v56 = vand.u32 2147483647, %v1350_v27  ;;  %vm1356_vm12 = vweird.f32 %v1350_v27 }
 0x4e3   :  { %2190 = vrcp.f32 %v1369_v42  ;;  %v2187_v48 = vpop.eup %2186  ;;  %v1381_v31 = vand.u32 2147483648, %v1369_v42  ;;  %v1379_v8 = vand.u32 2147483647, %v1369_v42  ;;  %vm1375_vm14 = vweird.f32 %v1369_v42 }
 0x4e4   :  { %v1391_v55 = vmul.f32 %v2187_v48, %v1389_v40  ;;  %2192 = vtanh.f32 %v1345_v62  ;;  %v1363_v21 = vor.u32 1.1754944e-38, %v1362_v4  ;;  %vm1361_vm15 = vcmp.eq.f32.partialorder %v1360_v56, 8.507059e+37 }
 0x4e5   :  { %v1382_v9 = vor.u32 1.1754944e-38, %v1381_v31  ;;  %vm1380_vm2 = vcmp.eq.f32.partialorder %v1379_v8, 8.507059e+37  ;;  %vm1396_vm3 = vweird.f32 %v2187_v48 }
 0x4e6   :  { %v1392_v46 = vsub.f32 1.0, %v1391_v55  ;;  %vm1397_vm5 = vmor %vm1395_vm4, %vm1396_vm3  ;;  %vm1746_vm4 = vcmask 1045504  }
 0x4e8   :  { %v2189_v35 = vpop.eup %2188  ;;  %v1393_v41 = vmul.f32 %v2187_v48, %v1392_v46 }
 0x4e9   :  { %v2191_v17 = vpop.eup %2190  ;;  %v1352_v10 = vmul.f32 %v2189_v35, %v1350_v27  ;;  %vm1357_vm10 = vweird.f32 %v2189_v35 }
 0x4ea   :  { %v1371_v51 = vmul.f32 %v2191_v17, %v1369_v42  ;;  %vm1376_vm11 = vweird.f32 %v2191_v17  ;;  %vm1358_vm13 = vmor %vm1356_vm12, %vm1357_vm10  ;;  %v2193_v60 = vpop.eup %2192  ;;  %v1394_v1 = vadd.f32 %v2187_v48, %v1393_v41 }
 0x4eb   :  { %v1353_v22 = vsub.f32 1.0, %v1352_v10  ;;  %vm1377_vm0 = vmor %vm1375_vm14, %vm1376_vm11 }
 0x4ec   :  { %v1372_v63 = vsub.f32 1.0, %v1371_v51  ;;  %v1398_v54 = vsel %vm1397_vm5, %v2187_v48, %v1394_v1  ;;  %vm1742_vm5 = vcmask 48128  }
 0x4ed   :  { %v1354_v11 = vmul.f32 %v2189_v35, %v1353_v22  ;;  %v1403_v53 = vsel %vm1400_vm6, %v1402_v45, %v1398_v54  ;;  %v1728_v54 = vld [vmem:[%s3743_s7 + $0x70] sm:$0xff] }
 0x4ee   :  { %v1373_v50 = vmul.f32 %v2191_v17, %v1372_v63  ;;  %v1863_v45 = vld [vmem:[%s3750_s14 + $0x70] sm:$0xff] }
 0x4ef   :  { %v1355_v13 = vadd.f32 %v2189_v35, %v1354_v11 }
 0x4f0   :  { %v1374_v18 = vadd.f32 %v2191_v17, %v1373_v50 }
 0x4f1   :  { %v1359_v16 = vsel %vm1358_vm13, %v2189_v35, %v1355_v13 }
 0x4f2   :  { %v1364_v20 = vsel %vm1361_vm15, %v1363_v21, %v1359_v16  ;;  %v1378_v49 = vsel %vm1377_vm0, %v2191_v17, %v1374_v18 }
 0x4f3   :  { %v1383_v59 = vsel %vm1380_vm2, %v1382_v9, %v1378_v49  ;;  %v1406_v24 = vmul.f32 %v2193_v60, %v1364_v20 }
 0x4f4   :  { %v1405_v61 = vmul.f32 %v1383_v59, %v3451_v3 }
 0x4f6   :  { %v3523_v58 = vadd.f32 %v1406_v24, %v1405_v61 }
 0x4f8   :  { %2194 = vtanh.f32 %v3523_v58 }
 0x4fe   :  { %v2195_v5 = vpop.eup %2194 }
 0x4ff   :  { %v1409_v0 = vmul.f32 %v2195_v5, %v1403_v53  ;;  %v1727_v5 = vld [vmem:[%s3743_s7 + $0x68] sm:$0xff] }
 0x500   :  { %v1862_v53 = vld [vmem:[%s3750_s14 + $0x68] sm:$0xff] }
 0x501   :  { %1430 = vmatmul.f32.vlgmr.msrb.gmra.mxu2 %v1409_v0  ;;  %1450 = vmatmul.f32.vlgmr.msra.gmra.mxu3 %v1409_v0 }
 0x502   :  { %1470 = vmatmul.f32.vlgmr.msrb.gmra.mxu0 %v1409_v0  ;;  %1490 = vmatmul.f32.vlgmr.msra.gmra.mxu1 %v1409_v0  ;;  %v1726_v0 = vld [vmem:[%s3743_s7 + $0x60] sm:$0xff] }
 0x503   :  { %1900 = vmatpush.msrb.mxu0 %v1864_v7 }
 0x505   :  { %1901 = vmatpush.msrb.mxu0 %v1863_v45 }
 0x507   :  { %1902 = vmatpush.msrb.mxu0 %v1862_v53 }
 0x57f   :  { %v1491_v3 = vpop.f32.mrf.mxu1  ;;  %v1471_v37 = vpop.f32.mrf.mxu0 }
 0x580   :  { %v1497_v25 = vadd.f32 %v1491_v3, %v4077_v23  ;;  %v1496_v14 = vadd.f32 %v1471_v37, %v4080_v15  ;;  %v1861_v3 = vld [vmem:[%s3750_s14 + $0x60] sm:$0xff]  ;;  %v1725_v23 = vld [vmem:[%s3743_s7 + $0x58] sm:$0xff]  ;;  %v1855_v37 = vld [vmem:[%s3750_s14 + $0x30] sm:$0xff] }
 0x581   :  { %1903 = vmatpush.msrb.mxu0 %v1861_v3  ;;  %v1730_v15 = vld [vmem:[%s3744_s8] sm:$0x3f] }
 0x582   :  { %v2072_v52 = vmul.f32 -1.442695, %v1497_v25  ;;  %v1860_v25 = vld [vmem:[%s3750_s14 + $0x58] sm:$0xff]  ;;  %2076 = vmatpush.msk.msrb.mxu2 %vm1746_vm4, %v1730_v15 }
 0x583   :  { %1904 = vmatpush.msrb.mxu0 %v1860_v25 }
 0x584   :  { %2196 = vpow2.f32 %v2072_v52  ;;  %v1431_v28 = vpop.f32.mrf.mxu2  ;;  %v1451_v29 = vpop.f32.mrf.mxu3  ;;  %v1724_v52 = vld [vmem:[%s3743_s7 + $0x50] sm:$0xff] }
 0x585   :  { %v1494_v32 = vadd.f32 %v1431_v28, %v4078_v30  ;;  %v1495_v33 = vadd.f32 %v1451_v29, %v4079_v26  ;;  %v1859_v28 = vld [vmem:[%s3750_s14 + $0x50] sm:$0xff]  ;;  %v4081_v29 = vld [vmem:[#allocation41_spill] sm:$0xff] }
 0x586   :  { %v4082_v30 = vld [vmem:[#allocation12_spill] sm:$0xff]  ;;  %1905 = vmatpush.msrb.mxu0 %v1859_v28 }
 0x587   :  { %v2070_v34 = vmul.f32 -1.442695, %v1494_v32  ;;  %v2071_v47 = vmul.f32 -1.442695, %v1495_v33  ;;  %v406_v32 = vadd.f32 %v4082_v30, %v4081_v29  ;;  %v1723_v33 = vld [vmem:[%s3743_s7 + $0x48] sm:$0xff] }
 0x589   :  { %2198 = vpow2.f32 %v2070_v34  ;;  %v1858_v34 = vld [vmem:[%s3750_s14 + $0x48] sm:$0xff] }
 0x58a   :  { %v2197_v36 = vpop.eup %2196  ;;  %2200 = vpow2.f32 %v2071_v47  ;;  %1906 = vmatpush.msrb.mxu0 %v1858_v34 }
 0x58b   :  { %v1540_v6 = vadd.f32 1.0, %v2197_v36  ;;  %v1722_v36 = vld [vmem:[%s3743_s7 + $0x40] sm:$0xff] }
 0x58d   :  { %2202 = vrcp.f32 %v1540_v6  ;;  %v1552_v49 = vand.u32 2147483648, %v1540_v6  ;;  %vm1546_vm0 = vweird.f32 %v1540_v6  ;;  %v1550_v59 = vand.u32 2147483647, %v1540_v6 }
 0x58f   :  { %v2199_v12 = vpop.eup %2198  ;;  %v1553_v24 = vor.u32 1.1754944e-38, %v1552_v49  ;;  %vm1551_vm3 = vcmp.eq.f32.partialorder %v1550_v59, 8.507059e+37  ;;  %v4086_v59 = vld [vmem:[#allocation65_spill] sm:$0xff] }
 0x590   :  { %v2201_v43 = vpop.eup %2200  ;;  %v1501_v44 = vadd.f32 1.0, %v2199_v12 }
 0x591   :  { %v1520_v19 = vadd.f32 1.0, %v2201_v43  ;;  %v1721_v43 = vld [vmem:[%s3743_s7 + $0x38] sm:$0xff] }
 0x592   :  { %2204 = vrcp.f32 %v1501_v44  ;;  %v1513_v2 = vand.u32 2147483648, %v1501_v44  ;;  %v1511_v10 = vand.u32 2147483647, %v1501_v44  ;;  %vm1507_vm9 = vweird.f32 %v1501_v44 }
 0x593   :  { %2206 = vrcp.f32 %v1520_v19  ;;  %v2203_v57 = vpop.eup %2202  ;;  %v1532_v51 = vand.u32 2147483648, %v1520_v19  ;;  %v1530_v22 = vand.u32 2147483647, %v1520_v19  ;;  %vm1526_vm11 = vweird.f32 %v1520_v19 }
 0x594   :  { %v1542_v48 = vmul.f32 %v2203_v57, %v1540_v6  ;;  %2208 = vtanh.f32 %v1496_v14  ;;  %v1514_v11 = vor.u32 1.1754944e-38, %v1513_v2  ;;  %vm1512_vm12 = vcmp.eq.f32.partialorder %v1511_v10, 8.507059e+37  ;;  %v1857_v6 = vld [vmem:[%s3750_s14 + $0x40] sm:$0xff]  ;;  %v4083_v14 = vld [vmem:[#allocation63_spill] sm:$0xff] }
 0x595   :  { %v1533_v50 = vor.u32 1.1754944e-38, %v1532_v51  ;;  %vm1531_vm14 = vcmp.eq.f32.partialorder %v1530_v22, 8.507059e+37  ;;  %vm1547_vm15 = vweird.f32 %v2203_v57  ;;  %1907 = vmatpush.msrb.mxu0 %v1857_v6  ;;  %v1853_v10 = vld [vmem:[%s3750_s14 + $0x20] sm:$0xff]  ;;  %v1852_v22 = vld [vmem:[%s3750_s14 + $0x18] sm:$0xff] }
 0x596   :  { %v1543_v4 = vsub.f32 1.0, %v1542_v48  ;;  %vm1548_vm2 = vmor %vm1546_vm0, %vm1547_vm15  ;;  %v1719_v48 = vld [vmem:[%s3743_s7 + $0x28] sm:$0xff]  ;;  %v3617_v51 = vld [vmem:[%s4085_s23] sm:$0xff] }
 0x598   :  { %v2205_v40 = vpop.eup %2204  ;;  %v1544_v18 = vmul.f32 %v2203_v57, %v1543_v4 }
 0x599   :  { %v2207_v27 = vpop.eup %2206  ;;  %v1503_v42 = vmul.f32 %v2205_v40, %v1501_v44  ;;  %vm1508_vm7 = vweird.f32 %v2205_v40  ;;  %v1856_v44 = vld [vmem:[%s3750_s14 + $0x38] sm:$0xff] }
 0x59a   :  { %v1522_v38 = vmul.f32 %v2207_v27, %v1520_v19  ;;  %vm1527_vm8 = vweird.f32 %v2207_v27  ;;  %vm1509_vm10 = vmor %vm1507_vm9, %vm1508_vm7  ;;  %v2209_v8 = vpop.eup %2208  ;;  %v1545_v20 = vadd.f32 %v2203_v57, %v1544_v18  ;;  %v1720_v19 = vld [vmem:[%s3743_s7 + $0x30] sm:$0xff]  ;;  %1908 = vmatpush.msrb.mxu0 %v1856_v44 }
 0x59b   :  { %v1504_v35 = vsub.f32 1.0, %v1503_v42  ;;  %vm1528_vm13 = vmor %vm1526_vm11, %vm1527_vm8  ;;  %v4084_v42 = vld [vmem:[#allocation64_spill] sm:$0xff] }
 0x59c   :  { %v1523_v62 = vsub.f32 1.0, %v1522_v38  ;;  %v1549_v41 = vsel %vm1548_vm2, %v2203_v57, %v1545_v20  ;;  %1909 = vmatpush.msrb.mxu0 %v1855_v37 }
 0x59d   :  { %v1505_v17 = vmul.f32 %v2205_v40, %v1504_v35  ;;  %v1554_v1 = vsel %vm1551_vm3, %v1553_v24, %v1549_v41  ;;  %v1854_v35 = vld [vmem:[%s3750_s14 + $0x28] sm:$0xff] }
 0x59e   :  { %v1524_v55 = vmul.f32 %v2207_v27, %v1523_v62  ;;  %1910 = vmatpush.msrb.mxu0 %v1854_v35  ;;  %v1740_v35 = vld [vmem:[%s3748_s12 + $0x18] sm:$0xff] }
 0x59f   :  { %v1506_v63 = vadd.f32 %v2205_v40, %v1505_v17  ;;  %v1718_v17 = vld [vmem:[%s3743_s7 + $0x20] sm:$0xff] }
 0x5a0   :  { %v1525_v56 = vadd.f32 %v2207_v27, %v1524_v55  ;;  %v1717_v55 = vld [vmem:[%s3743_s7 + $0x18] sm:$0xff]  ;;  %1911 = vmatpush.msrb.mxu0 %v1853_v10 }
 0x5a1   :  { %v1510_v31 = vsel %vm1509_vm10, %v2205_v40, %v1506_v63  ;;  %v1716_v63 = vld [vmem:[%s3743_s7 + $0x10] sm:$0xff] }
 0x5a2   :  { %v1515_v46 = vsel %vm1512_vm12, %v1514_v11, %v1510_v31  ;;  %v1529_v13 = vsel %vm1528_vm13, %v2207_v27, %v1525_v56  ;;  %v1851_v11 = vld [vmem:[%s3750_s14 + $0x10] sm:$0xff]  ;;  %1912 = vmatpush.msrb.mxu0 %v1852_v22  ;;  %v1715_v31 = vld [vmem:[%s3743_s7 + $0x8] sm:$0xff] }
 0x5a3   :  { %v1534_v21 = vsel %vm1531_vm14, %v1533_v50, %v1529_v13  ;;  %v1557_v16 = vmul.f32 %v2209_v8, %v1515_v46  ;;  %v1850_v50 = vld [vmem:[%s3750_s14 + $0x8] sm:$0xff]  ;;  %v1714_v46 = vld [vmem:[%s3743_s7] sm:$0xff] }
 0x5a4   :  { %v1556_v9 = vmul.f32 %v1534_v21, %v3523_v58  ;;  %v1729_v58 = vld [vmem:[%s3743_s7 + $0x78] sm:$0xff]  ;;  %1913 = vmatpush.msrb.mxu0 %v1851_v11  ;;  %v1849_v13 = vld [vmem:[%s3750_s14] sm:$0xff] }
 0x5a5   :  { %1770 = vmatpush.msra.mxu3 %v1729_v58  ;;  %v1737_v11 = vld [vmem:[%s3748_s12] sm:$0xff] }
 0x5a6   :  { %v3531_v60 = vadd.f32 %v1557_v16, %v1556_v9  ;;  %1914 = vmatpush.msrb.mxu0 %v1850_v50 }
 0x5a7   :  { %1771 = vmatpush.msra.mxu3 %v1728_v54 }
 0x5a8   :  { %2210 = vtanh.f32 %v3531_v60  ;;  %1915 = vmatpush.msrb.mxu0 %v1849_v13  ;;  %v1870_v13 = vld [vmem:[%s3753_s17 + $0x18] sm:$0xff] }
 0x5a9   :  { %1772 = vmatpush.msra.mxu3 %v1727_v5  ;;  %1943 = vmatpush.msra.mxu1 %v1870_v13 }
 0x5ab   :  { %1773 = vmatpush.msra.mxu3 %v1726_v0 }
 0x5ad   :  { %1774 = vmatpush.msra.mxu3 %v1725_v23 }
 0x5ae   :  { %v2211_v61 = vpop.eup %2210 }
 0x5af   :  { %v1560_v39 = vmul.f32 %v2211_v61, %v1554_v1  ;;  %1775 = vmatpush.msra.mxu3 %v1724_v52 }
 0x5b1   :  { %1581 = vmatmul.f32.vlgmr.msra.gmra.mxu2 %v1560_v39  ;;  %1601 = vmatmul.f32.vlgmr.msrb.gmra.mxu3 %v1560_v39 }
 0x5b2   :  { %1621 = vmatmul.f32.vlgmr.msra.gmra.mxu0 %v1560_v39  ;;  %1641 = vmatmul.f32.vlgmr.msrb.gmra.mxu1 %v1560_v39 }
 0x5b3   :  { %1776 = vmatpush.msra.mxu3 %v1723_v33 }
 0x5b5   :  { %1777 = vmatpush.msra.mxu3 %v1722_v36 }
 0x5b7   :  { %1778 = vmatpush.msra.mxu3 %v1721_v43 }
 0x5b9   :  { %1779 = vmatpush.msra.mxu3 %v1720_v19  ;;  %2077 = vmatmul.msk.f32.vlgmr.msrb.gmra.mxu2 %vm1742_vm5, %v3617_v51 }
 0x5bb   :  { %1780 = vmatpush.msra.mxu3 %v1719_v48  ;;  %v1732_v48 = vld [vmem:[%s3746_s10] sm:$0xff] }
 0x5bd   :  { %1781 = vmatpush.msra.mxu3 %v1718_v17  ;;  %v2094_v17 = vld [vmem:[%s3745_s9] ss:$0 sm:$0xff] }
 0x5bf   :  { %1782 = vmatpush.msra.mxu3 %v1717_v55 }
 0x5c1   :  { %1783 = vmatpush.msra.mxu3 %v1716_v63  ;;  %v1738_v63 = vld [vmem:[%s3748_s12 + $0x8] sm:$0xff] }
 0x5c3   :  { %1784 = vmatpush.msra.mxu3 %v1715_v31  ;;  %v2095_v31 = vld [vmem:[%s3747_s11] ss:$0 sm:$0xff]  ;;  %s1997_s11 = sshll.u32 %s3758_s22, 4  ;;  %s1998_s11 = int_to_ptr.hbm [resolvable:$true] %s1997_s11 }
 0x5c5   :  { %1785 = vmatpush.msra.mxu3 %v1714_v46 }
 0x62f   :  { %v1642_v26 = vpop.f32.mrf.mxu1  ;;  %v1622_v9 = vpop.f32.mrf.mxu0 }
 0x630   :  { %v1648_v47 = vadd.f32 %v1642_v26, %v406_v32  ;;  %v1647_v41 = vadd.f32 %v1622_v9, %v4086_v59  ;;  %v1874_v9 = vld [vmem:[%s3755_s19 + $0x10] sm:$0xff] }
 0x632   :  { %v2075_v12 = vmul.f32 -1.442695, %v1648_v47 }
 0x634   :  { %2212 = vpow2.f32 %v2075_v12  ;;  %v1582_v57 = vpop.f32.mrf.mxu2  ;;  %v1602_v40 = vpop.f32.mrf.mxu3 }
 0x635   :  { %v1645_v27 = vadd.f32 %v1582_v57, %v4083_v14  ;;  %v1646_v38 = vadd.f32 %v1602_v40, %v4084_v42  ;;  %v1734_v42 = vld [vmem:[%s3746_s10 + $0x10] sm:$0xff] }
 0x637   :  { %v2073_v2 = vmul.f32 -1.442695, %v1645_v27  ;;  %v2074_v62 = vmul.f32 -1.442695, %v1646_v38  ;;  %v1733_v38 = vld [vmem:[%s3746_s10 + $0x8] sm:$0xff] }
 0x639   :  { %2214 = vpow2.f32 %v2073_v2  ;;  %v1739_v2 = vld [vmem:[%s3748_s12 + $0x10] sm:$0xff]  ;;  %s1986_s12 = sshll.u32 %s3757_s21, 4  ;;  %s1987_s12 = int_to_ptr.hbm [resolvable:$true] %s1986_s12 }
 0x63a   :  { %v2213_v4 = vpop.eup %2212  ;;  %2216 = vpow2.f32 %v2074_v62 }
 0x63b   :  { %v3633_v56 = vadd.f32 1.0, %v2213_v4 }
 0x63c   :  { %v1767_v62 = vpop.f32.mrf.mxu2 }
 0x63d   :  { %2218 = vrcp.f32 %v3633_v56  ;;  %v1703_v44 = vand.u32 2147483648, %v3633_v56  ;;  %vm1697_vm15 = vweird.f32 %v3633_v56  ;;  %v1701_v19 = vand.u32 2147483647, %v3633_v56 }
 0x63f   :  { %v2215_v8 = vpop.eup %2214  ;;  %v1704_v57 = vor.u32 1.1754944e-38, %v1703_v44  ;;  %vm1702_vm2 = vcmp.eq.f32.partialorder %v1701_v19, 8.507059e+37 }
 0x640   :  { %v2217_v21 = vpop.eup %2216  ;;  %v1652_v18 = vadd.f32 1.0, %v2215_v8 }
 0x641   :  { %v1671_v16 = vadd.f32 1.0, %v2217_v21  ;;  %v1869_v21 = vld [vmem:[%s3753_s17 + $0x10] sm:$0xff] }
 0x642   :  { %2220 = vrcp.f32 %v1652_v18  ;;  %v1664_v7 = vand.u32 2147483648, %v1652_v18  ;;  %v1662_v5 = vand.u32 2147483647, %v1652_v18  ;;  %vm1658_vm8 = vweird.f32 %v1652_v18  ;;  %1944 = vmatpush.msra.mxu1 %v1869_v21 }
 0x643   :  { %2222 = vrcp.f32 %v1671_v16  ;;  %v2219_v20 = vpop.eup %2218  ;;  %v1683_v53 = vand.u32 2147483648, %v1671_v16  ;;  %v1681_v3 = vand.u32 2147483647, %v1671_v16  ;;  %vm1677_vm10 = vweird.f32 %v1671_v16 }
 0x644   :  { %v1693_v39 = vmul.f32 %v2219_v20, %v3633_v56  ;;  %2224 = vtanh.f32 %v1647_v41  ;;  %v1665_v52 = vor.u32 1.1754944e-38, %v1664_v7  ;;  %vm1663_vm11 = vcmp.eq.f32.partialorder %v1662_v5, 8.507059e+37  ;;  %v1865_v56 = vld [vmem:[%s3751_s15] sm:$0x3f]  ;;  %v1873_v7 = vld [vmem:[%s3755_s19 + $0x8] sm:$0xff]  ;;  %s2375_s15 = smov [#allocation7]  }
 0x645   :  { %v1684_v30 = vor.u32 1.1754944e-38, %v1683_v53  ;;  %vm1682_vm13 = vcmp.eq.f32.partialorder %v1681_v3, 8.507059e+37  ;;  %vm1698_vm14 = vweird.f32 %v2219_v20  ;;  %v2097_v41 = vld [vmem:[%s3752_s16] ss:$0 sm:$0xff]  ;;  %s2374_s16 = smov [#allocation6]  }
 0x646   :  { %v1694_v23 = vsub.f32 1.0, %v1693_v39  ;;  %vm1699_vm0 = vmor %vm1697_vm15, %vm1698_vm14  ;;  %s1984_s7 = sshll.u32 %s2374_s16, 4  ;;  %v2099_v3 = vld [vmem:[%s3756_s20] ss:$0 sm:$0xff]  ;;  %s1985_s7 = int_to_ptr.vmem [resolvable:$true] %s1984_s7 }
 0x648   :  { %v2221_v49 = vpop.eup %2220  ;;  %v1695_v47 = vmul.f32 %v2219_v20, %v1694_v23 }
 0x649   :  { %v2223_v24 = vpop.eup %2222  ;;  %v1654_v61 = vmul.f32 %v2221_v49, %v1652_v18  ;;  %vm1659_vm6 = vweird.f32 %v2221_v49  ;;  %v1868_v18 = vld [vmem:[%s3753_s17 + $0x8] sm:$0xff] }
 0x64a   :  { %v1673_v1 = vmul.f32 %v2223_v24, %v1671_v16  ;;  %vm1678_vm7 = vweird.f32 %v2223_v24  ;;  %vm1660_vm9 = vmor %vm1658_vm8, %vm1659_vm6  ;;  %v2225_v32 = vpop.eup %2224  ;;  %v1696_v43 = vadd.f32 %v2219_v20, %v1695_v47  ;;  %1945 = vmatpush.msra.mxu1 %v1868_v18  ;;  %v1867_v16 = vld [vmem:[%s3753_s17] sm:$0xff] }
 0x64b   :  { %v1655_v58 = vsub.f32 1.0, %v1654_v61  ;;  %vm1679_vm12 = vmor %vm1677_vm10, %vm1678_vm7 }
 0x64c   :  { %v1674_v54 = vsub.f32 1.0, %v1673_v1  ;;  %v1700_v37 = vsel %vm1699_vm0, %v2219_v20, %v1696_v43  ;;  %1946 = vmatpush.msra.mxu1 %v1867_v16  ;;  %v2096_v20 = vld [vmem:[%s3749_s13] ss:$0 sm:$0xff] }
 0x64d   :  { %v1656_v45 = vmul.f32 %v2221_v49, %v1655_v58  ;;  %v1705_v15 = vsel %vm1702_vm2, %v1704_v57, %v1700_v37 }
 0x64e   :  { %v1675_v0 = vmul.f32 %v2223_v24, %v1674_v54  ;;  %v1872_v54 = vld [vmem:[%s3755_s19] sm:$0xff] }
 0x64f   :  { %v1657_v25 = vadd.f32 %v2221_v49, %v1656_v45  ;;  %v2098_v45 = vld [vmem:[%s3754_s18] ss:$0 sm:$0xff]  ;;  %s1995_s18 = sshll.u32 %s2375_s15, 4  ;;  %s1996_s18 = int_to_ptr.vmem [resolvable:$true] %s1995_s18 }
 0x650   :  { %v1676_v28 = vadd.f32 %v2223_v24, %v1675_v0 }
 0x651   :  { %v1661_v29 = vsel %vm1660_vm9, %v2221_v49, %v1657_v25 }
 0x652   :  { %v1680_v26 = vsel %vm1679_vm12, %v2223_v24, %v1676_v28  ;;  %v1666_v33 = vsel %vm1663_vm11, %v1665_v52, %v1661_v29 }
 0x653   :  { %v1685_v34 = vsel %vm1682_vm13, %v1684_v30, %v1680_v26  ;;  %v1708_v36 = vmul.f32 %v2225_v32, %v1666_v33 }
 0x654   :  { %v1707_v6 = vmul.f32 %v1685_v34, %v3531_v60  ;;  %v1735_v60 = vld [vmem:[%s3746_s10 + $0x18] sm:$0xff] }
 0x655   :  { %1813 = vmatpush.msra.mxu2 %v1735_v60 }
 0x656   :  { %v1709_v12 = vadd.f32 %v1708_v36, %v1707_v6 }
 0x657   :  { %1814 = vmatpush.msra.mxu2 %v1734_v42 }
 0x658   :  { %2226 = vtanh.f32 %v1709_v12 }
 0x659   :  { %1815 = vmatpush.msra.mxu2 %v1733_v38 }
 0x65b   :  { %1816 = vmatpush.msra.mxu2 %v1732_v48 }
 0x65d   :  { %1840 = vmatpush.msrb.mxu2 %v1740_v35 }
 0x65e   :  { %v2227_v40 = vpop.eup %2226 }
 0x65f   :  { %v1711_v14 = vmul.f32 %v2227_v40, %v1705_v15  ;;  %1841 = vmatpush.msrb.mxu2 %v1739_v2 }
 0x661   :  { %v1712_v27 = vmax.f32 %v1711_v14, 0.0  ;;  %1842 = vmatpush.msrb.mxu2 %v1738_v63 }
 0x663   :  { %1786 = vmatmul.f32.vlgmr.msra.gmra.mxu3 %v1712_v27  ;;  %1916 = vmatmul.f32.vlgmr.msrb.gmra.mxu0 %v1712_v27 }
 0x664   :  { %1843 = vmatpush.msrb.mxu2 %v1737_v11 }
 0x6e0   :  { %v1917_v24 = vpop.f32.mrf.mxu0 }
 0x6e6   :  { %v1787_v10 = vpop.f32.mrf.mxu3 }
 0x6e7   :  { %v1788_v55 = vadd.f32 %v1787_v10, %v1767_v62 }
 0x6e9   :  { %v1793_v22 = vadd.f32 %v2094_v17, %v1788_v55 }
 0x6eb   :  { %v1794_v4 = vmax.f32 %v1793_v22, 0.0 }
 0x6ed   :  { %2078 = vmatmul.msk.f32.vlgmr.msra.gmra.mxu2 %vm219_vm1, %v1794_v4 }
 0x6ee   :  { %2080 = vmatpush.msk.msra.mxu2 %vm1746_vm4, %v1865_v56 }
 0x770   :  { %v1818_v50 = vpop.f32.mrf.mxu2 }
 0x771   :  { %v1819_v8 = vadd.f32 %v2095_v31, %v1818_v50 }
 0x773   :  { %v1821_v46 = vmax.f32 %v1819_v8, 0.0 }
 0x775   :  { %2079 = vmatmul.msk.f32.vlgmr.msrb.gmra.mxu2 %vm219_vm1, %v1821_v46 }
 0x77d   :  { %2081 = vmatmul.msk.f32.vlgmr.msra.gmra.mxu2 %vm1742_vm5, %v3617_v51  ;;  %v1875_v51 = vld [vmem:[%s3755_s19 + $0x18] sm:$0xff] }
 0x77e   :  { %1970 = vmatpush.msrb.mxu2 %v1875_v51 }
 0x780   :  { %1971 = vmatpush.msrb.mxu2 %v1874_v9 }
 0x782   :  { %1972 = vmatpush.msrb.mxu2 %v1873_v7 }
 0x784   :  { %1973 = vmatpush.msrb.mxu2 %v1872_v54 }
 0x7f8   :  { %v1845_v49 = vpop.f32.mrf.mxu2 }
 0x7f9   :  { %v1846_v59 = vadd.f32 %v2096_v20, %v1845_v49 }
 0x7fb   :  { %1848 = vst [vmem:[#allocation6] sm:$0xff] %v1846_v59 }
 0x7fc   :  { %1989 = dma.vmem_to_hbm [thread:$0]  %s1985_s7, 128, %s1987_s12, [#allocation5]  }
 0x800   :  { %v1897_v61 = vpop.f32.mrf.mxu2 }
 0x801   :  { %v1918_v1 = vadd.f32 %v1917_v24, %v1897_v61 }
 0x803   :  { %v1923_v39 = vadd.f32 %v2097_v41, %v1918_v1 }
 0x805   :  { %v1924_v58 = vmax.f32 %v1923_v39, 0.0 }
 0x807   :  { %2082 = vmatmul.msk.f32.vlgmr.msra.gmra.mxu1 %vm219_vm1, %v1924_v58 }
 0x884   :  { %v1948_v5 = vpop.f32.mrf.mxu1 }
 0x885   :  { %v1949_v53 = vadd.f32 %v2098_v45, %v1948_v5 }
 0x887   :  { %v1951_v0 = vmax.f32 %v1949_v53, 0.0 }
 0x889   :  { %2083 = vmatmul.msk.f32.vlgmr.msrb.gmra.mxu2 %vm219_vm1, %v1951_v0 }
 0x90c   :  { %v1975_v23 = vpop.f32.mrf.mxu2 }
 0x90d   :  { %v1976_v25 = vadd.f32 %v2099_v3, %v1975_v23 }
 0x90f   :  { %1978 = vst [vmem:[#allocation7] sm:$0xff] %v1976_v25 }
 0x910   :  { %2000 = dma.vmem_to_hbm [thread:$0]  %s1996_s18, 128, %s1998_s11, [#allocation8]  }
 0x911   :  { %2366 = dma.done.wait [#allocation5], 128  }
 0x912   :  { %2367 = vsyncadd [#allocation5], 4294967168 }
 0x913   :  { %2368 = dma.done.wait [#allocation8], 128  }
 0x914   :  { %2369 = vsyncadd [#allocation8], 4294967168 }
 0x915   :  { %2009 = vsyncpa [#allocation4], 1 }
 0x916   :  { %2010 = vsyncpa [#allocation5], 1 }
 0x917   :  { %2011 = vsyncpa [#allocation8], 1 }

</bundles_post_ra>
